<compile_context>
chip_gen: v7x
topology: tpu7x:2x2x1
jax: 0.10.0
libtpu: 0.0.40
codegen_flags: <defaults>
</compile_context>

<pallas_src>
import functools

import jax
import jax.numpy as jnp
from jax.experimental import pallas as pl
from jax.experimental.pallas import tpu as pltpu

_LANE = 128
_SUBLANE = 8


# ----------------------------------------------------------------------------
# small helpers
# ----------------------------------------------------------------------------

def _round_up(x, m):
    return ((x + m - 1) // m) * m


def _pad2d(x, rows, cols):
    r, c = x.shape
    if r == rows and c == cols:
        return x
    return jnp.pad(x, ((0, rows - r), (0, cols - c)))


def _pick_tk(kp, tk_max):
    """Largest multiple of 128 that divides kp and is <= tk_max."""
    best = _LANE
    t = 2 * _LANE
    while t <= min(kp, tk_max):
        if kp % t == 0:
            best = t
        t += _LANE
    return best


def _vmem_spec():
    return pl.BlockSpec(memory_space=pltpu.MemorySpace.VMEM)


# ----------------------------------------------------------------------------
# Pallas kernels
# ----------------------------------------------------------------------------

def _matmul_kernel(*refs, relu, has_res):
    """Tiled A@B with f32 accumulator; fused affine (+residual) (+ReLU)."""
    if has_res:
        a_ref, b_ref, s_ref, t_ref, r_ref, o_ref, acc_ref = refs
    else:
        a_ref, b_ref, s_ref, t_ref, o_ref, acc_ref = refs
        r_ref = None

    @pl.when(pl.program_id(2) == 0)
    def _init():
        acc_ref[...] = jnp.zeros_like(acc_ref)

    acc_ref[...] += jnp.dot(a_ref[...], b_ref[...],
                            preferred_element_type=jnp.float32)

    @pl.when(pl.program_id(2) == pl.num_programs(2) - 1)
    def _finalize():
        out = acc_ref[...] * s_ref[...] + t_ref[...]     # epilogue stays f32
        if has_res:
            out = out + r_ref[...]
        if relu:
            out = jnp.maximum(out, 0.0)
        o_ref[...] = out.astype(o_ref.dtype)


def matmul_affine(a, mm, *, relu, residual=None, tm_max=256, tk_max=512):
    """A[M,K] @ prepacked B[Kp,Np] (bf16) with fused affine/residual/ReLU."""
    b, scale, shift, n_true = mm["b"], mm["scale"], mm["shift"], mm["n"]
    m, k = a.shape
    kp, np_ = b.shape
    assert kp % _LANE == 0 and np_ % _LANE == 0 and k <= kp

    mp = _round_up(m, _SUBLANE)
    if mp <= tm_max:
        tm = mp
    else:
        tm = tm_max                       # multiple of 8
        mp = _round_up(m, tm)
    tk = _pick_tk(kp, tk_max)
    tn = _LANE

    a_p = _pad2d(a, mp, kp).astype(jnp.bfloat16)   # bf16 MXU operands

    in_specs = [
        pl.BlockSpec((tm, tk), lambda i, j, kk: (i, kk)),
        pl.BlockSpec((tk, tn), lambda i, j, kk: (kk, j)),
        pl.BlockSpec((1, tn), lambda i, j, kk: (0, j)),
        pl.BlockSpec((1, tn), lambda i, j, kk: (0, j)),
    ]
    args = [a_p, b, scale, shift]
    if residual is not None:
        in_specs.append(pl.BlockSpec((tm, tn), lambda i, j, kk: (i, j)))
        args.append(_pad2d(residual.astype(jnp.float32), mp, np_))

    kernel = functools.partial(_matmul_kernel, relu=relu,
                               has_res=residual is not None)
    out = pl.pallas_call(
        kernel,
        out_shape=jax.ShapeDtypeStruct((mp, np_), jnp.float32),
        grid=(mp // tm, np_ // tn, kp // tk),
        in_specs=in_specs,
        out_specs=pl.BlockSpec((tm, tn), lambda i, j, kk: (i, j)),
        scratch_shapes=[pltpu.VMEM((tm, tn), jnp.float32)],
        compiler_params=pltpu.CompilerParams(
            dimension_semantics=("parallel", "parallel", "arbitrary"),
            vmem_limit_bytes=32 * 1024 * 1024),
    )(*args)
    return out[:m, :n_true]


def _max_kernel(*refs):
    """Running max over N input refs (elementwise)."""
    o_ref = refs[-1]
    m = refs[0][...]
    for r in refs[1:-1]:
        m = jnp.maximum(m, r[...])
    o_ref[...] = m


# ----------------------------------------------------------------------------
# conv / pooling wrappers (im2col glue in JAX, matmuls in Pallas)
# ----------------------------------------------------------------------------

def _im2col(x_nhwc, kh, kw, stride, pad):
    n, h, w, c = x_nhwc.shape
    xp = jnp.pad(x_nhwc, ((0, 0), (pad, pad), (pad, pad), (0, 0)))
    oh = (h + 2 * pad - kh) // stride + 1
    ow = (w + 2 * pad - kw) // stride + 1
    slices = []
    for i in range(kh):
        for j in range(kw):
            slices.append(xp[:, i:i + oh * stride:stride,
                             j:j + ow * stride:stride, :])
    patches = jnp.concatenate(slices, axis=-1)      # (N, OH, OW, kh*kw*C)
    return patches.reshape(n * oh * ow, kh * kw * c), (n, oh, ow)


def conv2d(x_nhwc, layer, relu, residual=None):
    a, (n, oh, ow) = _im2col(x_nhwc, layer["kh"], layer["kw"],
                             layer["stride"], layer["pad"])
    out = matmul_affine(a, layer["mm"], relu=relu, residual=residual)
    return out.reshape(n, oh, ow, layer["cout"])


def deconv_subpixel(x_nhwc, layer):
    """ConvTranspose2d(4, s=2, p=1)+BN+ReLU via sub-pixel decomposition:
    one 3x3/s1/p1 matmul yields all 4 output phases (columns = (ph,pw,cout))."""
    n, h, w, _ = x_nhwc.shape
    cout = layer["cout"]
    a, _ = _im2col(x_nhwc, 3, 3, 1, 1)
    out = matmul_affine(a, layer["mm"], relu=True)          # (N*H*W, 4*cout)
    out = out.reshape(n, h, w, 2, 2, cout)
    out = jnp.transpose(out, (0, 1, 3, 2, 4, 5)).reshape(n, 2 * h, 2 * w, cout)
    return out


def maxpool2d(x_nhwc, k=3, stride=2, pad=1):
    n, h, w, c = x_nhwc.shape
    xp = jnp.pad(x_nhwc, ((0, 0), (pad, pad), (pad, pad), (0, 0)),
                 constant_values=float("-inf"))
    oh = (h + 2 * pad - k) // stride + 1
    ow = (w + 2 * pad - k) // stride + 1
    size = n * oh * ow * c
    shp = (size // _LANE, _LANE) if size % _LANE == 0 else (n * oh * ow, c)
    taps = []
    for i in range(k):
        for j in range(k):
            t = xp[:, i:i + oh * stride:stride, j:j + ow * stride:stride, :]
            taps.append(t.reshape(shp))
    out = pl.pallas_call(
        _max_kernel,
        out_shape=jax.ShapeDtypeStruct(shp, x_nhwc.dtype),
        in_specs=[_vmem_spec()] * len(taps),
        out_specs=_vmem_spec(),
    )(*taps)
    return out.reshape(n, oh, ow, c)


# ----------------------------------------------------------------------------
# parameter construction + weight prepacking (all done once at init)
# ----------------------------------------------------------------------------

def _conv_w(key, cout, cin, kh, kw):
    std = (2.0 / (cin * kh * kw)) ** 0.5
    return std * jax.random.normal(key, (cout, cin, kh, kw), dtype=jnp.float32)


def _bn_fold(key, c, eps=1e-5):
    k1, k2, k3, k4 = jax.random.split(key, 4)
    gamma = 1.0 + 0.1 * jax.random.normal(k1, (c,), dtype=jnp.float32)
    beta = 0.1 * jax.random.normal(k2, (c,), dtype=jnp.float32)
    mean = 0.1 * jax.random.normal(k3, (c,), dtype=jnp.float32)
    var = 1.0 + 0.1 * jax.random.uniform(k4, (c,), dtype=jnp.float32)
    s = gamma / jnp.sqrt(var + eps)
    t = beta - mean * s
    return s, t


def _pack_matmul(w_kn, scale, shift):
    k, n = w_kn.shape
    kp = _round_up(k, _LANE)
    np_ = _round_up(n, _LANE)
    return {
        "b": _pad2d(w_kn, kp, np_).astype(jnp.bfloat16),
        "scale": _pad2d(scale.reshape(1, n).astype(jnp.float32), 1, np_),
        "shift": _pad2d(shift.reshape(1, n).astype(jnp.float32), 1, np_),
        "n": n,
    }


def _pack_conv(w_oihw, scale, shift, stride, pad):
    cout, cin, kh, kw = w_oihw.shape
    # im2col tap ordering is (kh, kw, cin) -> pack the weight the same way.
    w_kn = jnp.transpose(w_oihw, (2, 3, 1, 0)).reshape(kh * kw * cin, cout)
    return {"mm": _pack_matmul(w_kn, scale, shift),
            "kh": kh, "kw": kw, "stride": stride, "pad": pad, "cout": cout}


def _pack_deconv_subpixel(w_iohw, scale, shift):
    """Pack ConvTranspose2d(4,2,1) weight (Cin,Cout,4,4) into a (9*Cin,4*Cout)
    matrix for a 3x3/s1/p1 im2col; columns ordered (ph, pw, cout)."""
    cin, cout, kh_, kw_ = w_iohw.shape
    assert (kh_, kw_) == (4, 4)
    # (phase, window-tap index) -> transposed-conv kernel index
    tap = {(0, 0): 3, (0, 1): 1, (1, 1): 2, (1, 2): 0}
    w6 = jnp.zeros((3, 3, cin, 2, 2, cout), dtype=jnp.float32)
    for (ph, i), r in tap.items():
        for (pw, j), s in tap.items():
            w6 = w6.at[i, j, :, ph, pw, :].set(w_iohw[:, :, r, s])
    w_kn = w6.reshape(9 * cin, 4 * cout)
    return {"mm": _pack_matmul(w_kn, jnp.tile(scale, 4), jnp.tile(shift, 4)),
            "cout": cout}


def _basic_block_params(key, cin, cout, stride):
    ks = jax.random.split(key, 6)
    bn1 = _bn_fold(ks[2], cout)
    bn2 = _bn_fold(ks[3], cout)
    blk = {
        "conv1": _pack_conv(_conv_w(ks[0], cout, cin, 3, 3), *bn1, stride, 1),
        "conv2": _pack_conv(_conv_w(ks[1], cout, cout, 3, 3), *bn2, 1, 1),
        "down": None,
    }
    if stride != 1 or cin != cout:
        dbn = _bn_fold(ks[5], cout)
        blk["down"] = _pack_conv(_conv_w(ks[4], cout, cin, 1, 1), *dbn,
                                 stride, 0)
    return blk


def init_params(key, in_ch=3, widths=(16, 16, 32, 64, 128),
                deconv_dim=64, num_keypoints=8):
    keys = iter(jax.random.split(key, 64))
    params = {}
    # stem: 7x7 s2 conv + BN + ReLU
    stem_w = _conv_w(next(keys), widths[0], in_ch, 7, 7)
    stem_bn = _bn_fold(next(keys), widths[0])
    params["stem"] = _pack_conv(stem_w, *stem_bn, 2, 3)
    # 4 stages x 2 BasicBlocks (ResNet18 topology)
    stage_cfg = [(widths[0], widths[1], 1), (widths[1], widths[2], 2),
                 (widths[2], widths[3], 2), (widths[3], widths[4], 2)]
    params["layers"] = []
    for cin, cout, stride in stage_cfg:
        params["layers"].append([
            _basic_block_params(next(keys), cin, cout, stride),
            _basic_block_params(next(keys), cout, cout, 1),
        ])
    # upsampling: 3 x ConvTranspose2d(4, s=2, p=1) + BN + ReLU
    params["deconv"] = []
    cin = widths[4]
    for _ in range(3):
        w = (2.0 / (cin * 16)) ** 0.5 * jax.random.normal(
            next(keys), (cin, deconv_dim, 4, 4), dtype=jnp.float32)
        bn = _bn_fold(next(keys), deconv_dim)
        params["deconv"].append(_pack_deconv_subpixel(w, *bn))
        cin = deconv_dim
    # head: 1x1 conv, weight ~ N(0, 0.001), bias = 0 (as in the PyTorch init)
    head_w = 0.001 * jax.random.normal(
        next(keys), (num_keypoints, deconv_dim, 1, 1), dtype=jnp.float32)
    params["head"] = _pack_conv(head_w,
                                jnp.ones((num_keypoints,), jnp.float32),
                                jnp.zeros((num_keypoints,), jnp.float32),
                                1, 0)
    return params


# ----------------------------------------------------------------------------
# forward pass (= PoseResNetDANN.forward: backbone -> upsampling -> head)
# ----------------------------------------------------------------------------

def basic_block(x, blk):
    out = conv2d(x, blk["conv1"], relu=True)
    if blk["down"] is not None:
        identity = conv2d(x, blk["down"], relu=False)
    else:
        identity = x
    n, oh, ow, c = identity.shape
    # residual add + ReLU fused into conv2's matmul epilogue
    return conv2d(out, blk["conv2"], relu=True,
                  residual=identity.reshape(n * oh * ow, c))


def pose_resnet_dann_forward(params, x_nchw):
    x = jnp.transpose(x_nchw, (0, 2, 3, 1))        # NCHW -> NHWC
    # --- backbone ---
    x = conv2d(x, params["stem"], relu=True)
    x = maxpool2d(x, k=3, stride=2, pad=1)
    for stage in params["layers"]:
        for blk in stage:
            x = basic_block(x, blk)
    # --- upsampling (Simple Baseline deconv head, sub-pixel form) ---
    for d in params["deconv"]:
        x = deconv_subpixel(x, d)
    # --- head: 1x1 conv with bias ---
    x = conv2d(x, params["head"], relu=False)
    return jnp.transpose(x, (0, 3, 1, 2))          # back to NCHW


if __name__ == "__main__":
    key = jax.random.PRNGKey(0)
    pkey, xkey = jax.random.split(key)
    params = init_params(pkey)
    x = jax.random.normal(xkey, (2, 3, 32, 32), dtype=jnp.float32)  # NCHW

    forward = jax.jit(functools.partial(pose_resnet_dann_forward, params))
    out = jax.block_until_ready(forward(x))

    assert out.shape == (2, 8, 8, 8), out.shape
    assert jnp.all(jnp.isfinite(out))
    print("KERNEL_OK")
</pallas_src>

<mosaic_0001>
module attributes {stable_mosaic.version = 11 : i64} {
  func.func @_matmul_kernel(%arg0: i32, %arg1: i32, %arg2: i32, %arg3: memref<256x256xbf16, #tpu.memory_space<vmem>>, %arg4: memref<256x128xbf16, #tpu.memory_space<vmem>>, %arg5: memref<1x128xf32, #tpu.memory_space<vmem>>, %arg6: memref<1x128xf32, #tpu.memory_space<vmem>>, %arg7: memref<256x128xf32, #tpu.memory_space<vmem>>, %arg8: memref<256x128xf32, #tpu.memory_space<vmem>>) attributes {dimension_semantics = [#tpu.dimension_semantics<parallel>, #tpu.dimension_semantics<parallel>, #tpu.dimension_semantics<arbitrary>], iteration_bounds = array<i64: 2, 1, 1>, scalar_prefetch = 0 : i64, scratch_operands = 1 : i64, tpu.core_type = #tpu.core_type<tc>, window_params = [{transform_indices = @transform_0, window_bounds = array<i64: 256, 256>}, {transform_indices = @transform_1, window_bounds = array<i64: 256, 128>}, {transform_indices = @transform_2, window_bounds = array<i64: 1, 128>}, {transform_indices = @transform_3, window_bounds = array<i64: 1, 128>}, {transform_indices = @transform_4, window_bounds = array<i64: 256, 128>}]} {
    %c0_i32 = arith.constant 0 : i32
    %0 = arith.cmpi eq, %arg2, %c0_i32 : i32
    %1 = arith.extui %0 : i1 to i32
    %c0_i32_0 = arith.constant 0 : i32
    %2 = arith.cmpi ne, %1, %c0_i32_0 : i32
    scf.if %2 {
      %cst_10 = arith.constant 0.000000e+00 : f32
      %12 = vector.broadcast %cst_10 : f32 to vector<256x128xf32>
      %c0_11 = arith.constant 0 : index
      %c0_12 = arith.constant 0 : index
      %13 = vector.load %arg8[%c0_11, %c0_12] : memref<256x128xf32, #tpu.memory_space<vmem>>, vector<256x128xf32>
      tpu.vector_store %arg8[%c0_11, %c0_12], %12 {strides = array<i32>} : memref<256x128xf32, #tpu.memory_space<vmem>>, vector<256x128xf32>,
    } else {
    }
    %c0 = arith.constant 0 : index
    %c0_1 = arith.constant 0 : index
    %3 = vector.load %arg8[%c0, %c0_1] : memref<256x128xf32, #tpu.memory_space<vmem>>, vector<256x128xf32>
    %c0_2 = arith.constant 0 : index
    %c0_3 = arith.constant 0 : index
    %4 = vector.load %arg3[%c0_2, %c0_3] : memref<256x256xbf16, #tpu.memory_space<vmem>>, vector<256x256xbf16>
    %c0_4 = arith.constant 0 : index
    %c0_5 = arith.constant 0 : index
    %5 = vector.load %arg4[%c0_4, %c0_5] : memref<256x128xbf16, #tpu.memory_space<vmem>>, vector<256x128xbf16>
    %cst = arith.constant dense<0.000000e+00> : vector<256x128xf32>
    %6 = tpu.matmul %4, %5, %cst {dimension_numbers = #tpu.dot_dimension_numbers<[1], [0], [0], [1], [0, 0, 1, 1], [], []>} : vector<256x256xbf16>, vector<256x128xbf16>, vector<256x128xf32> -> vector<256x128xf32>
    %7 = arith.addf %3, %6 : vector<256x128xf32>
    %c0_6 = arith.constant 0 : index
    %c0_7 = arith.constant 0 : index
    %8 = vector.load %arg8[%c0_6, %c0_7] : memref<256x128xf32, #tpu.memory_space<vmem>>, vector<256x128xf32>
    tpu.vector_store %arg8[%c0_6, %c0_7], %7 {strides = array<i32>} : memref<256x128xf32, #tpu.memory_space<vmem>>, vector<256x128xf32>,
    %c0_i32_8 = arith.constant 0 : i32
    %9 = arith.cmpi eq, %arg2, %c0_i32_8 : i32
    %10 = arith.extui %9 : i1 to i32
    %c0_i32_9 = arith.constant 0 : i32
    %11 = arith.cmpi ne, %10, %c0_i32_9 : i32
    scf.if %11 {
      %c0_10 = arith.constant 0 : index
      %c0_11 = arith.constant 0 : index
      %12 = vector.load %arg8[%c0_10, %c0_11] : memref<256x128xf32, #tpu.memory_space<vmem>>, vector<256x128xf32>
      %c0_12 = arith.constant 0 : index
      %c0_13 = arith.constant 0 : index
      %13 = vector.load %arg5[%c0_12, %c0_13] : memref<1x128xf32, #tpu.memory_space<vmem>>, vector<1x128xf32>
      %14 = vector.broadcast %13 : vector<1x128xf32> to vector<256x128xf32>
      %15 = arith.mulf %12, %14 : vector<256x128xf32>
      %c0_14 = arith.constant 0 : index
      %c0_15 = arith.constant 0 : index
      %16 = vector.load %arg6[%c0_14, %c0_15] : memref<1x128xf32, #tpu.memory_space<vmem>>, vector<1x128xf32>
      %17 = vector.broadcast %16 : vector<1x128xf32> to vector<256x128xf32>
      %18 = arith.addf %15, %17 : vector<256x128xf32>
      %cst_16 = arith.constant 0.000000e+00 : f32
      %19 = vector.broadcast %cst_16 : f32 to vector<256x128xf32>
      %20 = arith.maximumf %18, %19 : vector<256x128xf32>
      %c0_17 = arith.constant 0 : index
      %c0_18 = arith.constant 0 : index
      %21 = vector.load %arg7[%c0_17, %c0_18] : memref<256x128xf32, #tpu.memory_space<vmem>>, vector<256x128xf32>
      tpu.vector_store %arg7[%c0_17, %c0_18], %20 {strides = array<i32>} : memref<256x128xf32, #tpu.memory_space<vmem>>, vector<256x128xf32>,
    } else {
    }
    return
  }
  func.func @transform_0(%arg0: i32, %arg1: i32, %arg2: i32) -> (i32, i32) {
    %c0_i32 = arith.constant 0 : i32
    return %arg0, %arg2 : i32, i32
  }
  func.func @transform_1(%arg0: i32, %arg1: i32, %arg2: i32) -> (i32, i32) {
    %c0_i32 = arith.constant 0 : i32
    return %arg2, %arg1 : i32, i32
  }
  func.func @transform_2(%arg0: i32, %arg1: i32, %arg2: i32) -> (i32, i32) {
    %c0_i32 = arith.constant 0 : i32
    %c0_i32_0 = arith.constant 0 : i32
    return %c0_i32, %arg1 : i32, i32
  }
  func.func @transform_3(%arg0: i32, %arg1: i32, %arg2: i32) -> (i32, i32) {
    %c0_i32 = arith.constant 0 : i32
    %c0_i32_0 = arith.constant 0 : i32
    return %c0_i32, %arg1 : i32, i32
  }
  func.func @transform_4(%arg0: i32, %arg1: i32, %arg2: i32) -> (i32, i32) {
    %c0_i32 = arith.constant 0 : i32
    return %arg0, %arg1 : i32, i32
  }
}

module attributes {stable_mosaic.version = 11 : i64} {
  func.func @_max_kernel(%arg0: memref<16x128xf32, #tpu.memory_space<vmem>>, %arg1: memref<16x128xf32, #tpu.memory_space<vmem>>, %arg2: memref<16x128xf32, #tpu.memory_space<vmem>>, %arg3: memref<16x128xf32, #tpu.memory_space<vmem>>, %arg4: memref<16x128xf32, #tpu.memory_space<vmem>>, %arg5: memref<16x128xf32, #tpu.memory_space<vmem>>, %arg6: memref<16x128xf32, #tpu.memory_space<vmem>>, %arg7: memref<16x128xf32, #tpu.memory_space<vmem>>, %arg8: memref<16x128xf32, #tpu.memory_space<vmem>>, %arg9: memref<16x128xf32, #tpu.memory_space<vmem>>) attributes {dimension_semantics = [], scalar_prefetch = 0 : i64, scratch_operands = 0 : i64, tpu.core_type = #tpu.core_type<tc>} {
    %c0 = arith.constant 0 : index
    %c0_0 = arith.constant 0 : index
    %0 = vector.load %arg0[%c0, %c0_0] : memref<16x128xf32, #tpu.memory_space<vmem>>, vector<16x128xf32>
    %c0_1 = arith.constant 0 : index
    %c0_2 = arith.constant 0 : index
    %1 = vector.load %arg1[%c0_1, %c0_2] : memref<16x128xf32, #tpu.memory_space<vmem>>, vector<16x128xf32>
    %2 = arith.maximumf %0, %1 : vector<16x128xf32>
    %c0_3 = arith.constant 0 : index
    %c0_4 = arith.constant 0 : index
    %3 = vector.load %arg2[%c0_3, %c0_4] : memref<16x128xf32, #tpu.memory_space<vmem>>, vector<16x128xf32>
    %4 = arith.maximumf %2, %3 : vector<16x128xf32>
    %c0_5 = arith.constant 0 : index
    %c0_6 = arith.constant 0 : index
    %5 = vector.load %arg3[%c0_5, %c0_6] : memref<16x128xf32, #tpu.memory_space<vmem>>, vector<16x128xf32>
    %6 = arith.maximumf %4, %5 : vector<16x128xf32>
    %c0_7 = arith.constant 0 : index
    %c0_8 = arith.constant 0 : index
    %7 = vector.load %arg4[%c0_7, %c0_8] : memref<16x128xf32, #tpu.memory_space<vmem>>, vector<16x128xf32>
    %8 = arith.maximumf %6, %7 : vector<16x128xf32>
    %c0_9 = arith.constant 0 : index
    %c0_10 = arith.constant 0 : index
    %9 = vector.load %arg5[%c0_9, %c0_10] : memref<16x128xf32, #tpu.memory_space<vmem>>, vector<16x128xf32>
    %10 = arith.maximumf %8, %9 : vector<16x128xf32>
    %c0_11 = arith.constant 0 : index
    %c0_12 = arith.constant 0 : index
    %11 = vector.load %arg6[%c0_11, %c0_12] : memref<16x128xf32, #tpu.memory_space<vmem>>, vector<16x128xf32>
    %12 = arith.maximumf %10, %11 : vector<16x128xf32>
    %c0_13 = arith.constant 0 : index
    %c0_14 = arith.constant 0 : index
    %13 = vector.load %arg7[%c0_13, %c0_14] : memref<16x128xf32, #tpu.memory_space<vmem>>, vector<16x128xf32>
    %14 = arith.maximumf %12, %13 : vector<16x128xf32>
    %c0_15 = arith.constant 0 : index
    %c0_16 = arith.constant 0 : index
    %15 = vector.load %arg8[%c0_15, %c0_16] : memref<16x128xf32, #tpu.memory_space<vmem>>, vector<16x128xf32>
    %16 = arith.maximumf %14, %15 : vector<16x128xf32>
    %c0_17 = arith.constant 0 : index
    %c0_18 = arith.constant 0 : index
    %17 = vector.load %arg9[%c0_17, %c0_18] : memref<16x128xf32, #tpu.memory_space<vmem>>, vector<16x128xf32>
    tpu.vector_store %arg9[%c0_17, %c0_18], %16 {strides = array<i32>} : memref<16x128xf32, #tpu.memory_space<vmem>>, vector<16x128xf32>,
    return
  }
}

module attributes {stable_mosaic.version = 11 : i64} {
  func.func @_matmul_kernel(%arg0: i32, %arg1: i32, %arg2: i32, %arg3: memref<128x256xbf16, #tpu.memory_space<vmem>>, %arg4: memref<256x128xbf16, #tpu.memory_space<vmem>>, %arg5: memref<1x128xf32, #tpu.memory_space<vmem>>, %arg6: memref<1x128xf32, #tpu.memory_space<vmem>>, %arg7: memref<128x128xf32, #tpu.memory_space<vmem>>, %arg8: memref<128x128xf32, #tpu.memory_space<vmem>>) attributes {dimension_semantics = [#tpu.dimension_semantics<parallel>, #tpu.dimension_semantics<parallel>, #tpu.dimension_semantics<arbitrary>], iteration_bounds = array<i64: 1, 1, 1>, scalar_prefetch = 0 : i64, scratch_operands = 1 : i64, tpu.core_type = #tpu.core_type<tc>, window_params = [{transform_indices = @transform_0, window_bounds = array<i64: 128, 256>}, {transform_indices = @transform_1, window_bounds = array<i64: 256, 128>}, {transform_indices = @transform_2, window_bounds = array<i64: 1, 128>}, {transform_indices = @transform_3, window_bounds = array<i64: 1, 128>}, {transform_indices = @transform_4, window_bounds = array<i64: 128, 128>}]} {
    %c0_i32 = arith.constant 0 : i32
    %0 = arith.cmpi eq, %arg2, %c0_i32 : i32
    %1 = arith.extui %0 : i1 to i32
    %c0_i32_0 = arith.constant 0 : i32
    %2 = arith.cmpi ne, %1, %c0_i32_0 : i32
    scf.if %2 {
      %cst_10 = arith.constant 0.000000e+00 : f32
      %12 = vector.broadcast %cst_10 : f32 to vector<128x128xf32>
      %c0_11 = arith.constant 0 : index
      %c0_12 = arith.constant 0 : index
      %13 = vector.load %arg8[%c0_11, %c0_12] : memref<128x128xf32, #tpu.memory_space<vmem>>, vector<128x128xf32>
      tpu.vector_store %arg8[%c0_11, %c0_12], %12 {strides = array<i32>} : memref<128x128xf32, #tpu.memory_space<vmem>>, vector<128x128xf32>,
    } else {
    }
    %c0 = arith.constant 0 : index
    %c0_1 = arith.constant 0 : index
    %3 = vector.load %arg8[%c0, %c0_1] : memref<128x128xf32, #tpu.memory_space<vmem>>, vector<128x128xf32>
    %c0_2 = arith.constant 0 : index
    %c0_3 = arith.constant 0 : index
    %4 = vector.load %arg3[%c0_2, %c0_3] : memref<128x256xbf16, #tpu.memory_space<vmem>>, vector<128x256xbf16>
    %c0_4 = arith.constant 0 : index
    %c0_5 = arith.constant 0 : index
    %5 = vector.load %arg4[%c0_4, %c0_5] : memref<256x128xbf16, #tpu.memory_space<vmem>>, vector<256x128xbf16>
    %cst = arith.constant dense<0.000000e+00> : vector<128x128xf32>
    %6 = tpu.matmul %4, %5, %cst {dimension_numbers = #tpu.dot_dimension_numbers<[1], [0], [0], [1], [0, 0, 1, 1], [], []>} : vector<128x256xbf16>, vector<256x128xbf16>, vector<128x128xf32> -> vector<128x128xf32>
    %7 = arith.addf %3, %6 : vector<128x128xf32>
    %c0_6 = arith.constant 0 : index
    %c0_7 = arith.constant 0 : index
    %8 = vector.load %arg8[%c0_6, %c0_7] : memref<128x128xf32, #tpu.memory_space<vmem>>, vector<128x128xf32>
    tpu.vector_store %arg8[%c0_6, %c0_7], %7 {strides = array<i32>} : memref<128x128xf32, #tpu.memory_space<vmem>>, vector<128x128xf32>,
    %c0_i32_8 = arith.constant 0 : i32
    %9 = arith.cmpi eq, %arg2, %c0_i32_8 : i32
    %10 = arith.extui %9 : i1 to i32
    %c0_i32_9 = arith.constant 0 : i32
    %11 = arith.cmpi ne, %10, %c0_i32_9 : i32
    scf.if %11 {
      %c0_10 = arith.constant 0 : index
      %c0_11 = arith.constant 0 : index
      %12 = vector.load %arg8[%c0_10, %c0_11] : memref<128x128xf32, #tpu.memory_space<vmem>>, vector<128x128xf32>
      %c0_12 = arith.constant 0 : index
      %c0_13 = arith.constant 0 : index
      %13 = vector.load %arg5[%c0_12, %c0_13] : memref<1x128xf32, #tpu.memory_space<vmem>>, vector<1x128xf32>
      %14 = vector.broadcast %13 : vector<1x128xf32> to vector<128x128xf32>
      %15 = arith.mulf %12, %14 : vector<128x128xf32>
      %c0_14 = arith.constant 0 : index
      %c0_15 = arith.constant 0 : index
      %16 = vector.load %arg6[%c0_14, %c0_15] : memref<1x128xf32, #tpu.memory_space<vmem>>, vector<1x128xf32>
      %17 = vector.broadcast %16 : vector<1x128xf32> to vector<128x128xf32>
      %18 = arith.addf %15, %17 : vector<128x128xf32>
      %cst_16 = arith.constant 0.000000e+00 : f32
      %19 = vector.broadcast %cst_16 : f32 to vector<128x128xf32>
      %20 = arith.maximumf %18, %19 : vector<128x128xf32>
      %c0_17 = arith.constant 0 : index
      %c0_18 = arith.constant 0 : index
      %21 = vector.load %arg7[%c0_17, %c0_18] : memref<128x128xf32, #tpu.memory_space<vmem>>, vector<128x128xf32>
      tpu.vector_store %arg7[%c0_17, %c0_18], %20 {strides = array<i32>} : memref<128x128xf32, #tpu.memory_space<vmem>>, vector<128x128xf32>,
    } else {
    }
    return
  }
  func.func @transform_0(%arg0: i32, %arg1: i32, %arg2: i32) -> (i32, i32) {
    %c0_i32 = arith.constant 0 : i32
    return %arg0, %arg2 : i32, i32
  }
  func.func @transform_1(%arg0: i32, %arg1: i32, %arg2: i32) -> (i32, i32) {
    %c0_i32 = arith.constant 0 : i32
    return %arg2, %arg1 : i32, i32
  }
  func.func @transform_2(%arg0: i32, %arg1: i32, %arg2: i32) -> (i32, i32) {
    %c0_i32 = arith.constant 0 : i32
    %c0_i32_0 = arith.constant 0 : i32
    return %c0_i32, %arg1 : i32, i32
  }
  func.func @transform_3(%arg0: i32, %arg1: i32, %arg2: i32) -> (i32, i32) {
    %c0_i32 = arith.constant 0 : i32
    %c0_i32_0 = arith.constant 0 : i32
    return %c0_i32, %arg1 : i32, i32
  }
  func.func @transform_4(%arg0: i32, %arg1: i32, %arg2: i32) -> (i32, i32) {
    %c0_i32 = arith.constant 0 : i32
    return %arg0, %arg1 : i32, i32
  }
}

module attributes {stable_mosaic.version = 11 : i64} {
  func.func @_matmul_kernel(%arg0: i32, %arg1: i32, %arg2: i32, %arg3: memref<128x256xbf16, #tpu.memory_space<vmem>>, %arg4: memref<256x128xbf16, #tpu.memory_space<vmem>>, %arg5: memref<1x128xf32, #tpu.memory_space<vmem>>, %arg6: memref<1x128xf32, #tpu.memory_space<vmem>>, %arg7: memref<128x128xf32, #tpu.memory_space<vmem>>, %arg8: memref<128x128xf32, #tpu.memory_space<vmem>>, %arg9: memref<128x128xf32, #tpu.memory_space<vmem>>) attributes {dimension_semantics = [#tpu.dimension_semantics<parallel>, #tpu.dimension_semantics<parallel>, #tpu.dimension_semantics<arbitrary>], iteration_bounds = array<i64: 1, 1, 1>, scalar_prefetch = 0 : i64, scratch_operands = 1 : i64, tpu.core_type = #tpu.core_type<tc>, window_params = [{transform_indices = @transform_0, window_bounds = array<i64: 128, 256>}, {transform_indices = @transform_1, window_bounds = array<i64: 256, 128>}, {transform_indices = @transform_2, window_bounds = array<i64: 1, 128>}, {transform_indices = @transform_3, window_bounds = array<i64: 1, 128>}, {transform_indices = @transform_4, window_bounds = array<i64: 128, 128>}, {transform_indices = @transform_5, window_bounds = array<i64: 128, 128>}]} {
    %c0_i32 = arith.constant 0 : i32
    %0 = arith.cmpi eq, %arg2, %c0_i32 : i32
    %1 = arith.extui %0 : i1 to i32
    %c0_i32_0 = arith.constant 0 : i32
    %2 = arith.cmpi ne, %1, %c0_i32_0 : i32
    scf.if %2 {
      %cst_10 = arith.constant 0.000000e+00 : f32
      %12 = vector.broadcast %cst_10 : f32 to vector<128x128xf32>
      %c0_11 = arith.constant 0 : index
      %c0_12 = arith.constant 0 : index
      %13 = vector.load %arg9[%c0_11, %c0_12] : memref<128x128xf32, #tpu.memory_space<vmem>>, vector<128x128xf32>
      tpu.vector_store %arg9[%c0_11, %c0_12], %12 {strides = array<i32>} : memref<128x128xf32, #tpu.memory_space<vmem>>, vector<128x128xf32>,
    } else {
    }
    %c0 = arith.constant 0 : index
    %c0_1 = arith.constant 0 : index
    %3 = vector.load %arg9[%c0, %c0_1] : memref<128x128xf32, #tpu.memory_space<vmem>>, vector<128x128xf32>
    %c0_2 = arith.constant 0 : index
    %c0_3 = arith.constant 0 : index
    %4 = vector.load %arg3[%c0_2, %c0_3] : memref<128x256xbf16, #tpu.memory_space<vmem>>, vector<128x256xbf16>
    %c0_4 = arith.constant 0 : index
    %c0_5 = arith.constant 0 : index
    %5 = vector.load %arg4[%c0_4, %c0_5] : memref<256x128xbf16, #tpu.memory_space<vmem>>, vector<256x128xbf16>
    %cst = arith.constant dense<0.000000e+00> : vector<128x128xf32>
    %6 = tpu.matmul %4, %5, %cst {dimension_numbers = #tpu.dot_dimension_numbers<[1], [0], [0], [1], [0, 0, 1, 1], [], []>} : vector<128x256xbf16>, vector<256x128xbf16>, vector<128x128xf32> -> vector<128x128xf32>
    %7 = arith.addf %3, %6 : vector<128x128xf32>
    %c0_6 = arith.constant 0 : index
    %c0_7 = arith.constant 0 : index
    %8 = vector.load %arg9[%c0_6, %c0_7] : memref<128x128xf32, #tpu.memory_space<vmem>>, vector<128x128xf32>
    tpu.vector_store %arg9[%c0_6, %c0_7], %7 {strides = array<i32>} : memref<128x128xf32, #tpu.memory_space<vmem>>, vector<128x128xf32>,
    %c0_i32_8 = arith.constant 0 : i32
    %9 = arith.cmpi eq, %arg2, %c0_i32_8 : i32
    %10 = arith.extui %9 : i1 to i32
    %c0_i32_9 = arith.constant 0 : i32
    %11 = arith.cmpi ne, %10, %c0_i32_9 : i32
    scf.if %11 {
      %c0_10 = arith.constant 0 : index
      %c0_11 = arith.constant 0 : index
      %12 = vector.load %arg9[%c0_10, %c0_11] : memref<128x128xf32, #tpu.memory_space<vmem>>, vector<128x128xf32>
      %c0_12 = arith.constant 0 : index
      %c0_13 = arith.constant 0 : index
      %13 = vector.load %arg5[%c0_12, %c0_13] : memref<1x128xf32, #tpu.memory_space<vmem>>, vector<1x128xf32>
      %14 = vector.broadcast %13 : vector<1x128xf32> to vector<128x128xf32>
      %15 = arith.mulf %12, %14 : vector<128x128xf32>
      %c0_14 = arith.constant 0 : index
      %c0_15 = arith.constant 0 : index
      %16 = vector.load %arg6[%c0_14, %c0_15] : memref<1x128xf32, #tpu.memory_space<vmem>>, vector<1x128xf32>
      %17 = vector.broadcast %16 : vector<1x128xf32> to vector<128x128xf32>
      %18 = arith.addf %15, %17 : vector<128x128xf32>
      %c0_16 = arith.constant 0 : index
      %c0_17 = arith.constant 0 : index
      %19 = vector.load %arg7[%c0_16, %c0_17] : memref<128x128xf32, #tpu.memory_space<vmem>>, vector<128x128xf32>
      %20 = arith.addf %18, %19 : vector<128x128xf32>
      %cst_18 = arith.constant 0.000000e+00 : f32
      %21 = vector.broadcast %cst_18 : f32 to vector<128x128xf32>
      %22 = arith.maximumf %20, %21 : vector<128x128xf32>
      %c0_19 = arith.constant 0 : index
      %c0_20 = arith.constant 0 : index
      %23 = vector.load %arg8[%c0_19, %c0_20] : memref<128x128xf32, #tpu.memory_space<vmem>>, vector<128x128xf32>
      tpu.vector_store %arg8[%c0_19, %c0_20], %22 {strides = array<i32>} : memref<128x128xf32, #tpu.memory_space<vmem>>, vector<128x128xf32>,
    } else {
    }
    return
  }
  func.func @transform_0(%arg0: i32, %arg1: i32, %arg2: i32) -> (i32, i32) {
    %c0_i32 = arith.constant 0 : i32
    return %arg0, %arg2 : i32, i32
  }
  func.func @transform_1(%arg0: i32, %arg1: i32, %arg2: i32) -> (i32, i32) {
    %c0_i32 = arith.constant 0 : i32
    return %arg2, %arg1 : i32, i32
  }
  func.func @transform_2(%arg0: i32, %arg1: i32, %arg2: i32) -> (i32, i32) {
    %c0_i32 = arith.constant 0 : i32
    %c0_i32_0 = arith.constant 0 : i32
    return %c0_i32, %arg1 : i32, i32
  }
  func.func @transform_3(%arg0: i32, %arg1: i32, %arg2: i32) -> (i32, i32) {
    %c0_i32 = arith.constant 0 : i32
    %c0_i32_0 = arith.constant 0 : i32
    return %c0_i32, %arg1 : i32, i32
  }
  func.func @transform_4(%arg0: i32, %arg1: i32, %arg2: i32) -> (i32, i32) {
    %c0_i32 = arith.constant 0 : i32
    return %arg0, %arg1 : i32, i32
  }
  func.func @transform_5(%arg0: i32, %arg1: i32, %arg2: i32) -> (i32, i32) {
    %c0_i32 = arith.constant 0 : i32
    return %arg0, %arg1 : i32, i32
  }
}

module attributes {stable_mosaic.version = 11 : i64} {
  func.func @_matmul_kernel(%arg0: i32, %arg1: i32, %arg2: i32, %arg3: memref<32x256xbf16, #tpu.memory_space<vmem>>, %arg4: memref<256x128xbf16, #tpu.memory_space<vmem>>, %arg5: memref<1x128xf32, #tpu.memory_space<vmem>>, %arg6: memref<1x128xf32, #tpu.memory_space<vmem>>, %arg7: memref<32x128xf32, #tpu.memory_space<vmem>>, %arg8: memref<32x128xf32, #tpu.memory_space<vmem>>) attributes {dimension_semantics = [#tpu.dimension_semantics<parallel>, #tpu.dimension_semantics<parallel>, #tpu.dimension_semantics<arbitrary>], iteration_bounds = array<i64: 1, 1, 1>, scalar_prefetch = 0 : i64, scratch_operands = 1 : i64, tpu.core_type = #tpu.core_type<tc>, window_params = [{transform_indices = @transform_0, window_bounds = array<i64: 32, 256>}, {transform_indices = @transform_1, window_bounds = array<i64: 256, 128>}, {transform_indices = @transform_2, window_bounds = array<i64: 1, 128>}, {transform_indices = @transform_3, window_bounds = array<i64: 1, 128>}, {transform_indices = @transform_4, window_bounds = array<i64: 32, 128>}]} {
    %c0_i32 = arith.constant 0 : i32
    %0 = arith.cmpi eq, %arg2, %c0_i32 : i32
    %1 = arith.extui %0 : i1 to i32
    %c0_i32_0 = arith.constant 0 : i32
    %2 = arith.cmpi ne, %1, %c0_i32_0 : i32
    scf.if %2 {
      %cst_10 = arith.constant 0.000000e+00 : f32
      %12 = vector.broadcast %cst_10 : f32 to vector<32x128xf32>
      %c0_11 = arith.constant 0 : index
      %c0_12 = arith.constant 0 : index
      %13 = vector.load %arg8[%c0_11, %c0_12] : memref<32x128xf32, #tpu.memory_space<vmem>>, vector<32x128xf32>
      tpu.vector_store %arg8[%c0_11, %c0_12], %12 {strides = array<i32>} : memref<32x128xf32, #tpu.memory_space<vmem>>, vector<32x128xf32>,
    } else {
    }
    %c0 = arith.constant 0 : index
    %c0_1 = arith.constant 0 : index
    %3 = vector.load %arg8[%c0, %c0_1] : memref<32x128xf32, #tpu.memory_space<vmem>>, vector<32x128xf32>
    %c0_2 = arith.constant 0 : index
    %c0_3 = arith.constant 0 : index
    %4 = vector.load %arg3[%c0_2, %c0_3] : memref<32x256xbf16, #tpu.memory_space<vmem>>, vector<32x256xbf16>
    %c0_4 = arith.constant 0 : index
    %c0_5 = arith.constant 0 : index
    %5 = vector.load %arg4[%c0_4, %c0_5] : memref<256x128xbf16, #tpu.memory_space<vmem>>, vector<256x128xbf16>
    %cst = arith.constant dense<0.000000e+00> : vector<32x128xf32>
    %6 = tpu.matmul %4, %5, %cst {dimension_numbers = #tpu.dot_dimension_numbers<[1], [0], [0], [1], [0, 0, 1, 1], [], []>} : vector<32x256xbf16>, vector<256x128xbf16>, vector<32x128xf32> -> vector<32x128xf32>
    %7 = arith.addf %3, %6 : vector<32x128xf32>
    %c0_6 = arith.constant 0 : index
    %c0_7 = arith.constant 0 : index
    %8 = vector.load %arg8[%c0_6, %c0_7] : memref<32x128xf32, #tpu.memory_space<vmem>>, vector<32x128xf32>
    tpu.vector_store %arg8[%c0_6, %c0_7], %7 {strides = array<i32>} : memref<32x128xf32, #tpu.memory_space<vmem>>, vector<32x128xf32>,
    %c0_i32_8 = arith.constant 0 : i32
    %9 = arith.cmpi eq, %arg2, %c0_i32_8 : i32
    %10 = arith.extui %9 : i1 to i32
    %c0_i32_9 = arith.constant 0 : i32
    %11 = arith.cmpi ne, %10, %c0_i32_9 : i32
    scf.if %11 {
      %c0_10 = arith.constant 0 : index
      %c0_11 = arith.constant 0 : index
      %12 = vector.load %arg8[%c0_10, %c0_11] : memref<32x128xf32, #tpu.memory_space<vmem>>, vector<32x128xf32>
      %c0_12 = arith.constant 0 : index
      %c0_13 = arith.constant 0 : index
      %13 = vector.load %arg5[%c0_12, %c0_13] : memref<1x128xf32, #tpu.memory_space<vmem>>, vector<1x128xf32>
      %14 = vector.broadcast %13 : vector<1x128xf32> to vector<32x128xf32>
      %15 = arith.mulf %12, %14 : vector<32x128xf32>
      %c0_14 = arith.constant 0 : index
      %c0_15 = arith.constant 0 : index
      %16 = vector.load %arg6[%c0_14, %c0_15] : memref<1x128xf32, #tpu.memory_space<vmem>>, vector<1x128xf32>
      %17 = vector.broadcast %16 : vector<1x128xf32> to vector<32x128xf32>
      %18 = arith.addf %15, %17 : vector<32x128xf32>
      %cst_16 = arith.constant 0.000000e+00 : f32
      %19 = vector.broadcast %cst_16 : f32 to vector<32x128xf32>
      %20 = arith.maximumf %18, %19 : vector<32x128xf32>
      %c0_17 = arith.constant 0 : index
      %c0_18 = arith.constant 0 : index
      %21 = vector.load %arg7[%c0_17, %c0_18] : memref<32x128xf32, #tpu.memory_space<vmem>>, vector<32x128xf32>
      tpu.vector_store %arg7[%c0_17, %c0_18], %20 {strides = array<i32>} : memref<32x128xf32, #tpu.memory_space<vmem>>, vector<32x128xf32>,
    } else {
    }
    return
  }
  func.func @transform_0(%arg0: i32, %arg1: i32, %arg2: i32) -> (i32, i32) {
    %c0_i32 = arith.constant 0 : i32
    return %arg0, %arg2 : i32, i32
  }
  func.func @transform_1(%arg0: i32, %arg1: i32, %arg2: i32) -> (i32, i32) {
    %c0_i32 = arith.constant 0 : i32
    return %arg2, %arg1 : i32, i32
  }
  func.func @transform_2(%arg0: i32, %arg1: i32, %arg2: i32) -> (i32, i32) {
    %c0_i32 = arith.constant 0 : i32
    %c0_i32_0 = arith.constant 0 : i32
    return %c0_i32, %arg1 : i32, i32
  }
  func.func @transform_3(%arg0: i32, %arg1: i32, %arg2: i32) -> (i32, i32) {
    %c0_i32 = arith.constant 0 : i32
    %c0_i32_0 = arith.constant 0 : i32
    return %c0_i32, %arg1 : i32, i32
  }
  func.func @transform_4(%arg0: i32, %arg1: i32, %arg2: i32) -> (i32, i32) {
    %c0_i32 = arith.constant 0 : i32
    return %arg0, %arg1 : i32, i32
  }
}

module attributes {stable_mosaic.version = 11 : i64} {
  func.func @_matmul_kernel(%arg0: i32, %arg1: i32, %arg2: i32, %arg3: memref<32x384xbf16, #tpu.memory_space<vmem>>, %arg4: memref<384x128xbf16, #tpu.memory_space<vmem>>, %arg5: memref<1x128xf32, #tpu.memory_space<vmem>>, %arg6: memref<1x128xf32, #tpu.memory_space<vmem>>, %arg7: memref<32x128xf32, #tpu.memory_space<vmem>>, %arg8: memref<32x128xf32, #tpu.memory_space<vmem>>, %arg9: memref<32x128xf32, #tpu.memory_space<vmem>>) attributes {dimension_semantics = [#tpu.dimension_semantics<parallel>, #tpu.dimension_semantics<parallel>, #tpu.dimension_semantics<arbitrary>], iteration_bounds = array<i64: 1, 1, 1>, scalar_prefetch = 0 : i64, scratch_operands = 1 : i64, tpu.core_type = #tpu.core_type<tc>, window_params = [{transform_indices = @transform_0, window_bounds = array<i64: 32, 384>}, {transform_indices = @transform_1, window_bounds = array<i64: 384, 128>}, {transform_indices = @transform_2, window_bounds = array<i64: 1, 128>}, {transform_indices = @transform_3, window_bounds = array<i64: 1, 128>}, {transform_indices = @transform_4, window_bounds = array<i64: 32, 128>}, {transform_indices = @transform_5, window_bounds = array<i64: 32, 128>}]} {
    %c0_i32 = arith.constant 0 : i32
    %0 = arith.cmpi eq, %arg2, %c0_i32 : i32
    %1 = arith.extui %0 : i1 to i32
    %c0_i32_0 = arith.constant 0 : i32
    %2 = arith.cmpi ne, %1, %c0_i32_0 : i32
    scf.if %2 {
      %cst_10 = arith.constant 0.000000e+00 : f32
      %12 = vector.broadcast %cst_10 : f32 to vector<32x128xf32>
      %c0_11 = arith.constant 0 : index
      %c0_12 = arith.constant 0 : index
      %13 = vector.load %arg9[%c0_11, %c0_12] : memref<32x128xf32, #tpu.memory_space<vmem>>, vector<32x128xf32>
      tpu.vector_store %arg9[%c0_11, %c0_12], %12 {strides = array<i32>} : memref<32x128xf32, #tpu.memory_space<vmem>>, vector<32x128xf32>,
    } else {
    }
    %c0 = arith.constant 0 : index
    %c0_1 = arith.constant 0 : index
    %3 = vector.load %arg9[%c0, %c0_1] : memref<32x128xf32, #tpu.memory_space<vmem>>, vector<32x128xf32>
    %c0_2 = arith.constant 0 : index
    %c0_3 = arith.constant 0 : index
    %4 = vector.load %arg3[%c0_2, %c0_3] : memref<32x384xbf16, #tpu.memory_space<vmem>>, vector<32x384xbf16>
    %c0_4 = arith.constant 0 : index
    %c0_5 = arith.constant 0 : index
    %5 = vector.load %arg4[%c0_4, %c0_5] : memref<384x128xbf16, #tpu.memory_space<vmem>>, vector<384x128xbf16>
    %cst = arith.constant dense<0.000000e+00> : vector<32x128xf32>
    %6 = tpu.matmul %4, %5, %cst {dimension_numbers = #tpu.dot_dimension_numbers<[1], [0], [0], [1], [0, 0, 1, 1], [], []>} : vector<32x384xbf16>, vector<384x128xbf16>, vector<32x128xf32> -> vector<32x128xf32>
    %7 = arith.addf %3, %6 : vector<32x128xf32>
    %c0_6 = arith.constant 0 : index
    %c0_7 = arith.constant 0 : index
    %8 = vector.load %arg9[%c0_6, %c0_7] : memref<32x128xf32, #tpu.memory_space<vmem>>, vector<32x128xf32>
    tpu.vector_store %arg9[%c0_6, %c0_7], %7 {strides = array<i32>} : memref<32x128xf32, #tpu.memory_space<vmem>>, vector<32x128xf32>,
    %c0_i32_8 = arith.constant 0 : i32
    %9 = arith.cmpi eq, %arg2, %c0_i32_8 : i32
    %10 = arith.extui %9 : i1 to i32
    %c0_i32_9 = arith.constant 0 : i32
    %11 = arith.cmpi ne, %10, %c0_i32_9 : i32
    scf.if %11 {
      %c0_10 = arith.constant 0 : index
      %c0_11 = arith.constant 0 : index
      %12 = vector.load %arg9[%c0_10, %c0_11] : memref<32x128xf32, #tpu.memory_space<vmem>>, vector<32x128xf32>
      %c0_12 = arith.constant 0 : index
      %c0_13 = arith.constant 0 : index
      %13 = vector.load %arg5[%c0_12, %c0_13] : memref<1x128xf32, #tpu.memory_space<vmem>>, vector<1x128xf32>
      %14 = vector.broadcast %13 : vector<1x128xf32> to vector<32x128xf32>
      %15 = arith.mulf %12, %14 : vector<32x128xf32>
      %c0_14 = arith.constant 0 : index
      %c0_15 = arith.constant 0 : index
      %16 = vector.load %arg6[%c0_14, %c0_15] : memref<1x128xf32, #tpu.memory_space<vmem>>, vector<1x128xf32>
      %17 = vector.broadcast %16 : vector<1x128xf32> to vector<32x128xf32>
      %18 = arith.addf %15, %17 : vector<32x128xf32>
      %c0_16 = arith.constant 0 : index
      %c0_17 = arith.constant 0 : index
      %19 = vector.load %arg7[%c0_16, %c0_17] : memref<32x128xf32, #tpu.memory_space<vmem>>, vector<32x128xf32>
      %20 = arith.addf %18, %19 : vector<32x128xf32>
      %cst_18 = arith.constant 0.000000e+00 : f32
      %21 = vector.broadcast %cst_18 : f32 to vector<32x128xf32>
      %22 = arith.maximumf %20, %21 : vector<32x128xf32>
      %c0_19 = arith.constant 0 : index
      %c0_20 = arith.constant 0 : index
      %23 = vector.load %arg8[%c0_19, %c0_20] : memref<32x128xf32, #tpu.memory_space<vmem>>, vector<32x128xf32>
      tpu.vector_store %arg8[%c0_19, %c0_20], %22 {strides = array<i32>} : memref<32x128xf32, #tpu.memory_space<vmem>>, vector<32x128xf32>,
    } else {
    }
    return
  }
  func.func @transform_0(%arg0: i32, %arg1: i32, %arg2: i32) -> (i32, i32) {
    %c0_i32 = arith.constant 0 : i32
    return %arg0, %arg2 : i32, i32
  }
  func.func @transform_1(%arg0: i32, %arg1: i32, %arg2: i32) -> (i32, i32) {
    %c0_i32 = arith.constant 0 : i32
    return %arg2, %arg1 : i32, i32
  }
  func.func @transform_2(%arg0: i32, %arg1: i32, %arg2: i32) -> (i32, i32) {
    %c0_i32 = arith.constant 0 : i32
    %c0_i32_0 = arith.constant 0 : i32
    return %c0_i32, %arg1 : i32, i32
  }
  func.func @transform_3(%arg0: i32, %arg1: i32, %arg2: i32) -> (i32, i32) {
    %c0_i32 = arith.constant 0 : i32
    %c0_i32_0 = arith.constant 0 : i32
    return %c0_i32, %arg1 : i32, i32
  }
  func.func @transform_4(%arg0: i32, %arg1: i32, %arg2: i32) -> (i32, i32) {
    %c0_i32 = arith.constant 0 : i32
    return %arg0, %arg1 : i32, i32
  }
  func.func @transform_5(%arg0: i32, %arg1: i32, %arg2: i32) -> (i32, i32) {
    %c0_i32 = arith.constant 0 : i32
    return %arg0, %arg1 : i32, i32
  }
}

module attributes {stable_mosaic.version = 11 : i64} {
  func.func @_matmul_kernel(%arg0: i32, %arg1: i32, %arg2: i32, %arg3: memref<32x128xbf16, #tpu.memory_space<vmem>>, %arg4: memref<128x128xbf16, #tpu.memory_space<vmem>>, %arg5: memref<1x128xf32, #tpu.memory_space<vmem>>, %arg6: memref<1x128xf32, #tpu.memory_space<vmem>>, %arg7: memref<32x128xf32, #tpu.memory_space<vmem>>, %arg8: memref<32x128xf32, #tpu.memory_space<vmem>>) attributes {dimension_semantics = [#tpu.dimension_semantics<parallel>, #tpu.dimension_semantics<parallel>, #tpu.dimension_semantics<arbitrary>], iteration_bounds = array<i64: 1, 1, 1>, scalar_prefetch = 0 : i64, scratch_operands = 1 : i64, tpu.core_type = #tpu.core_type<tc>, window_params = [{transform_indices = @transform_0, window_bounds = array<i64: 32, 128>}, {transform_indices = @transform_1, window_bounds = array<i64: 128, 128>}, {transform_indices = @transform_2, window_bounds = array<i64: 1, 128>}, {transform_indices = @transform_3, window_bounds = array<i64: 1, 128>}, {transform_indices = @transform_4, window_bounds = array<i64: 32, 128>}]} {
    %c0_i32 = arith.constant 0 : i32
    %0 = arith.cmpi eq, %arg2, %c0_i32 : i32
    %1 = arith.extui %0 : i1 to i32
    %c0_i32_0 = arith.constant 0 : i32
    %2 = arith.cmpi ne, %1, %c0_i32_0 : i32
    scf.if %2 {
      %cst_10 = arith.constant 0.000000e+00 : f32
      %12 = vector.broadcast %cst_10 : f32 to vector<32x128xf32>
      %c0_11 = arith.constant 0 : index
      %c0_12 = arith.constant 0 : index
      %13 = vector.load %arg8[%c0_11, %c0_12] : memref<32x128xf32, #tpu.memory_space<vmem>>, vector<32x128xf32>
      tpu.vector_store %arg8[%c0_11, %c0_12], %12 {strides = array<i32>} : memref<32x128xf32, #tpu.memory_space<vmem>>, vector<32x128xf32>,
    } else {
    }
    %c0 = arith.constant 0 : index
    %c0_1 = arith.constant 0 : index
    %3 = vector.load %arg8[%c0, %c0_1] : memref<32x128xf32, #tpu.memory_space<vmem>>, vector<32x128xf32>
    %c0_2 = arith.constant 0 : index
    %c0_3 = arith.constant 0 : index
    %4 = vector.load %arg3[%c0_2, %c0_3] : memref<32x128xbf16, #tpu.memory_space<vmem>>, vector<32x128xbf16>
    %c0_4 = arith.constant 0 : index
    %c0_5 = arith.constant 0 : index
    %5 = vector.load %arg4[%c0_4, %c0_5] : memref<128x128xbf16, #tpu.memory_space<vmem>>, vector<128x128xbf16>
    %cst = arith.constant dense<0.000000e+00> : vector<32x128xf32>
    %6 = tpu.matmul %4, %5, %cst {dimension_numbers = #tpu.dot_dimension_numbers<[1], [0], [0], [1], [0, 0, 1, 1], [], []>} : vector<32x128xbf16>, vector<128x128xbf16>, vector<32x128xf32> -> vector<32x128xf32>
    %7 = arith.addf %3, %6 : vector<32x128xf32>
    %c0_6 = arith.constant 0 : index
    %c0_7 = arith.constant 0 : index
    %8 = vector.load %arg8[%c0_6, %c0_7] : memref<32x128xf32, #tpu.memory_space<vmem>>, vector<32x128xf32>
    tpu.vector_store %arg8[%c0_6, %c0_7], %7 {strides = array<i32>} : memref<32x128xf32, #tpu.memory_space<vmem>>, vector<32x128xf32>,
    %c0_i32_8 = arith.constant 0 : i32
    %9 = arith.cmpi eq, %arg2, %c0_i32_8 : i32
    %10 = arith.extui %9 : i1 to i32
    %c0_i32_9 = arith.constant 0 : i32
    %11 = arith.cmpi ne, %10, %c0_i32_9 : i32
    scf.if %11 {
      %c0_10 = arith.constant 0 : index
      %c0_11 = arith.constant 0 : index
      %12 = vector.load %arg8[%c0_10, %c0_11] : memref<32x128xf32, #tpu.memory_space<vmem>>, vector<32x128xf32>
      %c0_12 = arith.constant 0 : index
      %c0_13 = arith.constant 0 : index
      %13 = vector.load %arg5[%c0_12, %c0_13] : memref<1x128xf32, #tpu.memory_space<vmem>>, vector<1x128xf32>
      %14 = vector.broadcast %13 : vector<1x128xf32> to vector<32x128xf32>
      %15 = arith.mulf %12, %14 : vector<32x128xf32>
      %c0_14 = arith.constant 0 : index
      %c0_15 = arith.constant 0 : index
      %16 = vector.load %arg6[%c0_14, %c0_15] : memref<1x128xf32, #tpu.memory_space<vmem>>, vector<1x128xf32>
      %17 = vector.broadcast %16 : vector<1x128xf32> to vector<32x128xf32>
      %18 = arith.addf %15, %17 : vector<32x128xf32>
      %c0_16 = arith.constant 0 : index
      %c0_17 = arith.constant 0 : index
      %19 = vector.load %arg7[%c0_16, %c0_17] : memref<32x128xf32, #tpu.memory_space<vmem>>, vector<32x128xf32>
      tpu.vector_store %arg7[%c0_16, %c0_17], %18 {strides = array<i32>} : memref<32x128xf32, #tpu.memory_space<vmem>>, vector<32x128xf32>,
    } else {
    }
    return
  }
  func.func @transform_0(%arg0: i32, %arg1: i32, %arg2: i32) -> (i32, i32) {
    %c0_i32 = arith.constant 0 : i32
    return %arg0, %arg2 : i32, i32
  }
  func.func @transform_1(%arg0: i32, %arg1: i32, %arg2: i32) -> (i32, i32) {
    %c0_i32 = arith.constant 0 : i32
    return %arg2, %arg1 : i32, i32
  }
  func.func @transform_2(%arg0: i32, %arg1: i32, %arg2: i32) -> (i32, i32) {
    %c0_i32 = arith.constant 0 : i32
    %c0_i32_0 = arith.constant 0 : i32
    return %c0_i32, %arg1 : i32, i32
  }
  func.func @transform_3(%arg0: i32, %arg1: i32, %arg2: i32) -> (i32, i32) {
    %c0_i32 = arith.constant 0 : i32
    %c0_i32_0 = arith.constant 0 : i32
    return %c0_i32, %arg1 : i32, i32
  }
  func.func @transform_4(%arg0: i32, %arg1: i32, %arg2: i32) -> (i32, i32) {
    %c0_i32 = arith.constant 0 : i32
    return %arg0, %arg1 : i32, i32
  }
}

module attributes {stable_mosaic.version = 11 : i64} {
  func.func @_matmul_kernel(%arg0: i32, %arg1: i32, %arg2: i32, %arg3: memref<32x384xbf16, #tpu.memory_space<vmem>>, %arg4: memref<384x128xbf16, #tpu.memory_space<vmem>>, %arg5: memref<1x128xf32, #tpu.memory_space<vmem>>, %arg6: memref<1x128xf32, #tpu.memory_space<vmem>>, %arg7: memref<32x128xf32, #tpu.memory_space<vmem>>, %arg8: memref<32x128xf32, #tpu.memory_space<vmem>>) attributes {dimension_semantics = [#tpu.dimension_semantics<parallel>, #tpu.dimension_semantics<parallel>, #tpu.dimension_semantics<arbitrary>], iteration_bounds = array<i64: 1, 1, 1>, scalar_prefetch = 0 : i64, scratch_operands = 1 : i64, tpu.core_type = #tpu.core_type<tc>, window_params = [{transform_indices = @transform_0, window_bounds = array<i64: 32, 384>}, {transform_indices = @transform_1, window_bounds = array<i64: 384, 128>}, {transform_indices = @transform_2, window_bounds = array<i64: 1, 128>}, {transform_indices = @transform_3, window_bounds = array<i64: 1, 128>}, {transform_indices = @transform_4, window_bounds = array<i64: 32, 128>}]} {
    %c0_i32 = arith.constant 0 : i32
    %0 = arith.cmpi eq, %arg2, %c0_i32 : i32
    %1 = arith.extui %0 : i1 to i32
    %c0_i32_0 = arith.constant 0 : i32
    %2 = arith.cmpi ne, %1, %c0_i32_0 : i32
    scf.if %2 {
      %cst_10 = arith.constant 0.000000e+00 : f32
      %12 = vector.broadcast %cst_10 : f32 to vector<32x128xf32>
      %c0_11 = arith.constant 0 : index
      %c0_12 = arith.constant 0 : index
      %13 = vector.load %arg8[%c0_11, %c0_12] : memref<32x128xf32, #tpu.memory_space<vmem>>, vector<32x128xf32>
      tpu.vector_store %arg8[%c0_11, %c0_12], %12 {strides = array<i32>} : memref<32x128xf32, #tpu.memory_space<vmem>>, vector<32x128xf32>,
    } else {
    }
    %c0 = arith.constant 0 : index
    %c0_1 = arith.constant 0 : index
    %3 = vector.load %arg8[%c0, %c0_1] : memref<32x128xf32, #tpu.memory_space<vmem>>, vector<32x128xf32>
    %c0_2 = arith.constant 0 : index
    %c0_3 = arith.constant 0 : index
    %4 = vector.load %arg3[%c0_2, %c0_3] : memref<32x384xbf16, #tpu.memory_space<vmem>>, vector<32x384xbf16>
    %c0_4 = arith.constant 0 : index
    %c0_5 = arith.constant 0 : index
    %5 = vector.load %arg4[%c0_4, %c0_5] : memref<384x128xbf16, #tpu.memory_space<vmem>>, vector<384x128xbf16>
    %cst = arith.constant dense<0.000000e+00> : vector<32x128xf32>
    %6 = tpu.matmul %4, %5, %cst {dimension_numbers = #tpu.dot_dimension_numbers<[1], [0], [0], [1], [0, 0, 1, 1], [], []>} : vector<32x384xbf16>, vector<384x128xbf16>, vector<32x128xf32> -> vector<32x128xf32>
    %7 = arith.addf %3, %6 : vector<32x128xf32>
    %c0_6 = arith.constant 0 : index
    %c0_7 = arith.constant 0 : index
    %8 = vector.load %arg8[%c0_6, %c0_7] : memref<32x128xf32, #tpu.memory_space<vmem>>, vector<32x128xf32>
    tpu.vector_store %arg8[%c0_6, %c0_7], %7 {strides = array<i32>} : memref<32x128xf32, #tpu.memory_space<vmem>>, vector<32x128xf32>,
    %c0_i32_8 = arith.constant 0 : i32
    %9 = arith.cmpi eq, %arg2, %c0_i32_8 : i32
    %10 = arith.extui %9 : i1 to i32
    %c0_i32_9 = arith.constant 0 : i32
    %11 = arith.cmpi ne, %10, %c0_i32_9 : i32
    scf.if %11 {
      %c0_10 = arith.constant 0 : index
      %c0_11 = arith.constant 0 : index
      %12 = vector.load %arg8[%c0_10, %c0_11] : memref<32x128xf32, #tpu.memory_space<vmem>>, vector<32x128xf32>
      %c0_12 = arith.constant 0 : index
      %c0_13 = arith.constant 0 : index
      %13 = vector.load %arg5[%c0_12, %c0_13] : memref<1x128xf32, #tpu.memory_space<vmem>>, vector<1x128xf32>
      %14 = vector.broadcast %13 : vector<1x128xf32> to vector<32x128xf32>
      %15 = arith.mulf %12, %14 : vector<32x128xf32>
      %c0_14 = arith.constant 0 : index
      %c0_15 = arith.constant 0 : index
      %16 = vector.load %arg6[%c0_14, %c0_15] : memref<1x128xf32, #tpu.memory_space<vmem>>, vector<1x128xf32>
      %17 = vector.broadcast %16 : vector<1x128xf32> to vector<32x128xf32>
      %18 = arith.addf %15, %17 : vector<32x128xf32>
      %cst_16 = arith.constant 0.000000e+00 : f32
      %19 = vector.broadcast %cst_16 : f32 to vector<32x128xf32>
      %20 = arith.maximumf %18, %19 : vector<32x128xf32>
      %c0_17 = arith.constant 0 : index
      %c0_18 = arith.constant 0 : index
      %21 = vector.load %arg7[%c0_17, %c0_18] : memref<32x128xf32, #tpu.memory_space<vmem>>, vector<32x128xf32>
      tpu.vector_store %arg7[%c0_17, %c0_18], %20 {strides = array<i32>} : memref<32x128xf32, #tpu.memory_space<vmem>>, vector<32x128xf32>,
    } else {
    }
    return
  }
  func.func @transform_0(%arg0: i32, %arg1: i32, %arg2: i32) -> (i32, i32) {
    %c0_i32 = arith.constant 0 : i32
    return %arg0, %arg2 : i32, i32
  }
  func.func @transform_1(%arg0: i32, %arg1: i32, %arg2: i32) -> (i32, i32) {
    %c0_i32 = arith.constant 0 : i32
    return %arg2, %arg1 : i32, i32
  }
  func.func @transform_2(%arg0: i32, %arg1: i32, %arg2: i32) -> (i32, i32) {
    %c0_i32 = arith.constant 0 : i32
    %c0_i32_0 = arith.constant 0 : i32
    return %c0_i32, %arg1 : i32, i32
  }
  func.func @transform_3(%arg0: i32, %arg1: i32, %arg2: i32) -> (i32, i32) {
    %c0_i32 = arith.constant 0 : i32
    %c0_i32_0 = arith.constant 0 : i32
    return %c0_i32, %arg1 : i32, i32
  }
  func.func @transform_4(%arg0: i32, %arg1: i32, %arg2: i32) -> (i32, i32) {
    %c0_i32 = arith.constant 0 : i32
    return %arg0, %arg1 : i32, i32
  }
}

module attributes {stable_mosaic.version = 11 : i64} {
  func.func @_matmul_kernel(%arg0: i32, %arg1: i32, %arg2: i32, %arg3: memref<8x384xbf16, #tpu.memory_space<vmem>>, %arg4: memref<384x128xbf16, #tpu.memory_space<vmem>>, %arg5: memref<1x128xf32, #tpu.memory_space<vmem>>, %arg6: memref<1x128xf32, #tpu.memory_space<vmem>>, %arg7: memref<8x128xf32, #tpu.memory_space<vmem>>, %arg8: memref<8x128xf32, #tpu.memory_space<vmem>>) attributes {dimension_semantics = [#tpu.dimension_semantics<parallel>, #tpu.dimension_semantics<parallel>, #tpu.dimension_semantics<arbitrary>], iteration_bounds = array<i64: 1, 1, 1>, scalar_prefetch = 0 : i64, scratch_operands = 1 : i64, tpu.core_type = #tpu.core_type<tc>, window_params = [{transform_indices = @transform_0, window_bounds = array<i64: 8, 384>}, {transform_indices = @transform_1, window_bounds = array<i64: 384, 128>}, {transform_indices = @transform_2, window_bounds = array<i64: 1, 128>}, {transform_indices = @transform_3, window_bounds = array<i64: 1, 128>}, {transform_indices = @transform_4, window_bounds = array<i64: 8, 128>}]} {
    %c0_i32 = arith.constant 0 : i32
    %0 = arith.cmpi eq, %arg2, %c0_i32 : i32
    %1 = arith.extui %0 : i1 to i32
    %c0_i32_0 = arith.constant 0 : i32
    %2 = arith.cmpi ne, %1, %c0_i32_0 : i32
    scf.if %2 {
      %cst_10 = arith.constant 0.000000e+00 : f32
      %12 = vector.broadcast %cst_10 : f32 to vector<8x128xf32>
      %c0_11 = arith.constant 0 : index
      %c0_12 = arith.constant 0 : index
      %13 = vector.load %arg8[%c0_11, %c0_12] : memref<8x128xf32, #tpu.memory_space<vmem>>, vector<8x128xf32>
      tpu.vector_store %arg8[%c0_11, %c0_12], %12 {strides = array<i32>} : memref<8x128xf32, #tpu.memory_space<vmem>>, vector<8x128xf32>,
    } else {
    }
    %c0 = arith.constant 0 : index
    %c0_1 = arith.constant 0 : index
    %3 = vector.load %arg8[%c0, %c0_1] : memref<8x128xf32, #tpu.memory_space<vmem>>, vector<8x128xf32>
    %c0_2 = arith.constant 0 : index
    %c0_3 = arith.constant 0 : index
    %4 = vector.load %arg3[%c0_2, %c0_3] : memref<8x384xbf16, #tpu.memory_space<vmem>>, vector<8x384xbf16>
    %c0_4 = arith.constant 0 : index
    %c0_5 = arith.constant 0 : index
    %5 = vector.load %arg4[%c0_4, %c0_5] : memref<384x128xbf16, #tpu.memory_space<vmem>>, vector<384x128xbf16>
    %cst = arith.constant dense<0.000000e+00> : vector<8x128xf32>
    %6 = tpu.matmul %4, %5, %cst {dimension_numbers = #tpu.dot_dimension_numbers<[1], [0], [0], [1], [0, 0, 1, 1], [], []>} : vector<8x384xbf16>, vector<384x128xbf16>, vector<8x128xf32> -> vector<8x128xf32>
    %7 = arith.addf %3, %6 : vector<8x128xf32>
    %c0_6 = arith.constant 0 : index
    %c0_7 = arith.constant 0 : index
    %8 = vector.load %arg8[%c0_6, %c0_7] : memref<8x128xf32, #tpu.memory_space<vmem>>, vector<8x128xf32>
    tpu.vector_store %arg8[%c0_6, %c0_7], %7 {strides = array<i32>} : memref<8x128xf32, #tpu.memory_space<vmem>>, vector<8x128xf32>,
    %c0_i32_8 = arith.constant 0 : i32
    %9 = arith.cmpi eq, %arg2, %c0_i32_8 : i32
    %10 = arith.extui %9 : i1 to i32
    %c0_i32_9 = arith.constant 0 : i32
    %11 = arith.cmpi ne, %10, %c0_i32_9 : i32
    scf.if %11 {
      %c0_10 = arith.constant 0 : index
      %c0_11 = arith.constant 0 : index
      %12 = vector.load %arg8[%c0_10, %c0_11] : memref<8x128xf32, #tpu.memory_space<vmem>>, vector<8x128xf32>
      %c0_12 = arith.constant 0 : index
      %c0_13 = arith.constant 0 : index
      %13 = vector.load %arg5[%c0_12, %c0_13] : memref<1x128xf32, #tpu.memory_space<vmem>>, vector<1x128xf32>
      %14 = vector.broadcast %13 : vector<1x128xf32> to vector<8x128xf32>
      %15 = arith.mulf %12, %14 : vector<8x128xf32>
      %c0_14 = arith.constant 0 : index
      %c0_15 = arith.constant 0 : index
      %16 = vector.load %arg6[%c0_14, %c0_15] : memref<1x128xf32, #tpu.memory_space<vmem>>, vector<1x128xf32>
      %17 = vector.broadcast %16 : vector<1x128xf32> to vector<8x128xf32>
      %18 = arith.addf %15, %17 : vector<8x128xf32>
      %cst_16 = arith.constant 0.000000e+00 : f32
      %19 = vector.broadcast %cst_16 : f32 to vector<8x128xf32>
      %20 = arith.maximumf %18, %19 : vector<8x128xf32>
      %c0_17 = arith.constant 0 : index
      %c0_18 = arith.constant 0 : index
      %21 = vector.load %arg7[%c0_17, %c0_18] : memref<8x128xf32, #tpu.memory_space<vmem>>, vector<8x128xf32>
      tpu.vector_store %arg7[%c0_17, %c0_18], %20 {strides = array<i32>} : memref<8x128xf32, #tpu.memory_space<vmem>>, vector<8x128xf32>,
    } else {
    }
    return
  }
  func.func @transform_0(%arg0: i32, %arg1: i32, %arg2: i32) -> (i32, i32) {
    %c0_i32 = arith.constant 0 : i32
    return %arg0, %arg2 : i32, i32
  }
  func.func @transform_1(%arg0: i32, %arg1: i32, %arg2: i32) -> (i32, i32) {
    %c0_i32 = arith.constant 0 : i32
    return %arg2, %arg1 : i32, i32
  }
  func.func @transform_2(%arg0: i32, %arg1: i32, %arg2: i32) -> (i32, i32) {
    %c0_i32 = arith.constant 0 : i32
    %c0_i32_0 = arith.constant 0 : i32
    return %c0_i32, %arg1 : i32, i32
  }
  func.func @transform_3(%arg0: i32, %arg1: i32, %arg2: i32) -> (i32, i32) {
    %c0_i32 = arith.constant 0 : i32
    %c0_i32_0 = arith.constant 0 : i32
    return %c0_i32, %arg1 : i32, i32
  }
  func.func @transform_4(%arg0: i32, %arg1: i32, %arg2: i32) -> (i32, i32) {
    %c0_i32 = arith.constant 0 : i32
    return %arg0, %arg1 : i32, i32
  }
}

module attributes {stable_mosaic.version = 11 : i64} {
  func.func @_matmul_kernel(%arg0: i32, %arg1: i32, %arg2: i32, %arg3: memref<8x128xbf16, #tpu.memory_space<vmem>>, %arg4: memref<128x128xbf16, #tpu.memory_space<vmem>>, %arg5: memref<1x128xf32, #tpu.memory_space<vmem>>, %arg6: memref<1x128xf32, #tpu.memory_space<vmem>>, %arg7: memref<8x128xf32, #tpu.memory_space<vmem>>, %arg8: memref<8x128xf32, #tpu.memory_space<vmem>>) attributes {dimension_semantics = [#tpu.dimension_semantics<parallel>, #tpu.dimension_semantics<parallel>, #tpu.dimension_semantics<arbitrary>], iteration_bounds = array<i64: 1, 1, 1>, scalar_prefetch = 0 : i64, scratch_operands = 1 : i64, tpu.core_type = #tpu.core_type<tc>, window_params = [{transform_indices = @transform_0, window_bounds = array<i64: 8, 128>}, {transform_indices = @transform_1, window_bounds = array<i64: 128, 128>}, {transform_indices = @transform_2, window_bounds = array<i64: 1, 128>}, {transform_indices = @transform_3, window_bounds = array<i64: 1, 128>}, {transform_indices = @transform_4, window_bounds = array<i64: 8, 128>}]} {
    %c0_i32 = arith.constant 0 : i32
    %0 = arith.cmpi eq, %arg2, %c0_i32 : i32
    %1 = arith.extui %0 : i1 to i32
    %c0_i32_0 = arith.constant 0 : i32
    %2 = arith.cmpi ne, %1, %c0_i32_0 : i32
    scf.if %2 {
      %cst_10 = arith.constant 0.000000e+00 : f32
      %12 = vector.broadcast %cst_10 : f32 to vector<8x128xf32>
      %c0_11 = arith.constant 0 : index
      %c0_12 = arith.constant 0 : index
      %13 = vector.load %arg8[%c0_11, %c0_12] : memref<8x128xf32, #tpu.memory_space<vmem>>, vector<8x128xf32>
      tpu.vector_store %arg8[%c0_11, %c0_12], %12 {strides = array<i32>} : memref<8x128xf32, #tpu.memory_space<vmem>>, vector<8x128xf32>,
    } else {
    }
    %c0 = arith.constant 0 : index
    %c0_1 = arith.constant 0 : index
    %3 = vector.load %arg8[%c0, %c0_1] : memref<8x128xf32, #tpu.memory_space<vmem>>, vector<8x128xf32>
    %c0_2 = arith.constant 0 : index
    %c0_3 = arith.constant 0 : index
    %4 = vector.load %arg3[%c0_2, %c0_3] : memref<8x128xbf16, #tpu.memory_space<vmem>>, vector<8x128xbf16>
    %c0_4 = arith.constant 0 : index
    %c0_5 = arith.constant 0 : index
    %5 = vector.load %arg4[%c0_4, %c0_5] : memref<128x128xbf16, #tpu.memory_space<vmem>>, vector<128x128xbf16>
    %cst = arith.constant dense<0.000000e+00> : vector<8x128xf32>
    %6 = tpu.matmul %4, %5, %cst {dimension_numbers = #tpu.dot_dimension_numbers<[1], [0], [0], [1], [0, 0, 1, 1], [], []>} : vector<8x128xbf16>, vector<128x128xbf16>, vector<8x128xf32> -> vector<8x128xf32>
    %7 = arith.addf %3, %6 : vector<8x128xf32>
    %c0_6 = arith.constant 0 : index
    %c0_7 = arith.constant 0 : index
    %8 = vector.load %arg8[%c0_6, %c0_7] : memref<8x128xf32, #tpu.memory_space<vmem>>, vector<8x128xf32>
    tpu.vector_store %arg8[%c0_6, %c0_7], %7 {strides = array<i32>} : memref<8x128xf32, #tpu.memory_space<vmem>>, vector<8x128xf32>,
    %c0_i32_8 = arith.constant 0 : i32
    %9 = arith.cmpi eq, %arg2, %c0_i32_8 : i32
    %10 = arith.extui %9 : i1 to i32
    %c0_i32_9 = arith.constant 0 : i32
    %11 = arith.cmpi ne, %10, %c0_i32_9 : i32
    scf.if %11 {
      %c0_10 = arith.constant 0 : index
      %c0_11 = arith.constant 0 : index
      %12 = vector.load %arg8[%c0_10, %c0_11] : memref<8x128xf32, #tpu.memory_space<vmem>>, vector<8x128xf32>
      %c0_12 = arith.constant 0 : index
      %c0_13 = arith.constant 0 : index
      %13 = vector.load %arg5[%c0_12, %c0_13] : memref<1x128xf32, #tpu.memory_space<vmem>>, vector<1x128xf32>
      %14 = vector.broadcast %13 : vector<1x128xf32> to vector<8x128xf32>
      %15 = arith.mulf %12, %14 : vector<8x128xf32>
      %c0_14 = arith.constant 0 : index
      %c0_15 = arith.constant 0 : index
      %16 = vector.load %arg6[%c0_14, %c0_15] : memref<1x128xf32, #tpu.memory_space<vmem>>, vector<1x128xf32>
      %17 = vector.broadcast %16 : vector<1x128xf32> to vector<8x128xf32>
      %18 = arith.addf %15, %17 : vector<8x128xf32>
      %c0_16 = arith.constant 0 : index
      %c0_17 = arith.constant 0 : index
      %19 = vector.load %arg7[%c0_16, %c0_17] : memref<8x128xf32, #tpu.memory_space<vmem>>, vector<8x128xf32>
      tpu.vector_store %arg7[%c0_16, %c0_17], %18 {strides = array<i32>} : memref<8x128xf32, #tpu.memory_space<vmem>>, vector<8x128xf32>,
    } else {
    }
    return
  }
  func.func @transform_0(%arg0: i32, %arg1: i32, %arg2: i32) -> (i32, i32) {
    %c0_i32 = arith.constant 0 : i32
    return %arg0, %arg2 : i32, i32
  }
  func.func @transform_1(%arg0: i32, %arg1: i32, %arg2: i32) -> (i32, i32) {
    %c0_i32 = arith.constant 0 : i32
    return %arg2, %arg1 : i32, i32
  }
  func.func @transform_2(%arg0: i32, %arg1: i32, %arg2: i32) -> (i32, i32) {
    %c0_i32 = arith.constant 0 : i32
    %c0_i32_0 = arith.constant 0 : i32
    return %c0_i32, %arg1 : i32, i32
  }
  func.func @transform_3(%arg0: i32, %arg1: i32, %arg2: i32) -> (i32, i32) {
    %c0_i32 = arith.constant 0 : i32
    %c0_i32_0 = arith.constant 0 : i32
    return %c0_i32, %arg1 : i32, i32
  }
  func.func @transform_4(%arg0: i32, %arg1: i32, %arg2: i32) -> (i32, i32) {
    %c0_i32 = arith.constant 0 : i32
    return %arg0, %arg1 : i32, i32
  }
}

module attributes {stable_mosaic.version = 11 : i64} {
  func.func @_matmul_kernel(%arg0: i32, %arg1: i32, %arg2: i32, %arg3: memref<8x128xbf16, #tpu.memory_space<vmem>>, %arg4: memref<128x128xbf16, #tpu.memory_space<vmem>>, %arg5: memref<1x128xf32, #tpu.memory_space<vmem>>, %arg6: memref<1x128xf32, #tpu.memory_space<vmem>>, %arg7: memref<8x128xf32, #tpu.memory_space<vmem>>, %arg8: memref<8x128xf32, #tpu.memory_space<vmem>>, %arg9: memref<8x128xf32, #tpu.memory_space<vmem>>) attributes {dimension_semantics = [#tpu.dimension_semantics<parallel>, #tpu.dimension_semantics<parallel>, #tpu.dimension_semantics<arbitrary>], iteration_bounds = array<i64: 1, 1, 5>, scalar_prefetch = 0 : i64, scratch_operands = 1 : i64, tpu.core_type = #tpu.core_type<tc>, window_params = [{transform_indices = @transform_0, window_bounds = array<i64: 8, 128>}, {transform_indices = @transform_1, window_bounds = array<i64: 128, 128>}, {transform_indices = @transform_2, window_bounds = array<i64: 1, 128>}, {transform_indices = @transform_3, window_bounds = array<i64: 1, 128>}, {transform_indices = @transform_4, window_bounds = array<i64: 8, 128>}, {transform_indices = @transform_5, window_bounds = array<i64: 8, 128>}]} {
    %c0_i32 = arith.constant 0 : i32
    %0 = arith.cmpi eq, %arg2, %c0_i32 : i32
    %1 = arith.extui %0 : i1 to i32
    %c0_i32_0 = arith.constant 0 : i32
    %2 = arith.cmpi ne, %1, %c0_i32_0 : i32
    scf.if %2 {
      %cst_9 = arith.constant 0.000000e+00 : f32
      %12 = vector.broadcast %cst_9 : f32 to vector<8x128xf32>
      %c0_10 = arith.constant 0 : index
      %c0_11 = arith.constant 0 : index
      %13 = vector.load %arg9[%c0_10, %c0_11] : memref<8x128xf32, #tpu.memory_space<vmem>>, vector<8x128xf32>
      tpu.vector_store %arg9[%c0_10, %c0_11], %12 {strides = array<i32>} : memref<8x128xf32, #tpu.memory_space<vmem>>, vector<8x128xf32>,
    } else {
    }
    %c0 = arith.constant 0 : index
    %c0_1 = arith.constant 0 : index
    %3 = vector.load %arg9[%c0, %c0_1] : memref<8x128xf32, #tpu.memory_space<vmem>>, vector<8x128xf32>
    %c0_2 = arith.constant 0 : index
    %c0_3 = arith.constant 0 : index
    %4 = vector.load %arg3[%c0_2, %c0_3] : memref<8x128xbf16, #tpu.memory_space<vmem>>, vector<8x128xbf16>
    %c0_4 = arith.constant 0 : index
    %c0_5 = arith.constant 0 : index
    %5 = vector.load %arg4[%c0_4, %c0_5] : memref<128x128xbf16, #tpu.memory_space<vmem>>, vector<128x128xbf16>
    %cst = arith.constant dense<0.000000e+00> : vector<8x128xf32>
    %6 = tpu.matmul %4, %5, %cst {dimension_numbers = #tpu.dot_dimension_numbers<[1], [0], [0], [1], [0, 0, 1, 1], [], []>} : vector<8x128xbf16>, vector<128x128xbf16>, vector<8x128xf32> -> vector<8x128xf32>
    %7 = arith.addf %3, %6 : vector<8x128xf32>
    %c0_6 = arith.constant 0 : index
    %c0_7 = arith.constant 0 : index
    %8 = vector.load %arg9[%c0_6, %c0_7] : memref<8x128xf32, #tpu.memory_space<vmem>>, vector<8x128xf32>
    tpu.vector_store %arg9[%c0_6, %c0_7], %7 {strides = array<i32>} : memref<8x128xf32, #tpu.memory_space<vmem>>, vector<8x128xf32>,
    %c4_i32 = arith.constant 4 : i32
    %9 = arith.cmpi eq, %arg2, %c4_i32 : i32
    %10 = arith.extui %9 : i1 to i32
    %c0_i32_8 = arith.constant 0 : i32
    %11 = arith.cmpi ne, %10, %c0_i32_8 : i32
    scf.if %11 {
      %c0_9 = arith.constant 0 : index
      %c0_10 = arith.constant 0 : index
      %12 = vector.load %arg9[%c0_9, %c0_10] : memref<8x128xf32, #tpu.memory_space<vmem>>, vector<8x128xf32>
      %c0_11 = arith.constant 0 : index
      %c0_12 = arith.constant 0 : index
      %13 = vector.load %arg5[%c0_11, %c0_12] : memref<1x128xf32, #tpu.memory_space<vmem>>, vector<1x128xf32>
      %14 = vector.broadcast %13 : vector<1x128xf32> to vector<8x128xf32>
      %15 = arith.mulf %12, %14 : vector<8x128xf32>
      %c0_13 = arith.constant 0 : index
      %c0_14 = arith.constant 0 : index
      %16 = vector.load %arg6[%c0_13, %c0_14] : memref<1x128xf32, #tpu.memory_space<vmem>>, vector<1x128xf32>
      %17 = vector.broadcast %16 : vector<1x128xf32> to vector<8x128xf32>
      %18 = arith.addf %15, %17 : vector<8x128xf32>
      %c0_15 = arith.constant 0 : index
      %c0_16 = arith.constant 0 : index
      %19 = vector.load %arg7[%c0_15, %c0_16] : memref<8x128xf32, #tpu.memory_space<vmem>>, vector<8x128xf32>
      %20 = arith.addf %18, %19 : vector<8x128xf32>
      %cst_17 = arith.constant 0.000000e+00 : f32
      %21 = vector.broadcast %cst_17 : f32 to vector<8x128xf32>
      %22 = arith.maximumf %20, %21 : vector<8x128xf32>
      %c0_18 = arith.constant 0 : index
      %c0_19 = arith.constant 0 : index
      %23 = vector.load %arg8[%c0_18, %c0_19] : memref<8x128xf32, #tpu.memory_space<vmem>>, vector<8x128xf32>
      tpu.vector_store %arg8[%c0_18, %c0_19], %22 {strides = array<i32>} : memref<8x128xf32, #tpu.memory_space<vmem>>, vector<8x128xf32>,
    } else {
    }
    return
  }
  func.func @transform_0(%arg0: i32, %arg1: i32, %arg2: i32) -> (i32, i32) {
    %c0_i32 = arith.constant 0 : i32
    return %arg0, %arg2 : i32, i32
  }
  func.func @transform_1(%arg0: i32, %arg1: i32, %arg2: i32) -> (i32, i32) {
    %c0_i32 = arith.constant 0 : i32
    return %arg2, %arg1 : i32, i32
  }
  func.func @transform_2(%arg0: i32, %arg1: i32, %arg2: i32) -> (i32, i32) {
    %c0_i32 = arith.constant 0 : i32
    %c0_i32_0 = arith.constant 0 : i32
    return %c0_i32, %arg1 : i32, i32
  }
  func.func @transform_3(%arg0: i32, %arg1: i32, %arg2: i32) -> (i32, i32) {
    %c0_i32 = arith.constant 0 : i32
    %c0_i32_0 = arith.constant 0 : i32
    return %c0_i32, %arg1 : i32, i32
  }
  func.func @transform_4(%arg0: i32, %arg1: i32, %arg2: i32) -> (i32, i32) {
    %c0_i32 = arith.constant 0 : i32
    return %arg0, %arg1 : i32, i32
  }
  func.func @transform_5(%arg0: i32, %arg1: i32, %arg2: i32) -> (i32, i32) {
    %c0_i32 = arith.constant 0 : i32
    return %arg0, %arg1 : i32, i32
  }
}

module attributes {stable_mosaic.version = 11 : i64} {
  func.func @_matmul_kernel(%arg0: i32, %arg1: i32, %arg2: i32, %arg3: memref<8x128xbf16, #tpu.memory_space<vmem>>, %arg4: memref<128x128xbf16, #tpu.memory_space<vmem>>, %arg5: memref<1x128xf32, #tpu.memory_space<vmem>>, %arg6: memref<1x128xf32, #tpu.memory_space<vmem>>, %arg7: memref<8x128xf32, #tpu.memory_space<vmem>>, %arg8: memref<8x128xf32, #tpu.memory_space<vmem>>) attributes {dimension_semantics = [#tpu.dimension_semantics<parallel>, #tpu.dimension_semantics<parallel>, #tpu.dimension_semantics<arbitrary>], iteration_bounds = array<i64: 1, 1, 5>, scalar_prefetch = 0 : i64, scratch_operands = 1 : i64, tpu.core_type = #tpu.core_type<tc>, window_params = [{transform_indices = @transform_0, window_bounds = array<i64: 8, 128>}, {transform_indices = @transform_1, window_bounds = array<i64: 128, 128>}, {transform_indices = @transform_2, window_bounds = array<i64: 1, 128>}, {transform_indices = @transform_3, window_bounds = array<i64: 1, 128>}, {transform_indices = @transform_4, window_bounds = array<i64: 8, 128>}]} {
    %c0_i32 = arith.constant 0 : i32
    %0 = arith.cmpi eq, %arg2, %c0_i32 : i32
    %1 = arith.extui %0 : i1 to i32
    %c0_i32_0 = arith.constant 0 : i32
    %2 = arith.cmpi ne, %1, %c0_i32_0 : i32
    scf.if %2 {
      %cst_9 = arith.constant 0.000000e+00 : f32
      %12 = vector.broadcast %cst_9 : f32 to vector<8x128xf32>
      %c0_10 = arith.constant 0 : index
      %c0_11 = arith.constant 0 : index
      %13 = vector.load %arg8[%c0_10, %c0_11] : memref<8x128xf32, #tpu.memory_space<vmem>>, vector<8x128xf32>
      tpu.vector_store %arg8[%c0_10, %c0_11], %12 {strides = array<i32>} : memref<8x128xf32, #tpu.memory_space<vmem>>, vector<8x128xf32>,
    } else {
    }
    %c0 = arith.constant 0 : index
    %c0_1 = arith.constant 0 : index
    %3 = vector.load %arg8[%c0, %c0_1] : memref<8x128xf32, #tpu.memory_space<vmem>>, vector<8x128xf32>
    %c0_2 = arith.constant 0 : index
    %c0_3 = arith.constant 0 : index
    %4 = vector.load %arg3[%c0_2, %c0_3] : memref<8x128xbf16, #tpu.memory_space<vmem>>, vector<8x128xbf16>
    %c0_4 = arith.constant 0 : index
    %c0_5 = arith.constant 0 : index
    %5 = vector.load %arg4[%c0_4, %c0_5] : memref<128x128xbf16, #tpu.memory_space<vmem>>, vector<128x128xbf16>
    %cst = arith.constant dense<0.000000e+00> : vector<8x128xf32>
    %6 = tpu.matmul %4, %5, %cst {dimension_numbers = #tpu.dot_dimension_numbers<[1], [0], [0], [1], [0, 0, 1, 1], [], []>} : vector<8x128xbf16>, vector<128x128xbf16>, vector<8x128xf32> -> vector<8x128xf32>
    %7 = arith.addf %3, %6 : vector<8x128xf32>
    %c0_6 = arith.constant 0 : index
    %c0_7 = arith.constant 0 : index
    %8 = vector.load %arg8[%c0_6, %c0_7] : memref<8x128xf32, #tpu.memory_space<vmem>>, vector<8x128xf32>
    tpu.vector_store %arg8[%c0_6, %c0_7], %7 {strides = array<i32>} : memref<8x128xf32, #tpu.memory_space<vmem>>, vector<8x128xf32>,
    %c4_i32 = arith.constant 4 : i32
    %9 = arith.cmpi eq, %arg2, %c4_i32 : i32
    %10 = arith.extui %9 : i1 to i32
    %c0_i32_8 = arith.constant 0 : i32
    %11 = arith.cmpi ne, %10, %c0_i32_8 : i32
    scf.if %11 {
      %c0_9 = arith.constant 0 : index
      %c0_10 = arith.constant 0 : index
      %12 = vector.load %arg8[%c0_9, %c0_10] : memref<8x128xf32, #tpu.memory_space<vmem>>, vector<8x128xf32>
      %c0_11 = arith.constant 0 : index
      %c0_12 = arith.constant 0 : index
      %13 = vector.load %arg5[%c0_11, %c0_12] : memref<1x128xf32, #tpu.memory_space<vmem>>, vector<1x128xf32>
      %14 = vector.broadcast %13 : vector<1x128xf32> to vector<8x128xf32>
      %15 = arith.mulf %12, %14 : vector<8x128xf32>
      %c0_13 = arith.constant 0 : index
      %c0_14 = arith.constant 0 : index
      %16 = vector.load %arg6[%c0_13, %c0_14] : memref<1x128xf32, #tpu.memory_space<vmem>>, vector<1x128xf32>
      %17 = vector.broadcast %16 : vector<1x128xf32> to vector<8x128xf32>
      %18 = arith.addf %15, %17 : vector<8x128xf32>
      %cst_15 = arith.constant 0.000000e+00 : f32
      %19 = vector.broadcast %cst_15 : f32 to vector<8x128xf32>
      %20 = arith.maximumf %18, %19 : vector<8x128xf32>
      %c0_16 = arith.constant 0 : index
      %c0_17 = arith.constant 0 : index
      %21 = vector.load %arg7[%c0_16, %c0_17] : memref<8x128xf32, #tpu.memory_space<vmem>>, vector<8x128xf32>
      tpu.vector_store %arg7[%c0_16, %c0_17], %20 {strides = array<i32>} : memref<8x128xf32, #tpu.memory_space<vmem>>, vector<8x128xf32>,
    } else {
    }
    return
  }
  func.func @transform_0(%arg0: i32, %arg1: i32, %arg2: i32) -> (i32, i32) {
    %c0_i32 = arith.constant 0 : i32
    return %arg0, %arg2 : i32, i32
  }
  func.func @transform_1(%arg0: i32, %arg1: i32, %arg2: i32) -> (i32, i32) {
    %c0_i32 = arith.constant 0 : i32
    return %arg2, %arg1 : i32, i32
  }
  func.func @transform_2(%arg0: i32, %arg1: i32, %arg2: i32) -> (i32, i32) {
    %c0_i32 = arith.constant 0 : i32
    %c0_i32_0 = arith.constant 0 : i32
    return %c0_i32, %arg1 : i32, i32
  }
  func.func @transform_3(%arg0: i32, %arg1: i32, %arg2: i32) -> (i32, i32) {
    %c0_i32 = arith.constant 0 : i32
    %c0_i32_0 = arith.constant 0 : i32
    return %c0_i32, %arg1 : i32, i32
  }
  func.func @transform_4(%arg0: i32, %arg1: i32, %arg2: i32) -> (i32, i32) {
    %c0_i32 = arith.constant 0 : i32
    return %arg0, %arg1 : i32, i32
  }
}

module attributes {stable_mosaic.version = 11 : i64} {
  func.func @_matmul_kernel(%arg0: i32, %arg1: i32, %arg2: i32, %arg3: memref<8x384xbf16, #tpu.memory_space<vmem>>, %arg4: memref<384x128xbf16, #tpu.memory_space<vmem>>, %arg5: memref<1x128xf32, #tpu.memory_space<vmem>>, %arg6: memref<1x128xf32, #tpu.memory_space<vmem>>, %arg7: memref<8x128xf32, #tpu.memory_space<vmem>>, %arg8: memref<8x128xf32, #tpu.memory_space<vmem>>, %arg9: memref<8x128xf32, #tpu.memory_space<vmem>>) attributes {dimension_semantics = [#tpu.dimension_semantics<parallel>, #tpu.dimension_semantics<parallel>, #tpu.dimension_semantics<arbitrary>], iteration_bounds = array<i64: 1, 1, 3>, scalar_prefetch = 0 : i64, scratch_operands = 1 : i64, tpu.core_type = #tpu.core_type<tc>, window_params = [{transform_indices = @transform_0, window_bounds = array<i64: 8, 384>}, {transform_indices = @transform_1, window_bounds = array<i64: 384, 128>}, {transform_indices = @transform_2, window_bounds = array<i64: 1, 128>}, {transform_indices = @transform_3, window_bounds = array<i64: 1, 128>}, {transform_indices = @transform_4, window_bounds = array<i64: 8, 128>}, {transform_indices = @transform_5, window_bounds = array<i64: 8, 128>}]} {
    %c0_i32 = arith.constant 0 : i32
    %0 = arith.cmpi eq, %arg2, %c0_i32 : i32
    %1 = arith.extui %0 : i1 to i32
    %c0_i32_0 = arith.constant 0 : i32
    %2 = arith.cmpi ne, %1, %c0_i32_0 : i32
    scf.if %2 {
      %cst_9 = arith.constant 0.000000e+00 : f32
      %12 = vector.broadcast %cst_9 : f32 to vector<8x128xf32>
      %c0_10 = arith.constant 0 : index
      %c0_11 = arith.constant 0 : index
      %13 = vector.load %arg9[%c0_10, %c0_11] : memref<8x128xf32, #tpu.memory_space<vmem>>, vector<8x128xf32>
      tpu.vector_store %arg9[%c0_10, %c0_11], %12 {strides = array<i32>} : memref<8x128xf32, #tpu.memory_space<vmem>>, vector<8x128xf32>,
    } else {
    }
    %c0 = arith.constant 0 : index
    %c0_1 = arith.constant 0 : index
    %3 = vector.load %arg9[%c0, %c0_1] : memref<8x128xf32, #tpu.memory_space<vmem>>, vector<8x128xf32>
    %c0_2 = arith.constant 0 : index
    %c0_3 = arith.constant 0 : index
    %4 = vector.load %arg3[%c0_2, %c0_3] : memref<8x384xbf16, #tpu.memory_space<vmem>>, vector<8x384xbf16>
    %c0_4 = arith.constant 0 : index
    %c0_5 = arith.constant 0 : index
    %5 = vector.load %arg4[%c0_4, %c0_5] : memref<384x128xbf16, #tpu.memory_space<vmem>>, vector<384x128xbf16>
    %cst = arith.constant dense<0.000000e+00> : vector<8x128xf32>
    %6 = tpu.matmul %4, %5, %cst {dimension_numbers = #tpu.dot_dimension_numbers<[1], [0], [0], [1], [0, 0, 1, 1], [], []>} : vector<8x384xbf16>, vector<384x128xbf16>, vector<8x128xf32> -> vector<8x128xf32>
    %7 = arith.addf %3, %6 : vector<8x128xf32>
    %c0_6 = arith.constant 0 : index
    %c0_7 = arith.constant 0 : index
    %8 = vector.load %arg9[%c0_6, %c0_7] : memref<8x128xf32, #tpu.memory_space<vmem>>, vector<8x128xf32>
    tpu.vector_store %arg9[%c0_6, %c0_7], %7 {strides = array<i32>} : memref<8x128xf32, #tpu.memory_space<vmem>>, vector<8x128xf32>,
    %c2_i32 = arith.constant 2 : i32
    %9 = arith.cmpi eq, %arg2, %c2_i32 : i32
    %10 = arith.extui %9 : i1 to i32
    %c0_i32_8 = arith.constant 0 : i32
    %11 = arith.cmpi ne, %10, %c0_i32_8 : i32
    scf.if %11 {
      %c0_9 = arith.constant 0 : index
      %c0_10 = arith.constant 0 : index
      %12 = vector.load %arg9[%c0_9, %c0_10] : memref<8x128xf32, #tpu.memory_space<vmem>>, vector<8x128xf32>
      %c0_11 = arith.constant 0 : index
      %c0_12 = arith.constant 0 : index
      %13 = vector.load %arg5[%c0_11, %c0_12] : memref<1x128xf32, #tpu.memory_space<vmem>>, vector<1x128xf32>
      %14 = vector.broadcast %13 : vector<1x128xf32> to vector<8x128xf32>
      %15 = arith.mulf %12, %14 : vector<8x128xf32>
      %c0_13 = arith.constant 0 : index
      %c0_14 = arith.constant 0 : index
      %16 = vector.load %arg6[%c0_13, %c0_14] : memref<1x128xf32, #tpu.memory_space<vmem>>, vector<1x128xf32>
      %17 = vector.broadcast %16 : vector<1x128xf32> to vector<8x128xf32>
      %18 = arith.addf %15, %17 : vector<8x128xf32>
      %c0_15 = arith.constant 0 : index
      %c0_16 = arith.constant 0 : index
      %19 = vector.load %arg7[%c0_15, %c0_16] : memref<8x128xf32, #tpu.memory_space<vmem>>, vector<8x128xf32>
      %20 = arith.addf %18, %19 : vector<8x128xf32>
      %cst_17 = arith.constant 0.000000e+00 : f32
      %21 = vector.broadcast %cst_17 : f32 to vector<8x128xf32>
      %22 = arith.maximumf %20, %21 : vector<8x128xf32>
      %c0_18 = arith.constant 0 : index
      %c0_19 = arith.constant 0 : index
      %23 = vector.load %arg8[%c0_18, %c0_19] : memref<8x128xf32, #tpu.memory_space<vmem>>, vector<8x128xf32>
      tpu.vector_store %arg8[%c0_18, %c0_19], %22 {strides = array<i32>} : memref<8x128xf32, #tpu.memory_space<vmem>>, vector<8x128xf32>,
    } else {
    }
    return
  }
  func.func @transform_0(%arg0: i32, %arg1: i32, %arg2: i32) -> (i32, i32) {
    %c0_i32 = arith.constant 0 : i32
    return %arg0, %arg2 : i32, i32
  }
  func.func @transform_1(%arg0: i32, %arg1: i32, %arg2: i32) -> (i32, i32) {
    %c0_i32 = arith.constant 0 : i32
    return %arg2, %arg1 : i32, i32
  }
  func.func @transform_2(%arg0: i32, %arg1: i32, %arg2: i32) -> (i32, i32) {
    %c0_i32 = arith.constant 0 : i32
    %c0_i32_0 = arith.constant 0 : i32
    return %c0_i32, %arg1 : i32, i32
  }
  func.func @transform_3(%arg0: i32, %arg1: i32, %arg2: i32) -> (i32, i32) {
    %c0_i32 = arith.constant 0 : i32
    %c0_i32_0 = arith.constant 0 : i32
    return %c0_i32, %arg1 : i32, i32
  }
  func.func @transform_4(%arg0: i32, %arg1: i32, %arg2: i32) -> (i32, i32) {
    %c0_i32 = arith.constant 0 : i32
    return %arg0, %arg1 : i32, i32
  }
  func.func @transform_5(%arg0: i32, %arg1: i32, %arg2: i32) -> (i32, i32) {
    %c0_i32 = arith.constant 0 : i32
    return %arg0, %arg1 : i32, i32
  }
}

module attributes {stable_mosaic.version = 11 : i64} {
  func.func @_matmul_kernel(%arg0: i32, %arg1: i32, %arg2: i32, %arg3: memref<8x384xbf16, #tpu.memory_space<vmem>>, %arg4: memref<384x128xbf16, #tpu.memory_space<vmem>>, %arg5: memref<1x128xf32, #tpu.memory_space<vmem>>, %arg6: memref<1x128xf32, #tpu.memory_space<vmem>>, %arg7: memref<8x128xf32, #tpu.memory_space<vmem>>, %arg8: memref<8x128xf32, #tpu.memory_space<vmem>>) attributes {dimension_semantics = [#tpu.dimension_semantics<parallel>, #tpu.dimension_semantics<parallel>, #tpu.dimension_semantics<arbitrary>], iteration_bounds = array<i64: 1, 1, 3>, scalar_prefetch = 0 : i64, scratch_operands = 1 : i64, tpu.core_type = #tpu.core_type<tc>, window_params = [{transform_indices = @transform_0, window_bounds = array<i64: 8, 384>}, {transform_indices = @transform_1, window_bounds = array<i64: 384, 128>}, {transform_indices = @transform_2, window_bounds = array<i64: 1, 128>}, {transform_indices = @transform_3, window_bounds = array<i64: 1, 128>}, {transform_indices = @transform_4, window_bounds = array<i64: 8, 128>}]} {
    %c0_i32 = arith.constant 0 : i32
    %0 = arith.cmpi eq, %arg2, %c0_i32 : i32
    %1 = arith.extui %0 : i1 to i32
    %c0_i32_0 = arith.constant 0 : i32
    %2 = arith.cmpi ne, %1, %c0_i32_0 : i32
    scf.if %2 {
      %cst_9 = arith.constant 0.000000e+00 : f32
      %12 = vector.broadcast %cst_9 : f32 to vector<8x128xf32>
      %c0_10 = arith.constant 0 : index
      %c0_11 = arith.constant 0 : index
      %13 = vector.load %arg8[%c0_10, %c0_11] : memref<8x128xf32, #tpu.memory_space<vmem>>, vector<8x128xf32>
      tpu.vector_store %arg8[%c0_10, %c0_11], %12 {strides = array<i32>} : memref<8x128xf32, #tpu.memory_space<vmem>>, vector<8x128xf32>,
    } else {
    }
    %c0 = arith.constant 0 : index
    %c0_1 = arith.constant 0 : index
    %3 = vector.load %arg8[%c0, %c0_1] : memref<8x128xf32, #tpu.memory_space<vmem>>, vector<8x128xf32>
    %c0_2 = arith.constant 0 : index
    %c0_3 = arith.constant 0 : index
    %4 = vector.load %arg3[%c0_2, %c0_3] : memref<8x384xbf16, #tpu.memory_space<vmem>>, vector<8x384xbf16>
    %c0_4 = arith.constant 0 : index
    %c0_5 = arith.constant 0 : index
    %5 = vector.load %arg4[%c0_4, %c0_5] : memref<384x128xbf16, #tpu.memory_space<vmem>>, vector<384x128xbf16>
    %cst = arith.constant dense<0.000000e+00> : vector<8x128xf32>
    %6 = tpu.matmul %4, %5, %cst {dimension_numbers = #tpu.dot_dimension_numbers<[1], [0], [0], [1], [0, 0, 1, 1], [], []>} : vector<8x384xbf16>, vector<384x128xbf16>, vector<8x128xf32> -> vector<8x128xf32>
    %7 = arith.addf %3, %6 : vector<8x128xf32>
    %c0_6 = arith.constant 0 : index
    %c0_7 = arith.constant 0 : index
    %8 = vector.load %arg8[%c0_6, %c0_7] : memref<8x128xf32, #tpu.memory_space<vmem>>, vector<8x128xf32>
    tpu.vector_store %arg8[%c0_6, %c0_7], %7 {strides = array<i32>} : memref<8x128xf32, #tpu.memory_space<vmem>>, vector<8x128xf32>,
    %c2_i32 = arith.constant 2 : i32
    %9 = arith.cmpi eq, %arg2, %c2_i32 : i32
    %10 = arith.extui %9 : i1 to i32
    %c0_i32_8 = arith.constant 0 : i32
    %11 = arith.cmpi ne, %10, %c0_i32_8 : i32
    scf.if %11 {
      %c0_9 = arith.constant 0 : index
      %c0_10 = arith.constant 0 : index
      %12 = vector.load %arg8[%c0_9, %c0_10] : memref<8x128xf32, #tpu.memory_space<vmem>>, vector<8x128xf32>
      %c0_11 = arith.constant 0 : index
      %c0_12 = arith.constant 0 : index
      %13 = vector.load %arg5[%c0_11, %c0_12] : memref<1x128xf32, #tpu.memory_space<vmem>>, vector<1x128xf32>
      %14 = vector.broadcast %13 : vector<1x128xf32> to vector<8x128xf32>
      %15 = arith.mulf %12, %14 : vector<8x128xf32>
      %c0_13 = arith.constant 0 : index
      %c0_14 = arith.constant 0 : index
      %16 = vector.load %arg6[%c0_13, %c0_14] : memref<1x128xf32, #tpu.memory_space<vmem>>, vector<1x128xf32>
      %17 = vector.broadcast %16 : vector<1x128xf32> to vector<8x128xf32>
      %18 = arith.addf %15, %17 : vector<8x128xf32>
      %cst_15 = arith.constant 0.000000e+00 : f32
      %19 = vector.broadcast %cst_15 : f32 to vector<8x128xf32>
      %20 = arith.maximumf %18, %19 : vector<8x128xf32>
      %c0_16 = arith.constant 0 : index
      %c0_17 = arith.constant 0 : index
      %21 = vector.load %arg7[%c0_16, %c0_17] : memref<8x128xf32, #tpu.memory_space<vmem>>, vector<8x128xf32>
      tpu.vector_store %arg7[%c0_16, %c0_17], %20 {strides = array<i32>} : memref<8x128xf32, #tpu.memory_space<vmem>>, vector<8x128xf32>,
    } else {
    }
    return
  }
  func.func @transform_0(%arg0: i32, %arg1: i32, %arg2: i32) -> (i32, i32) {
    %c0_i32 = arith.constant 0 : i32
    return %arg0, %arg2 : i32, i32
  }
  func.func @transform_1(%arg0: i32, %arg1: i32, %arg2: i32) -> (i32, i32) {
    %c0_i32 = arith.constant 0 : i32
    return %arg2, %arg1 : i32, i32
  }
  func.func @transform_2(%arg0: i32, %arg1: i32, %arg2: i32) -> (i32, i32) {
    %c0_i32 = arith.constant 0 : i32
    %c0_i32_0 = arith.constant 0 : i32
    return %c0_i32, %arg1 : i32, i32
  }
  func.func @transform_3(%arg0: i32, %arg1: i32, %arg2: i32) -> (i32, i32) {
    %c0_i32 = arith.constant 0 : i32
    %c0_i32_0 = arith.constant 0 : i32
    return %c0_i32, %arg1 : i32, i32
  }
  func.func @transform_4(%arg0: i32, %arg1: i32, %arg2: i32) -> (i32, i32) {
    %c0_i32 = arith.constant 0 : i32
    return %arg0, %arg1 : i32, i32
  }
}

module attributes {stable_mosaic.version = 11 : i64} {
  func.func @_matmul_kernel(%arg0: i32, %arg1: i32, %arg2: i32, %arg3: memref<8x384xbf16, #tpu.memory_space<vmem>>, %arg4: memref<384x128xbf16, #tpu.memory_space<vmem>>, %arg5: memref<1x128xf32, #tpu.memory_space<vmem>>, %arg6: memref<1x128xf32, #tpu.memory_space<vmem>>, %arg7: memref<8x128xf32, #tpu.memory_space<vmem>>, %arg8: memref<8x128xf32, #tpu.memory_space<vmem>>) attributes {dimension_semantics = [#tpu.dimension_semantics<parallel>, #tpu.dimension_semantics<parallel>, #tpu.dimension_semantics<arbitrary>], iteration_bounds = array<i64: 1, 2, 3>, scalar_prefetch = 0 : i64, scratch_operands = 1 : i64, tpu.core_type = #tpu.core_type<tc>, window_params = [{transform_indices = @transform_0, window_bounds = array<i64: 8, 384>}, {transform_indices = @transform_1, window_bounds = array<i64: 384, 128>}, {transform_indices = @transform_2, window_bounds = array<i64: 1, 128>}, {transform_indices = @transform_3, window_bounds = array<i64: 1, 128>}, {transform_indices = @transform_4, window_bounds = array<i64: 8, 128>}]} {
    %c0_i32 = arith.constant 0 : i32
    %0 = arith.cmpi eq, %arg2, %c0_i32 : i32
    %1 = arith.extui %0 : i1 to i32
    %c0_i32_0 = arith.constant 0 : i32
    %2 = arith.cmpi ne, %1, %c0_i32_0 : i32
    scf.if %2 {
      %cst_9 = arith.constant 0.000000e+00 : f32
      %12 = vector.broadcast %cst_9 : f32 to vector<8x128xf32>
      %c0_10 = arith.constant 0 : index
      %c0_11 = arith.constant 0 : index
      %13 = vector.load %arg8[%c0_10, %c0_11] : memref<8x128xf32, #tpu.memory_space<vmem>>, vector<8x128xf32>
      tpu.vector_store %arg8[%c0_10, %c0_11], %12 {strides = array<i32>} : memref<8x128xf32, #tpu.memory_space<vmem>>, vector<8x128xf32>,
    } else {
    }
    %c0 = arith.constant 0 : index
    %c0_1 = arith.constant 0 : index
    %3 = vector.load %arg8[%c0, %c0_1] : memref<8x128xf32, #tpu.memory_space<vmem>>, vector<8x128xf32>
    %c0_2 = arith.constant 0 : index
    %c0_3 = arith.constant 0 : index
    %4 = vector.load %arg3[%c0_2, %c0_3] : memref<8x384xbf16, #tpu.memory_space<vmem>>, vector<8x384xbf16>
    %c0_4 = arith.constant 0 : index
    %c0_5 = arith.constant 0 : index
    %5 = vector.load %arg4[%c0_4, %c0_5] : memref<384x128xbf16, #tpu.memory_space<vmem>>, vector<384x128xbf16>
    %cst = arith.constant dense<0.000000e+00> : vector<8x128xf32>
    %6 = tpu.matmul %4, %5, %cst {dimension_numbers = #tpu.dot_dimension_numbers<[1], [0], [0], [1], [0, 0, 1, 1], [], []>} : vector<8x384xbf16>, vector<384x128xbf16>, vector<8x128xf32> -> vector<8x128xf32>
    %7 = arith.addf %3, %6 : vector<8x128xf32>
    %c0_6 = arith.constant 0 : index
    %c0_7 = arith.constant 0 : index
    %8 = vector.load %arg8[%c0_6, %c0_7] : memref<8x128xf32, #tpu.memory_space<vmem>>, vector<8x128xf32>
    tpu.vector_store %arg8[%c0_6, %c0_7], %7 {strides = array<i32>} : memref<8x128xf32, #tpu.memory_space<vmem>>, vector<8x128xf32>,
    %c2_i32 = arith.constant 2 : i32
    %9 = arith.cmpi eq, %arg2, %c2_i32 : i32
    %10 = arith.extui %9 : i1 to i32
    %c0_i32_8 = arith.constant 0 : i32
    %11 = arith.cmpi ne, %10, %c0_i32_8 : i32
    scf.if %11 {
      %c0_9 = arith.constant 0 : index
      %c0_10 = arith.constant 0 : index
      %12 = vector.load %arg8[%c0_9, %c0_10] : memref<8x128xf32, #tpu.memory_space<vmem>>, vector<8x128xf32>
      %c0_11 = arith.constant 0 : index
      %c0_12 = arith.constant 0 : index
      %13 = vector.load %arg5[%c0_11, %c0_12] : memref<1x128xf32, #tpu.memory_space<vmem>>, vector<1x128xf32>
      %14 = vector.broadcast %13 : vector<1x128xf32> to vector<8x128xf32>
      %15 = arith.mulf %12, %14 : vector<8x128xf32>
      %c0_13 = arith.constant 0 : index
      %c0_14 = arith.constant 0 : index
      %16 = vector.load %arg6[%c0_13, %c0_14] : memref<1x128xf32, #tpu.memory_space<vmem>>, vector<1x128xf32>
      %17 = vector.broadcast %16 : vector<1x128xf32> to vector<8x128xf32>
      %18 = arith.addf %15, %17 : vector<8x128xf32>
      %cst_15 = arith.constant 0.000000e+00 : f32
      %19 = vector.broadcast %cst_15 : f32 to vector<8x128xf32>
      %20 = arith.maximumf %18, %19 : vector<8x128xf32>
      %c0_16 = arith.constant 0 : index
      %c0_17 = arith.constant 0 : index
      %21 = vector.load %arg7[%c0_16, %c0_17] : memref<8x128xf32, #tpu.memory_space<vmem>>, vector<8x128xf32>
      tpu.vector_store %arg7[%c0_16, %c0_17], %20 {strides = array<i32>} : memref<8x128xf32, #tpu.memory_space<vmem>>, vector<8x128xf32>,
    } else {
    }
    return
  }
  func.func @transform_0(%arg0: i32, %arg1: i32, %arg2: i32) -> (i32, i32) {
    %c0_i32 = arith.constant 0 : i32
    return %arg0, %arg2 : i32, i32
  }
  func.func @transform_1(%arg0: i32, %arg1: i32, %arg2: i32) -> (i32, i32) {
    %c0_i32 = arith.constant 0 : i32
    return %arg2, %arg1 : i32, i32
  }
  func.func @transform_2(%arg0: i32, %arg1: i32, %arg2: i32) -> (i32, i32) {
    %c0_i32 = arith.constant 0 : i32
    %c0_i32_0 = arith.constant 0 : i32
    return %c0_i32, %arg1 : i32, i32
  }
  func.func @transform_3(%arg0: i32, %arg1: i32, %arg2: i32) -> (i32, i32) {
    %c0_i32 = arith.constant 0 : i32
    %c0_i32_0 = arith.constant 0 : i32
    return %c0_i32, %arg1 : i32, i32
  }
  func.func @transform_4(%arg0: i32, %arg1: i32, %arg2: i32) -> (i32, i32) {
    %c0_i32 = arith.constant 0 : i32
    return %arg0, %arg1 : i32, i32
  }
}

module attributes {stable_mosaic.version = 11 : i64} {
  func.func @_matmul_kernel(%arg0: i32, %arg1: i32, %arg2: i32, %arg3: memref<8x128xbf16, #tpu.memory_space<vmem>>, %arg4: memref<128x128xbf16, #tpu.memory_space<vmem>>, %arg5: memref<1x128xf32, #tpu.memory_space<vmem>>, %arg6: memref<1x128xf32, #tpu.memory_space<vmem>>, %arg7: memref<8x128xf32, #tpu.memory_space<vmem>>, %arg8: memref<8x128xf32, #tpu.memory_space<vmem>>) attributes {dimension_semantics = [#tpu.dimension_semantics<parallel>, #tpu.dimension_semantics<parallel>, #tpu.dimension_semantics<arbitrary>], iteration_bounds = array<i64: 1, 2, 5>, scalar_prefetch = 0 : i64, scratch_operands = 1 : i64, tpu.core_type = #tpu.core_type<tc>, window_params = [{transform_indices = @transform_0, window_bounds = array<i64: 8, 128>}, {transform_indices = @transform_1, window_bounds = array<i64: 128, 128>}, {transform_indices = @transform_2, window_bounds = array<i64: 1, 128>}, {transform_indices = @transform_3, window_bounds = array<i64: 1, 128>}, {transform_indices = @transform_4, window_bounds = array<i64: 8, 128>}]} {
    %c0_i32 = arith.constant 0 : i32
    %0 = arith.cmpi eq, %arg2, %c0_i32 : i32
    %1 = arith.extui %0 : i1 to i32
    %c0_i32_0 = arith.constant 0 : i32
    %2 = arith.cmpi ne, %1, %c0_i32_0 : i32
    scf.if %2 {
      %cst_9 = arith.constant 0.000000e+00 : f32
      %12 = vector.broadcast %cst_9 : f32 to vector<8x128xf32>
      %c0_10 = arith.constant 0 : index
      %c0_11 = arith.constant 0 : index
      %13 = vector.load %arg8[%c0_10, %c0_11] : memref<8x128xf32, #tpu.memory_space<vmem>>, vector<8x128xf32>
      tpu.vector_store %arg8[%c0_10, %c0_11], %12 {strides = array<i32>} : memref<8x128xf32, #tpu.memory_space<vmem>>, vector<8x128xf32>,
    } else {
    }
    %c0 = arith.constant 0 : index
    %c0_1 = arith.constant 0 : index
    %3 = vector.load %arg8[%c0, %c0_1] : memref<8x128xf32, #tpu.memory_space<vmem>>, vector<8x128xf32>
    %c0_2 = arith.constant 0 : index
    %c0_3 = arith.constant 0 : index
    %4 = vector.load %arg3[%c0_2, %c0_3] : memref<8x128xbf16, #tpu.memory_space<vmem>>, vector<8x128xbf16>
    %c0_4 = arith.constant 0 : index
    %c0_5 = arith.constant 0 : index
    %5 = vector.load %arg4[%c0_4, %c0_5] : memref<128x128xbf16, #tpu.memory_space<vmem>>, vector<128x128xbf16>
    %cst = arith.constant dense<0.000000e+00> : vector<8x128xf32>
    %6 = tpu.matmul %4, %5, %cst {dimension_numbers = #tpu.dot_dimension_numbers<[1], [0], [0], [1], [0, 0, 1, 1], [], []>} : vector<8x128xbf16>, vector<128x128xbf16>, vector<8x128xf32> -> vector<8x128xf32>
    %7 = arith.addf %3, %6 : vector<8x128xf32>
    %c0_6 = arith.constant 0 : index
    %c0_7 = arith.constant 0 : index
    %8 = vector.load %arg8[%c0_6, %c0_7] : memref<8x128xf32, #tpu.memory_space<vmem>>, vector<8x128xf32>
    tpu.vector_store %arg8[%c0_6, %c0_7], %7 {strides = array<i32>} : memref<8x128xf32, #tpu.memory_space<vmem>>, vector<8x128xf32>,
    %c4_i32 = arith.constant 4 : i32
    %9 = arith.cmpi eq, %arg2, %c4_i32 : i32
    %10 = arith.extui %9 : i1 to i32
    %c0_i32_8 = arith.constant 0 : i32
    %11 = arith.cmpi ne, %10, %c0_i32_8 : i32
    scf.if %11 {
      %c0_9 = arith.constant 0 : index
      %c0_10 = arith.constant 0 : index
      %12 = vector.load %arg8[%c0_9, %c0_10] : memref<8x128xf32, #tpu.memory_space<vmem>>, vector<8x128xf32>
      %c0_11 = arith.constant 0 : index
      %c0_12 = arith.constant 0 : index
      %13 = vector.load %arg5[%c0_11, %c0_12] : memref<1x128xf32, #tpu.memory_space<vmem>>, vector<1x128xf32>
      %14 = vector.broadcast %13 : vector<1x128xf32> to vector<8x128xf32>
      %15 = arith.mulf %12, %14 : vector<8x128xf32>
      %c0_13 = arith.constant 0 : index
      %c0_14 = arith.constant 0 : index
      %16 = vector.load %arg6[%c0_13, %c0_14] : memref<1x128xf32, #tpu.memory_space<vmem>>, vector<1x128xf32>
      %17 = vector.broadcast %16 : vector<1x128xf32> to vector<8x128xf32>
      %18 = arith.addf %15, %17 : vector<8x128xf32>
      %cst_15 = arith.constant 0.000000e+00 : f32
      %19 = vector.broadcast %cst_15 : f32 to vector<8x128xf32>
      %20 = arith.maximumf %18, %19 : vector<8x128xf32>
      %c0_16 = arith.constant 0 : index
      %c0_17 = arith.constant 0 : index
      %21 = vector.load %arg7[%c0_16, %c0_17] : memref<8x128xf32, #tpu.memory_space<vmem>>, vector<8x128xf32>
      tpu.vector_store %arg7[%c0_16, %c0_17], %20 {strides = array<i32>} : memref<8x128xf32, #tpu.memory_space<vmem>>, vector<8x128xf32>,
    } else {
    }
    return
  }
  func.func @transform_0(%arg0: i32, %arg1: i32, %arg2: i32) -> (i32, i32) {
    %c0_i32 = arith.constant 0 : i32
    return %arg0, %arg2 : i32, i32
  }
  func.func @transform_1(%arg0: i32, %arg1: i32, %arg2: i32) -> (i32, i32) {
    %c0_i32 = arith.constant 0 : i32
    return %arg2, %arg1 : i32, i32
  }
  func.func @transform_2(%arg0: i32, %arg1: i32, %arg2: i32) -> (i32, i32) {
    %c0_i32 = arith.constant 0 : i32
    %c0_i32_0 = arith.constant 0 : i32
    return %c0_i32, %arg1 : i32, i32
  }
  func.func @transform_3(%arg0: i32, %arg1: i32, %arg2: i32) -> (i32, i32) {
    %c0_i32 = arith.constant 0 : i32
    %c0_i32_0 = arith.constant 0 : i32
    return %c0_i32, %arg1 : i32, i32
  }
  func.func @transform_4(%arg0: i32, %arg1: i32, %arg2: i32) -> (i32, i32) {
    %c0_i32 = arith.constant 0 : i32
    return %arg0, %arg1 : i32, i32
  }
}

module attributes {stable_mosaic.version = 11 : i64} {
  func.func @_matmul_kernel(%arg0: i32, %arg1: i32, %arg2: i32, %arg3: memref<32x128xbf16, #tpu.memory_space<vmem>>, %arg4: memref<128x128xbf16, #tpu.memory_space<vmem>>, %arg5: memref<1x128xf32, #tpu.memory_space<vmem>>, %arg6: memref<1x128xf32, #tpu.memory_space<vmem>>, %arg7: memref<32x128xf32, #tpu.memory_space<vmem>>, %arg8: memref<32x128xf32, #tpu.memory_space<vmem>>) attributes {dimension_semantics = [#tpu.dimension_semantics<parallel>, #tpu.dimension_semantics<parallel>, #tpu.dimension_semantics<arbitrary>], iteration_bounds = array<i64: 1, 2, 5>, scalar_prefetch = 0 : i64, scratch_operands = 1 : i64, tpu.core_type = #tpu.core_type<tc>, window_params = [{transform_indices = @transform_0, window_bounds = array<i64: 32, 128>}, {transform_indices = @transform_1, window_bounds = array<i64: 128, 128>}, {transform_indices = @transform_2, window_bounds = array<i64: 1, 128>}, {transform_indices = @transform_3, window_bounds = array<i64: 1, 128>}, {transform_indices = @transform_4, window_bounds = array<i64: 32, 128>}]} {
    %c0_i32 = arith.constant 0 : i32
    %0 = arith.cmpi eq, %arg2, %c0_i32 : i32
    %1 = arith.extui %0 : i1 to i32
    %c0_i32_0 = arith.constant 0 : i32
    %2 = arith.cmpi ne, %1, %c0_i32_0 : i32
    scf.if %2 {
      %cst_9 = arith.constant 0.000000e+00 : f32
      %12 = vector.broadcast %cst_9 : f32 to vector<32x128xf32>
      %c0_10 = arith.constant 0 : index
      %c0_11 = arith.constant 0 : index
      %13 = vector.load %arg8[%c0_10, %c0_11] : memref<32x128xf32, #tpu.memory_space<vmem>>, vector<32x128xf32>
      tpu.vector_store %arg8[%c0_10, %c0_11], %12 {strides = array<i32>} : memref<32x128xf32, #tpu.memory_space<vmem>>, vector<32x128xf32>,
    } else {
    }
    %c0 = arith.constant 0 : index
    %c0_1 = arith.constant 0 : index
    %3 = vector.load %arg8[%c0, %c0_1] : memref<32x128xf32, #tpu.memory_space<vmem>>, vector<32x128xf32>
    %c0_2 = arith.constant 0 : index
    %c0_3 = arith.constant 0 : index
    %4 = vector.load %arg3[%c0_2, %c0_3] : memref<32x128xbf16, #tpu.memory_space<vmem>>, vector<32x128xbf16>
    %c0_4 = arith.constant 0 : index
    %c0_5 = arith.constant 0 : index
    %5 = vector.load %arg4[%c0_4, %c0_5] : memref<128x128xbf16, #tpu.memory_space<vmem>>, vector<128x128xbf16>
    %cst = arith.constant dense<0.000000e+00> : vector<32x128xf32>
    %6 = tpu.matmul %4, %5, %cst {dimension_numbers = #tpu.dot_dimension_numbers<[1], [0], [0], [1], [0, 0, 1, 1], [], []>} : vector<32x128xbf16>, vector<128x128xbf16>, vector<32x128xf32> -> vector<32x128xf32>
    %7 = arith.addf %3, %6 : vector<32x128xf32>
    %c0_6 = arith.constant 0 : index
    %c0_7 = arith.constant 0 : index
    %8 = vector.load %arg8[%c0_6, %c0_7] : memref<32x128xf32, #tpu.memory_space<vmem>>, vector<32x128xf32>
    tpu.vector_store %arg8[%c0_6, %c0_7], %7 {strides = array<i32>} : memref<32x128xf32, #tpu.memory_space<vmem>>, vector<32x128xf32>,
    %c4_i32 = arith.constant 4 : i32
    %9 = arith.cmpi eq, %arg2, %c4_i32 : i32
    %10 = arith.extui %9 : i1 to i32
    %c0_i32_8 = arith.constant 0 : i32
    %11 = arith.cmpi ne, %10, %c0_i32_8 : i32
    scf.if %11 {
      %c0_9 = arith.constant 0 : index
      %c0_10 = arith.constant 0 : index
      %12 = vector.load %arg8[%c0_9, %c0_10] : memref<32x128xf32, #tpu.memory_space<vmem>>, vector<32x128xf32>
      %c0_11 = arith.constant 0 : index
      %c0_12 = arith.constant 0 : index
      %13 = vector.load %arg5[%c0_11, %c0_12] : memref<1x128xf32, #tpu.memory_space<vmem>>, vector<1x128xf32>
      %14 = vector.broadcast %13 : vector<1x128xf32> to vector<32x128xf32>
      %15 = arith.mulf %12, %14 : vector<32x128xf32>
      %c0_13 = arith.constant 0 : index
      %c0_14 = arith.constant 0 : index
      %16 = vector.load %arg6[%c0_13, %c0_14] : memref<1x128xf32, #tpu.memory_space<vmem>>, vector<1x128xf32>
      %17 = vector.broadcast %16 : vector<1x128xf32> to vector<32x128xf32>
      %18 = arith.addf %15, %17 : vector<32x128xf32>
      %cst_15 = arith.constant 0.000000e+00 : f32
      %19 = vector.broadcast %cst_15 : f32 to vector<32x128xf32>
      %20 = arith.maximumf %18, %19 : vector<32x128xf32>
      %c0_16 = arith.constant 0 : index
      %c0_17 = arith.constant 0 : index
      %21 = vector.load %arg7[%c0_16, %c0_17] : memref<32x128xf32, #tpu.memory_space<vmem>>, vector<32x128xf32>
      tpu.vector_store %arg7[%c0_16, %c0_17], %20 {strides = array<i32>} : memref<32x128xf32, #tpu.memory_space<vmem>>, vector<32x128xf32>,
    } else {
    }
    return
  }
  func.func @transform_0(%arg0: i32, %arg1: i32, %arg2: i32) -> (i32, i32) {
    %c0_i32 = arith.constant 0 : i32
    return %arg0, %arg2 : i32, i32
  }
  func.func @transform_1(%arg0: i32, %arg1: i32, %arg2: i32) -> (i32, i32) {
    %c0_i32 = arith.constant 0 : i32
    return %arg2, %arg1 : i32, i32
  }
  func.func @transform_2(%arg0: i32, %arg1: i32, %arg2: i32) -> (i32, i32) {
    %c0_i32 = arith.constant 0 : i32
    %c0_i32_0 = arith.constant 0 : i32
    return %c0_i32, %arg1 : i32, i32
  }
  func.func @transform_3(%arg0: i32, %arg1: i32, %arg2: i32) -> (i32, i32) {
    %c0_i32 = arith.constant 0 : i32
    %c0_i32_0 = arith.constant 0 : i32
    return %c0_i32, %arg1 : i32, i32
  }
  func.func @transform_4(%arg0: i32, %arg1: i32, %arg2: i32) -> (i32, i32) {
    %c0_i32 = arith.constant 0 : i32
    return %arg0, %arg1 : i32, i32
  }
}

module attributes {stable_mosaic.version = 11 : i64} {
  func.func @_matmul_kernel(%arg0: i32, %arg1: i32, %arg2: i32, %arg3: memref<128x128xbf16, #tpu.memory_space<vmem>>, %arg4: memref<128x128xbf16, #tpu.memory_space<vmem>>, %arg5: memref<1x128xf32, #tpu.memory_space<vmem>>, %arg6: memref<1x128xf32, #tpu.memory_space<vmem>>, %arg7: memref<128x128xf32, #tpu.memory_space<vmem>>, %arg8: memref<128x128xf32, #tpu.memory_space<vmem>>) attributes {dimension_semantics = [#tpu.dimension_semantics<parallel>, #tpu.dimension_semantics<parallel>, #tpu.dimension_semantics<arbitrary>], iteration_bounds = array<i64: 1, 1, 1>, scalar_prefetch = 0 : i64, scratch_operands = 1 : i64, tpu.core_type = #tpu.core_type<tc>, window_params = [{transform_indices = @transform_0, window_bounds = array<i64: 128, 128>}, {transform_indices = @transform_1, window_bounds = array<i64: 128, 128>}, {transform_indices = @transform_2, window_bounds = array<i64: 1, 128>}, {transform_indices = @transform_3, window_bounds = array<i64: 1, 128>}, {transform_indices = @transform_4, window_bounds = array<i64: 128, 128>}]} {
    %c0_i32 = arith.constant 0 : i32
    %0 = arith.cmpi eq, %arg2, %c0_i32 : i32
    %1 = arith.extui %0 : i1 to i32
    %c0_i32_0 = arith.constant 0 : i32
    %2 = arith.cmpi ne, %1, %c0_i32_0 : i32
    scf.if %2 {
      %cst_10 = arith.constant 0.000000e+00 : f32
      %12 = vector.broadcast %cst_10 : f32 to vector<128x128xf32>
      %c0_11 = arith.constant 0 : index
      %c0_12 = arith.constant 0 : index
      %13 = vector.load %arg8[%c0_11, %c0_12] : memref<128x128xf32, #tpu.memory_space<vmem>>, vector<128x128xf32>
      tpu.vector_store %arg8[%c0_11, %c0_12], %12 {strides = array<i32>} : memref<128x128xf32, #tpu.memory_space<vmem>>, vector<128x128xf32>,
    } else {
    }
    %c0 = arith.constant 0 : index
    %c0_1 = arith.constant 0 : index
    %3 = vector.load %arg8[%c0, %c0_1] : memref<128x128xf32, #tpu.memory_space<vmem>>, vector<128x128xf32>
    %c0_2 = arith.constant 0 : index
    %c0_3 = arith.constant 0 : index
    %4 = vector.load %arg3[%c0_2, %c0_3] : memref<128x128xbf16, #tpu.memory_space<vmem>>, vector<128x128xbf16>
    %c0_4 = arith.constant 0 : index
    %c0_5 = arith.constant 0 : index
    %5 = vector.load %arg4[%c0_4, %c0_5] : memref<128x128xbf16, #tpu.memory_space<vmem>>, vector<128x128xbf16>
    %cst = arith.constant dense<0.000000e+00> : vector<128x128xf32>
    %6 = tpu.matmul %4, %5, %cst {dimension_numbers = #tpu.dot_dimension_numbers<[1], [0], [0], [1], [0, 0, 1, 1], [], []>} : vector<128x128xbf16>, vector<128x128xbf16>, vector<128x128xf32> -> vector<128x128xf32>
    %7 = arith.addf %3, %6 : vector<128x128xf32>
    %c0_6 = arith.constant 0 : index
    %c0_7 = arith.constant 0 : index
    %8 = vector.load %arg8[%c0_6, %c0_7] : memref<128x128xf32, #tpu.memory_space<vmem>>, vector<128x128xf32>
    tpu.vector_store %arg8[%c0_6, %c0_7], %7 {strides = array<i32>} : memref<128x128xf32, #tpu.memory_space<vmem>>, vector<128x128xf32>,
    %c0_i32_8 = arith.constant 0 : i32
    %9 = arith.cmpi eq, %arg2, %c0_i32_8 : i32
    %10 = arith.extui %9 : i1 to i32
    %c0_i32_9 = arith.constant 0 : i32
    %11 = arith.cmpi ne, %10, %c0_i32_9 : i32
    scf.if %11 {
      %c0_10 = arith.constant 0 : index
      %c0_11 = arith.constant 0 : index
      %12 = vector.load %arg8[%c0_10, %c0_11] : memref<128x128xf32, #tpu.memory_space<vmem>>, vector<128x128xf32>
      %c0_12 = arith.constant 0 : index
      %c0_13 = arith.constant 0 : index
      %13 = vector.load %arg5[%c0_12, %c0_13] : memref<1x128xf32, #tpu.memory_space<vmem>>, vector<1x128xf32>
      %14 = vector.broadcast %13 : vector<1x128xf32> to vector<128x128xf32>
      %15 = arith.mulf %12, %14 : vector<128x128xf32>
      %c0_14 = arith.constant 0 : index
      %c0_15 = arith.constant 0 : index
      %16 = vector.load %arg6[%c0_14, %c0_15] : memref<1x128xf32, #tpu.memory_space<vmem>>, vector<1x128xf32>
      %17 = vector.broadcast %16 : vector<1x128xf32> to vector<128x128xf32>
      %18 = arith.addf %15, %17 : vector<128x128xf32>
      %c0_16 = arith.constant 0 : index
      %c0_17 = arith.constant 0 : index
      %19 = vector.load %arg7[%c0_16, %c0_17] : memref<128x128xf32, #tpu.memory_space<vmem>>, vector<128x128xf32>
      tpu.vector_store %arg7[%c0_16, %c0_17], %18 {strides = array<i32>} : memref<128x128xf32, #tpu.memory_space<vmem>>, vector<128x128xf32>,
    } else {
    }
    return
  }
  func.func @transform_0(%arg0: i32, %arg1: i32, %arg2: i32) -> (i32, i32) {
    %c0_i32 = arith.constant 0 : i32
    return %arg0, %arg2 : i32, i32
  }
  func.func @transform_1(%arg0: i32, %arg1: i32, %arg2: i32) -> (i32, i32) {
    %c0_i32 = arith.constant 0 : i32
    return %arg2, %arg1 : i32, i32
  }
  func.func @transform_2(%arg0: i32, %arg1: i32, %arg2: i32) -> (i32, i32) {
    %c0_i32 = arith.constant 0 : i32
    %c0_i32_0 = arith.constant 0 : i32
    return %c0_i32, %arg1 : i32, i32
  }
  func.func @transform_3(%arg0: i32, %arg1: i32, %arg2: i32) -> (i32, i32) {
    %c0_i32 = arith.constant 0 : i32
    %c0_i32_0 = arith.constant 0 : i32
    return %c0_i32, %arg1 : i32, i32
  }
  func.func @transform_4(%arg0: i32, %arg1: i32, %arg2: i32) -> (i32, i32) {
    %c0_i32 = arith.constant 0 : i32
    return %arg0, %arg1 : i32, i32
  }
}

</mosaic_0001>

<bundles_post_ra>
// kernel: pose_resnet_dann_forward.26
= control target key start
LH: loop header
LB: loop body
LE: loop exit
PB: predicated region body
PF: predicated region fallthrough
CT: control target
= control target key end

     0   :  { %s182_s0 = inlined_call_operand.vmem [shape: f32[16,128], index: 0, kind: input, shape index: {}]   ;;  %s183_s1 = inlined_call_operand.vmem [shape: f32[16,128], index: 1, kind: input, shape index: {}]   ;;  %s184_s2 = inlined_call_operand.vmem [shape: f32[16,128], index: 2, kind: input, shape index: {}]   ;;  %s185_s3 = inlined_call_operand.vmem [shape: f32[16,128], index: 3, kind: input, shape index: {}]   ;;  %s186_s4 = inlined_call_operand.vmem [shape: f32[16,128], index: 4, kind: input, shape index: {}]   ;;  %s187_s5 = inlined_call_operand.vmem [shape: f32[16,128], index: 5, kind: input, shape index: {}]   ;;  %s188_s6 = inlined_call_operand.vmem [shape: f32[16,128], index: 6, kind: input, shape index: {}]   ;;  %s189_s7 = inlined_call_operand.vmem [shape: f32[16,128], index: 7, kind: input, shape index: {}]   ;;  %s190_s8 = inlined_call_operand.vmem [shape: f32[16,128], index: 8, kind: input, shape index: {}]   ;;  %s191_s9 = inlined_call_operand.vmem [shape: f32[16,128], index: 9, kind: output, shape index: {}]  }
   0x1   :  { %v32_v0 = vld [vmem:[%s182_s0] sm:$0xff]  ;;  %v33_v6 = vld [vmem:[%s182_s0 + $0x8] sm:$0xff] }
   0x2   :  { %v34_v1 = vld [vmem:[%s183_s1] sm:$0xff]  ;;  %v35_v7 = vld [vmem:[%s183_s1 + $0x8] sm:$0xff] }
   0x3   :  { %v38_v2 = vld [vmem:[%s184_s2] sm:$0xff]  ;;  %v36_v3 = vmax.f32 %v32_v0, %v34_v1  ;;  %v39_v8 = vld [vmem:[%s184_s2 + $0x8] sm:$0xff]  ;;  %v37_v10 = vmax.f32 %v33_v6, %v35_v7 }
   0x4   :  { %v42_v4 = vld [vmem:[%s185_s3] sm:$0xff]  ;;  %v43_v12 = vld [vmem:[%s185_s3 + $0x8] sm:$0xff] }
   0x5   :  { %v40_v5 = vmax.f32 %v36_v3, %v38_v2  ;;  %v46_v9 = vld [vmem:[%s186_s4] sm:$0xff]  ;;  %v41_v14 = vmax.f32 %v37_v10, %v39_v8  ;;  %v47_v16 = vld [vmem:[%s186_s4 + $0x8] sm:$0xff] }
   0x6   :  { %v50_v13 = vld [vmem:[%s187_s5] sm:$0xff]  ;;  %v51_v20 = vld [vmem:[%s187_s5 + $0x8] sm:$0xff] }
   0x7   :  { %v44_v11 = vmax.f32 %v40_v5, %v42_v4  ;;  %v54_v17 = vld [vmem:[%s188_s6] sm:$0xff]  ;;  %v45_v18 = vmax.f32 %v41_v14, %v43_v12  ;;  %v55_v24 = vld [vmem:[%s188_s6 + $0x8] sm:$0xff] }
   0x8   :  { %v58_v21 = vld [vmem:[%s189_s7] sm:$0xff]  ;;  %v59_v28 = vld [vmem:[%s189_s7 + $0x8] sm:$0xff] }
   0x9   :  { %v48_v15 = vmax.f32 %v44_v11, %v46_v9  ;;  %v49_v22 = vmax.f32 %v45_v18, %v47_v16  ;;  %v62_v25 = vld [vmem:[%s190_s8] sm:$0xff]  ;;  %v63_v31 = vld [vmem:[%s190_s8 + $0x8] sm:$0xff] }
   0xb   :  { %v52_v19 = vmax.f32 %v48_v15, %v50_v13  ;;  %v53_v26 = vmax.f32 %v49_v22, %v51_v20 }
   0xd   :  { %v56_v23 = vmax.f32 %v52_v19, %v54_v17  ;;  %v57_v29 = vmax.f32 %v53_v26, %v55_v24 }
   0xf   :  { %v60_v27 = vmax.f32 %v56_v23, %v58_v21  ;;  %v61_v32 = vmax.f32 %v57_v29, %v59_v28 }
  0x11   :  { %v64_v30 = vmax.f32 %v60_v27, %v62_v25  ;;  %v65_v33 = vmax.f32 %v61_v32, %v63_v31 }
  0x13   :  { %66 = vst [vmem:[%s191_s9] sm:$0xff] %v64_v30  ;;  %67 = vst [vmem:[%s191_s9 + $0x8] sm:$0xff] %v65_v33 }

// kernel: pose_resnet_dann_forward.25
= control target key start
LH: loop header
LB: loop body
LE: loop exit
PB: predicated region body
PF: predicated region fallthrough
CT: control target
= control target key end

     0   :  { %s1556_s15 = smov 0   ;;  %s1558_s16 = smov 0   ;;  %s1786_s0 = inlined_call_operand.vmem [shape: bf16[512,256], index: 0, kind: input, shape index: {}]   ;;  %s1787_s1 = inlined_call_operand.vmem [shape: bf16[256,128], index: 1, kind: input, shape index: {}]   ;;  %s1788_s2 = inlined_call_operand.vmem [shape: f32[1,128], index: 2, kind: input, shape index: {}]   ;;  %s1789_s3 = inlined_call_operand.vmem [shape: f32[1,128], index: 3, kind: input, shape index: {}]   ;;  %s1790_s4 = inlined_call_operand.vmem [shape: f32[512,128], index: 4, kind: output, shape index: {}]  }
   0x1   :  { %s1560_s17 = smov 0  }
   0x2 LB: > { %s33_s18 = sadd.s32 1, %s1525_s16  ;;  %p1232_p0 = scmp.ge.s32.totalorder %s1529_s17, 1  ;;  %s1529_s17 = sphi %s1560_s17, %s14_s17   ;;  %s1525_s16 = sphi %s1558_s16, %s1792_s16   ;;  %s1521_s15 = sphi %s1556_s15, %s1791_s15  }
   0x3   : > { %p35_p1 = scmp.ge.s32.totalorder %s33_s18, 2  ;;  %p224_p2 = scmp.lt.s32.totalorder %s1529_s17, 3 }
   0x5   : > { %s1794_s18 = smov (%p35_p1, %s33_s18), 0  ;;  %p225_p3 = pnand %p1232_p0, %p224_p2 }
   0x6   : > { %v1443_v0 = vld [vmem:[%s1787_s1 + $0x40] sm:$0xff] (!%p225_p3)   ;;  %s1233_s21 = sshll.u32 (!%p225_p3), %s1521_s15, 5  ;;  %v1445_v2 = vld [vmem:[%s1787_s1 + $0x48] sm:$0xff] (!%p225_p3)   ;;  %v1447_v4 = vld [vmem:[%s1787_s1 + $0x50] sm:$0xff] (!%p225_p3)  }
   0x7   : > { %228 = sbr.rel (%p225_p3) target bundleno = 320 (0x140), region = 36  ;;  %v1444_v1 = vld [vmem:[%s1787_s1] sm:$0xff] (!%p225_p3)   ;;  %1291 = vmatprep.subr.bf16.mxu0 (!%p225_p3), %v1443_v0  ;;  %1403 = vmatprep.subr.bf16.mxu1 (!%p225_p3), %v1443_v0  ;;  %v1446_v3 = vld [vmem:[%s1787_s1 + $0x8] sm:$0xff] (!%p225_p3)   ;;  %p274_p4 = scmp.lt.s32.totalorder (!%p225_p3), %s1233_s21, 63  ;;  %v1448_v5 = vld [vmem:[%s1787_s1 + $0x10] sm:$0xff] (!%p225_p3)  }
   0x8   : > { %1292 = vmatpush3.bf16.msra.mxu0 (!%p225_p3), %v1444_v1  ;;  %1411 = vmatpush3.bf16.msra.mxu1 (!%p225_p3), %v1444_v1  ;;  %v1449_v6 = vld [vmem:[%s1787_s1 + $0x58] sm:$0xff] (!%p225_p3)   ;;  %v1451_v8 = vld [vmem:[%s1787_s1 + $0x60] sm:$0xff] (!%p225_p3)   ;;  %v1453_v10 = vld [vmem:[%s1787_s1 + $0x68] sm:$0xff] (!%p225_p3)  }
   0x9   : > { %1293 = vmatprep.subr.bf16.mxu0 (!%p225_p3), %v1445_v2  ;;  %1404 = vmatprep.subr.bf16.mxu1 (!%p225_p3), %v1445_v2  ;;  %v1450_v7 = vld [vmem:[%s1787_s1 + $0x18] sm:$0xff] (!%p225_p3)   ;;  %v1452_v9 = vld [vmem:[%s1787_s1 + $0x20] sm:$0xff] (!%p225_p3)   ;;  %v1454_v13 = vld [vmem:[%s1787_s1 + $0x28] sm:$0xff] (!%p225_p3)  }
   0xa   : > { %v1455_v14 = vld [vmem:[%s1787_s1 + $0x70] sm:$0xff] (!%p225_p3)   ;;  %v1457_v16 = vld [vmem:[%s1787_s1 + $0x78] sm:$0xff] (!%p225_p3)   ;;  %v1667_v51 = vld [vmem:[%s1788_s2] ss:$0 sm:$0xff] (!%p225_p3) }
   0xb   : > { %v1456_v15 = vld [vmem:[%s1787_s1 + $0x30] sm:$0xff] (!%p225_p3)   ;;  %v1458_v17 = vld [vmem:[%s1787_s1 + $0x38] sm:$0xff] (!%p225_p3)   ;;  %v1672_v57 = vld [vmem:[%s1789_s3] ss:$0 sm:$0xff] (!%p225_p3) }
   0xc   : > { %1294 = vmatpush3.bf16.msra.mxu0 (!%p225_p3), %v1446_v3  ;;  %1412 = vmatpush3.bf16.msra.mxu1 (!%p225_p3), %v1446_v3 }
   0xd   : > { %1295 = vmatprep.subr.bf16.mxu0 (!%p225_p3), %v1447_v4  ;;  %1405 = vmatprep.subr.bf16.mxu1 (!%p225_p3), %v1447_v4 }
   0xe   : > { %s1796_s21 = smov (!%p274_p4, %s1233_s21), 63 }
   0xf   : > { %s1290_s10 = sshll.u32 %s1796_s21, 3 }
  0x10   : > { %1296 = vmatpush3.bf16.msra.mxu0 %v1448_v5  ;;  %1413 = vmatpush3.bf16.msra.mxu1 %v1448_v5  ;;  %s1609_s15 = scalar_lea.vmem %s1786_s0, %s1290_s10 }
  0x11   : > { %1297 = vmatprep.subr.bf16.mxu0 %v1449_v6  ;;  %1406 = vmatprep.subr.bf16.mxu1 %v1449_v6  ;;  %v1461_v11 = vld [vmem:[%s1609_s15 + $0x4] ss:$8 sps:$4 sm:$0xff]   ;;  %v1459_v18 = vld [vmem:[%s1609_s15] ss:$8 sps:$4 sm:$0xff]   ;;  %v1465_v20 = vld [vmem:[%s1609_s15 + $0x14] ss:$8 sps:$4 sm:$0xff]  }
  0x12   : > { %v1464_v12 = vld [vmem:[%s1609_s15 + $0x84] ss:$8 sps:$4 sm:$0xff]   ;;  %729 = vmatprep.mubr.bf16.mxu0 %v1461_v11  ;;  %v1462_v19 = vld [vmem:[%s1609_s15 + $0x80] ss:$8 sps:$4 sm:$0xff]   ;;  %v1467_v21 = vld [vmem:[%s1609_s15 + $0x94] ss:$8 sps:$4 sm:$0xff]  }
  0x13   : > { %793 = vmatprep.mubr.bf16.mxu1 %v1464_v12  ;;  %v1469_v22 = vld [vmem:[%s1609_s15 + $0x10] ss:$8 sps:$4 sm:$0xff]   ;;  %v1471_v24 = vld [vmem:[%s1609_s15 + $0x24] ss:$8 sps:$4 sm:$0xff]   ;;  %v1475_v26 = vld [vmem:[%s1609_s15 + $0x20] ss:$8 sps:$4 sm:$0xff]  }
  0x14   : > { %1298 = vmatpush3.bf16.msra.mxu0 %v1450_v7  ;;  %1414 = vmatpush3.bf16.msra.mxu1 %v1450_v7  ;;  %v1470_v23 = vld [vmem:[%s1609_s15 + $0x90] ss:$8 sps:$4 sm:$0xff]   ;;  %v1473_v25 = vld [vmem:[%s1609_s15 + $0xa4] ss:$8 sps:$4 sm:$0xff]   ;;  %v1476_v27 = vld [vmem:[%s1609_s15 + $0xa0] ss:$8 sps:$4 sm:$0xff]  }
  0x15   : > { %1299 = vmatprep.subr.bf16.mxu0 %v1451_v8  ;;  %1407 = vmatprep.subr.bf16.mxu1 %v1451_v8  ;;  %v1477_v28 = vld [vmem:[%s1609_s15 + $0x34] ss:$8 sps:$4 sm:$0xff]   ;;  %v1481_v30 = vld [vmem:[%s1609_s15 + $0x30] ss:$8 sps:$4 sm:$0xff]   ;;  %v1483_v32 = vld [vmem:[%s1609_s15 + $0x44] ss:$8 sps:$4 sm:$0xff]  }
  0x16   : > { %v1479_v29 = vld [vmem:[%s1609_s15 + $0xb4] ss:$8 sps:$4 sm:$0xff]   ;;  %v1482_v31 = vld [vmem:[%s1609_s15 + $0xb0] ss:$8 sps:$4 sm:$0xff]   ;;  %v1485_v33 = vld [vmem:[%s1609_s15 + $0xc4] ss:$8 sps:$4 sm:$0xff]  }
  0x17   : > { %v1487_v34 = vld [vmem:[%s1609_s15 + $0x40] ss:$8 sps:$4 sm:$0xff]   ;;  %v1489_v36 = vld [vmem:[%s1609_s15 + $0x54] ss:$8 sps:$4 sm:$0xff]   ;;  %v1493_v38 = vld [vmem:[%s1609_s15 + $0x50] ss:$8 sps:$4 sm:$0xff]  }
  0x18   : > { %1300 = vmatpush3.bf16.msra.mxu0 %v1452_v9  ;;  %1415 = vmatpush3.bf16.msra.mxu1 %v1452_v9  ;;  %v1488_v35 = vld [vmem:[%s1609_s15 + $0xc0] ss:$8 sps:$4 sm:$0xff]   ;;  %v1491_v37 = vld [vmem:[%s1609_s15 + $0xd4] ss:$8 sps:$4 sm:$0xff]   ;;  %v1494_v39 = vld [vmem:[%s1609_s15 + $0xd0] ss:$8 sps:$4 sm:$0xff]  }
  0x19   : > { %1301 = vmatprep.subr.bf16.mxu0 %v1453_v10  ;;  %1408 = vmatprep.subr.bf16.mxu1 %v1453_v10  ;;  %v1495_v40 = vld [vmem:[%s1609_s15 + $0x64] ss:$8 sps:$4 sm:$0xff]   ;;  %v1499_v42 = vld [vmem:[%s1609_s15 + $0x60] ss:$8 sps:$4 sm:$0xff]   ;;  %v1501_v44 = vld [vmem:[%s1609_s15 + $0x74] ss:$8 sps:$4 sm:$0xff]  }
  0x1a   : > { %v1497_v41 = vld [vmem:[%s1609_s15 + $0xe4] ss:$8 sps:$4 sm:$0xff]   ;;  %v1500_v43 = vld [vmem:[%s1609_s15 + $0xe0] ss:$8 sps:$4 sm:$0xff]   ;;  %v1503_v45 = vld [vmem:[%s1609_s15 + $0xf4] ss:$8 sps:$4 sm:$0xff]  }
  0x1b   : > { %v1505_v46 = vld [vmem:[%s1609_s15 + $0x70] ss:$8 sps:$4 sm:$0xff]  }
  0x1c   : > { %1302 = vmatpush3.bf16.msra.mxu0 %v1454_v13  ;;  %1416 = vmatpush3.bf16.msra.mxu1 %v1454_v13  ;;  %v1506_v47 = vld [vmem:[%s1609_s15 + $0xf0] ss:$8 sps:$4 sm:$0xff]   ;;  %s1685_s15 = scalar_lea.vmem %s1790_s4, %s1290_s10 }
  0x1d   : > { %1303 = vmatprep.subr.bf16.mxu0 %v1455_v14  ;;  %1409 = vmatprep.subr.bf16.mxu1 %v1455_v14 }
  0x20   : > { %1304 = vmatpush3.bf16.msra.mxu0 %v1456_v15  ;;  %1417 = vmatpush3.bf16.msra.mxu1 %v1456_v15 }
  0x21   : > { %1305 = vmatprep.subr.bf16.mxu0 %v1457_v16  ;;  %1410 = vmatprep.subr.bf16.mxu1 %v1457_v16 }
  0x24   : > { %1306 = vmatpush3.bf16.msra.mxu0 %v1458_v17  ;;  %1418 = vmatpush3.bf16.msra.mxu1 %v1458_v17 }
  0x27   : > { %730 = vmatmul.mubr.bf16.vlgmr.msra.gmra.mrb[0].mxu0 %v1459_v18  ;;  %794 = vmatmul.mubr.bf16.vlgmr.msra.gmra.mrb[0].mxu1 %v1462_v19 }
  0x28   : > { %737 = vmatprep.mubr.bf16.mxu0 %v1465_v20  ;;  %801 = vmatprep.mubr.bf16.mxu1 %v1467_v21 }
  0x2f   : > { %738 = vmatmul.mubr.bf16.gmra.mrb[4].mxu0 %v1469_v22  ;;  %802 = vmatmul.mubr.bf16.gmra.mrb[4].mxu1 %v1470_v23 }
  0x30   : > { %745 = vmatprep.mubr.bf16.mxu0 %v1471_v24  ;;  %809 = vmatprep.mubr.bf16.mxu1 %v1473_v25 }
  0x37   : > { %746 = vmatmul.mubr.bf16.gmra.mrb[8].mxu0 %v1475_v26  ;;  %810 = vmatmul.mubr.bf16.gmra.mrb[8].mxu1 %v1476_v27 }
  0x38   : > { %753 = vmatprep.mubr.bf16.mxu0 %v1477_v28  ;;  %817 = vmatprep.mubr.bf16.mxu1 %v1479_v29 }
  0x3f   : > { %754 = vmatmul.mubr.bf16.gmra.mrb[12].mxu0 %v1481_v30  ;;  %818 = vmatmul.mubr.bf16.gmra.mrb[12].mxu1 %v1482_v31 }
  0x40   : > { %761 = vmatprep.mubr.bf16.mxu0 %v1483_v32  ;;  %825 = vmatprep.mubr.bf16.mxu1 %v1485_v33 }
  0x47   : > { %762 = vmatmul.mubr.bf16.gmra.mrb[16].mxu0 %v1487_v34  ;;  %826 = vmatmul.mubr.bf16.gmra.mrb[16].mxu1 %v1488_v35 }
  0x48   : > { %769 = vmatprep.mubr.bf16.mxu0 %v1489_v36  ;;  %833 = vmatprep.mubr.bf16.mxu1 %v1491_v37 }
  0x4f   : > { %770 = vmatmul.mubr.bf16.gmra.mrb[20].mxu0 %v1493_v38  ;;  %834 = vmatmul.mubr.bf16.gmra.mrb[20].mxu1 %v1494_v39 }
  0x50   : > { %777 = vmatprep.mubr.bf16.mxu0 %v1495_v40  ;;  %841 = vmatprep.mubr.bf16.mxu1 %v1497_v41 }
  0x57   : > { %778 = vmatmul.mubr.bf16.gmra.mrb[24].mxu0 %v1499_v42  ;;  %842 = vmatmul.mubr.bf16.gmra.mrb[24].mxu1 %v1500_v43 }
  0x58   : > { %785 = vmatprep.mubr.bf16.mxu0 %v1501_v44  ;;  %849 = vmatprep.mubr.bf16.mxu1 %v1503_v45 }
  0x5f   : > { %786 = vmatmul.mubr.bf16.gmra.mrb[28].mxu0 %v1505_v46  ;;  %850 = vmatmul.mubr.bf16.gmra.mrb[28].mxu1 %v1506_v47 }
  0xfa   : > { %v1307_v48 = vpop.f32.mrb[0].mxu0  ;;  %v1355_v49 = vpop.f32.mrb[0].mxu1 }
  0xfb   : > { %v1308_v50 = vpop.f32.mrb[1].mxu0  ;;  %v1356_v52 = vpop.f32.mrb[1].mxu1 }
  0xfc   : > { %v1309_v53 = vadd.f32 %v1308_v50, %v1307_v48  ;;  %v1357_v54 = vadd.f32 %v1356_v52, %v1355_v49  ;;  %v1310_v55 = vpop.f32.mrb[2].mxu0  ;;  %v1358_v56 = vpop.f32.mrb[2].mxu1 }
  0xfd   : > { %v1311_v58 = vpop.f32.mrb[3].mxu0  ;;  %v1359_v59 = vpop.f32.mrb[3].mxu1 }
  0xfe   : > { %v964_v60 = vmul.f32 %v1309_v53, %v1667_v51  ;;  %v980_v61 = vmul.f32 %v1357_v54, %v1667_v51  ;;  %v1312_v62 = vadd.f32 %v1311_v58, %v1310_v55  ;;  %v1360_v63 = vadd.f32 %v1359_v59, %v1358_v56 }
 0x100   : > { %v1003_v0 = vadd.f32 %v1672_v57, %v964_v60  ;;  %v1019_v1 = vadd.f32 %v1672_v57, %v980_v61  ;;  %v965_v2 = vmul.f32 %v1312_v62, %v1667_v51  ;;  %v981_v3 = vmul.f32 %v1360_v63, %v1667_v51 }
 0x102   : > { %v1035_v4 = vmax.f32 %v1003_v0, 0.0  ;;  %v1051_v5 = vmax.f32 %v1019_v1, 0.0  ;;  %v1004_v6 = vadd.f32 %v1672_v57, %v965_v2  ;;  %v1020_v7 = vadd.f32 %v1672_v57, %v981_v3  ;;  %v1313_v8 = vpop.f32.mrb[4].mxu0  ;;  %v1361_v9 = vpop.f32.mrb[4].mxu1 }
 0x103   : > { %v1314_v10 = vpop.f32.mrb[5].mxu0  ;;  %v1362_v11 = vpop.f32.mrb[5].mxu1 }
 0x104   : > { %1067 = vst [vmem:[%s1685_s15] sm:$0xff] %v1035_v4  ;;  %1083 = vst [vmem:[%s1685_s15 + $0x80] sm:$0xff] %v1051_v5  ;;  %v1036_v12 = vmax.f32 %v1004_v6, 0.0  ;;  %v1052_v13 = vmax.f32 %v1020_v7, 0.0  ;;  %v1315_v14 = vadd.f32 %v1314_v10, %v1313_v8  ;;  %v1363_v15 = vadd.f32 %v1362_v11, %v1361_v9  ;;  %v1316_v16 = vpop.f32.mrb[6].mxu0  ;;  %v1364_v17 = vpop.f32.mrb[6].mxu1 }
 0x105   : > { %v1317_v18 = vpop.f32.mrb[7].mxu0  ;;  %v1365_v19 = vpop.f32.mrb[7].mxu1 }
 0x106   : > { %1068 = vst [vmem:[%s1685_s15 + $0x8] sm:$0xff] %v1036_v12  ;;  %1084 = vst [vmem:[%s1685_s15 + $0x88] sm:$0xff] %v1052_v13  ;;  %v966_v20 = vmul.f32 %v1315_v14, %v1667_v51  ;;  %v982_v21 = vmul.f32 %v1363_v15, %v1667_v51  ;;  %v1318_v22 = vadd.f32 %v1317_v18, %v1316_v16 }
 0x107   : > { %v1366_v23 = vadd.f32 %v1365_v19, %v1364_v17 }
 0x108   : > { %v1005_v24 = vadd.f32 %v1672_v57, %v966_v20  ;;  %v1021_v25 = vadd.f32 %v1672_v57, %v982_v21  ;;  %v967_v26 = vmul.f32 %v1318_v22, %v1667_v51 }
 0x109   : > { %v983_v27 = vmul.f32 %v1366_v23, %v1667_v51 }
 0x10a   : > { %v1037_v28 = vmax.f32 %v1005_v24, 0.0  ;;  %v1053_v29 = vmax.f32 %v1021_v25, 0.0  ;;  %v1006_v30 = vadd.f32 %v1672_v57, %v967_v26  ;;  %v1319_v32 = vpop.f32.mrb[8].mxu0  ;;  %v1367_v33 = vpop.f32.mrb[8].mxu1 }
 0x10b   : > { %v1022_v31 = vadd.f32 %v1672_v57, %v983_v27  ;;  %v1320_v34 = vpop.f32.mrb[9].mxu0  ;;  %v1368_v35 = vpop.f32.mrb[9].mxu1 }
 0x10c   : > { %1069 = vst [vmem:[%s1685_s15 + $0x10] sm:$0xff] %v1037_v28  ;;  %1085 = vst [vmem:[%s1685_s15 + $0x90] sm:$0xff] %v1053_v29  ;;  %v1038_v36 = vmax.f32 %v1006_v30, 0.0  ;;  %v1321_v38 = vadd.f32 %v1320_v34, %v1319_v32  ;;  %v1369_v39 = vadd.f32 %v1368_v35, %v1367_v33  ;;  %v1322_v40 = vpop.f32.mrb[10].mxu0  ;;  %v1370_v41 = vpop.f32.mrb[10].mxu1 }
 0x10d   : > { %v1054_v37 = vmax.f32 %v1022_v31, 0.0  ;;  %v1323_v42 = vpop.f32.mrb[11].mxu0  ;;  %v1371_v43 = vpop.f32.mrb[11].mxu1 }
 0x10e   : > { %1070 = vst [vmem:[%s1685_s15 + $0x18] sm:$0xff] %v1038_v36  ;;  %v968_v44 = vmul.f32 %v1321_v38, %v1667_v51  ;;  %v984_v45 = vmul.f32 %v1369_v39, %v1667_v51  ;;  %v1324_v46 = vadd.f32 %v1323_v42, %v1322_v40  ;;  %v1372_v47 = vadd.f32 %v1371_v43, %v1370_v41 }
 0x10f   : > { %1086 = vst [vmem:[%s1685_s15 + $0x98] sm:$0xff] %v1054_v37 }
 0x110   : > { %v1007_v48 = vadd.f32 %v1672_v57, %v968_v44  ;;  %v1023_v49 = vadd.f32 %v1672_v57, %v984_v45  ;;  %v969_v50 = vmul.f32 %v1324_v46, %v1667_v51  ;;  %v985_v52 = vmul.f32 %v1372_v47, %v1667_v51 }
 0x112   : > { %v1039_v53 = vmax.f32 %v1007_v48, 0.0  ;;  %v1055_v54 = vmax.f32 %v1023_v49, 0.0  ;;  %v1008_v55 = vadd.f32 %v1672_v57, %v969_v50  ;;  %v1024_v56 = vadd.f32 %v1672_v57, %v985_v52  ;;  %v1325_v58 = vpop.f32.mrb[12].mxu0  ;;  %v1373_v59 = vpop.f32.mrb[12].mxu1 }
 0x113   : > { %v1326_v60 = vpop.f32.mrb[13].mxu0  ;;  %v1374_v61 = vpop.f32.mrb[13].mxu1 }
 0x114   : > { %1071 = vst [vmem:[%s1685_s15 + $0x20] sm:$0xff] %v1039_v53  ;;  %1087 = vst [vmem:[%s1685_s15 + $0xa0] sm:$0xff] %v1055_v54  ;;  %v1040_v62 = vmax.f32 %v1008_v55, 0.0  ;;  %v1056_v63 = vmax.f32 %v1024_v56, 0.0  ;;  %v1327_v0 = vadd.f32 %v1326_v60, %v1325_v58  ;;  %v1375_v1 = vadd.f32 %v1374_v61, %v1373_v59  ;;  %v1328_v2 = vpop.f32.mrb[14].mxu0  ;;  %v1376_v3 = vpop.f32.mrb[14].mxu1 }
 0x115   : > { %v1329_v4 = vpop.f32.mrb[15].mxu0  ;;  %v1377_v5 = vpop.f32.mrb[15].mxu1 }
 0x116   : > { %1072 = vst [vmem:[%s1685_s15 + $0x28] sm:$0xff] %v1040_v62  ;;  %1088 = vst [vmem:[%s1685_s15 + $0xa8] sm:$0xff] %v1056_v63  ;;  %v970_v6 = vmul.f32 %v1327_v0, %v1667_v51  ;;  %v986_v7 = vmul.f32 %v1375_v1, %v1667_v51  ;;  %v1330_v8 = vadd.f32 %v1329_v4, %v1328_v2 }
 0x117   : > { %v1378_v9 = vadd.f32 %v1377_v5, %v1376_v3 }
 0x118   : > { %v1009_v10 = vadd.f32 %v1672_v57, %v970_v6  ;;  %v1025_v11 = vadd.f32 %v1672_v57, %v986_v7  ;;  %v971_v12 = vmul.f32 %v1330_v8, %v1667_v51 }
 0x119   : > { %v987_v13 = vmul.f32 %v1378_v9, %v1667_v51 }
 0x11a   : > { %v1041_v14 = vmax.f32 %v1009_v10, 0.0  ;;  %v1057_v15 = vmax.f32 %v1025_v11, 0.0  ;;  %v1010_v16 = vadd.f32 %v1672_v57, %v971_v12  ;;  %v1331_v18 = vpop.f32.mrb[16].mxu0  ;;  %v1379_v19 = vpop.f32.mrb[16].mxu1 }
 0x11b   : > { %v1026_v17 = vadd.f32 %v1672_v57, %v987_v13  ;;  %v1332_v20 = vpop.f32.mrb[17].mxu0  ;;  %v1380_v21 = vpop.f32.mrb[17].mxu1 }
 0x11c   : > { %1073 = vst [vmem:[%s1685_s15 + $0x30] sm:$0xff] %v1041_v14  ;;  %1089 = vst [vmem:[%s1685_s15 + $0xb0] sm:$0xff] %v1057_v15  ;;  %v1042_v22 = vmax.f32 %v1010_v16, 0.0  ;;  %v1333_v24 = vadd.f32 %v1332_v20, %v1331_v18  ;;  %v1381_v25 = vadd.f32 %v1380_v21, %v1379_v19  ;;  %v1334_v26 = vpop.f32.mrb[18].mxu0  ;;  %v1382_v27 = vpop.f32.mrb[18].mxu1 }
 0x11d   : > { %v1058_v23 = vmax.f32 %v1026_v17, 0.0  ;;  %v1335_v28 = vpop.f32.mrb[19].mxu0  ;;  %v1383_v29 = vpop.f32.mrb[19].mxu1 }
 0x11e   : > { %1074 = vst [vmem:[%s1685_s15 + $0x38] sm:$0xff] %v1042_v22  ;;  %v972_v30 = vmul.f32 %v1333_v24, %v1667_v51  ;;  %v988_v31 = vmul.f32 %v1381_v25, %v1667_v51  ;;  %v1336_v32 = vadd.f32 %v1335_v28, %v1334_v26  ;;  %v1384_v33 = vadd.f32 %v1383_v29, %v1382_v27 }
 0x11f   : > { %1090 = vst [vmem:[%s1685_s15 + $0xb8] sm:$0xff] %v1058_v23 }
 0x120   : > { %v1011_v34 = vadd.f32 %v1672_v57, %v972_v30  ;;  %v1027_v35 = vadd.f32 %v1672_v57, %v988_v31  ;;  %v973_v36 = vmul.f32 %v1336_v32, %v1667_v51  ;;  %v989_v37 = vmul.f32 %v1384_v33, %v1667_v51 }
 0x122   : > { %v1043_v38 = vmax.f32 %v1011_v34, 0.0  ;;  %v1059_v39 = vmax.f32 %v1027_v35, 0.0  ;;  %v1012_v40 = vadd.f32 %v1672_v57, %v973_v36  ;;  %v1028_v41 = vadd.f32 %v1672_v57, %v989_v37  ;;  %v1337_v42 = vpop.f32.mrb[20].mxu0  ;;  %v1385_v43 = vpop.f32.mrb[20].mxu1 }
 0x123   : > { %v1338_v44 = vpop.f32.mrb[21].mxu0  ;;  %v1386_v45 = vpop.f32.mrb[21].mxu1 }
 0x124   : > { %1075 = vst [vmem:[%s1685_s15 + $0x40] sm:$0xff] %v1043_v38  ;;  %1091 = vst [vmem:[%s1685_s15 + $0xc0] sm:$0xff] %v1059_v39  ;;  %v1044_v46 = vmax.f32 %v1012_v40, 0.0  ;;  %v1060_v47 = vmax.f32 %v1028_v41, 0.0  ;;  %v1339_v48 = vadd.f32 %v1338_v44, %v1337_v42  ;;  %v1387_v49 = vadd.f32 %v1386_v45, %v1385_v43  ;;  %v1340_v50 = vpop.f32.mrb[22].mxu0  ;;  %v1388_v52 = vpop.f32.mrb[22].mxu1 }
 0x125   : > { %v1341_v53 = vpop.f32.mrb[23].mxu0  ;;  %v1389_v54 = vpop.f32.mrb[23].mxu1 }
 0x126   : > { %1076 = vst [vmem:[%s1685_s15 + $0x48] sm:$0xff] %v1044_v46  ;;  %1092 = vst [vmem:[%s1685_s15 + $0xc8] sm:$0xff] %v1060_v47  ;;  %v974_v55 = vmul.f32 %v1339_v48, %v1667_v51  ;;  %v990_v56 = vmul.f32 %v1387_v49, %v1667_v51  ;;  %v1342_v58 = vadd.f32 %v1341_v53, %v1340_v50 }
 0x127   : > { %v1390_v59 = vadd.f32 %v1389_v54, %v1388_v52 }
 0x128   : > { %v1013_v60 = vadd.f32 %v1672_v57, %v974_v55  ;;  %v1029_v61 = vadd.f32 %v1672_v57, %v990_v56  ;;  %v975_v62 = vmul.f32 %v1342_v58, %v1667_v51 }
 0x129   : > { %v991_v63 = vmul.f32 %v1390_v59, %v1667_v51 }
 0x12a   : > { %v1045_v0 = vmax.f32 %v1013_v60, 0.0  ;;  %v1061_v1 = vmax.f32 %v1029_v61, 0.0  ;;  %v1014_v2 = vadd.f32 %v1672_v57, %v975_v62  ;;  %v1343_v4 = vpop.f32.mrb[24].mxu0  ;;  %v1391_v5 = vpop.f32.mrb[24].mxu1 }
 0x12b   : > { %v1030_v3 = vadd.f32 %v1672_v57, %v991_v63  ;;  %v1344_v6 = vpop.f32.mrb[25].mxu0  ;;  %v1392_v7 = vpop.f32.mrb[25].mxu1 }
 0x12c   : > { %1077 = vst [vmem:[%s1685_s15 + $0x50] sm:$0xff] %v1045_v0  ;;  %1093 = vst [vmem:[%s1685_s15 + $0xd0] sm:$0xff] %v1061_v1  ;;  %v1046_v8 = vmax.f32 %v1014_v2, 0.0  ;;  %v1345_v10 = vadd.f32 %v1344_v6, %v1343_v4  ;;  %v1393_v11 = vadd.f32 %v1392_v7, %v1391_v5  ;;  %v1346_v12 = vpop.f32.mrb[26].mxu0  ;;  %v1394_v13 = vpop.f32.mrb[26].mxu1 }
 0x12d   : > { %v1062_v9 = vmax.f32 %v1030_v3, 0.0  ;;  %v1347_v14 = vpop.f32.mrb[27].mxu0  ;;  %v1395_v15 = vpop.f32.mrb[27].mxu1 }
 0x12e   : > { %1078 = vst [vmem:[%s1685_s15 + $0x58] sm:$0xff] %v1046_v8  ;;  %v976_v16 = vmul.f32 %v1345_v10, %v1667_v51  ;;  %v992_v17 = vmul.f32 %v1393_v11, %v1667_v51  ;;  %v1348_v18 = vadd.f32 %v1347_v14, %v1346_v12  ;;  %v1396_v19 = vadd.f32 %v1395_v15, %v1394_v13 }
 0x12f   : > { %1094 = vst [vmem:[%s1685_s15 + $0xd8] sm:$0xff] %v1062_v9 }
 0x130   : > { %v1015_v20 = vadd.f32 %v1672_v57, %v976_v16  ;;  %v1031_v21 = vadd.f32 %v1672_v57, %v992_v17  ;;  %v977_v22 = vmul.f32 %v1348_v18, %v1667_v51  ;;  %v993_v23 = vmul.f32 %v1396_v19, %v1667_v51 }
 0x132   : > { %v1047_v24 = vmax.f32 %v1015_v20, 0.0  ;;  %v1063_v25 = vmax.f32 %v1031_v21, 0.0  ;;  %v1016_v26 = vadd.f32 %v1672_v57, %v977_v22  ;;  %v1032_v27 = vadd.f32 %v1672_v57, %v993_v23  ;;  %v1349_v28 = vpop.f32.mrb[28].mxu0  ;;  %v1397_v29 = vpop.f32.mrb[28].mxu1 }
 0x133   : > { %v1350_v30 = vpop.f32.mrb[29].mxu0  ;;  %v1398_v31 = vpop.f32.mrb[29].mxu1 }
 0x134   : > { %1079 = vst [vmem:[%s1685_s15 + $0x60] sm:$0xff] %v1047_v24  ;;  %1095 = vst [vmem:[%s1685_s15 + $0xe0] sm:$0xff] %v1063_v25  ;;  %v1048_v32 = vmax.f32 %v1016_v26, 0.0  ;;  %v1064_v33 = vmax.f32 %v1032_v27, 0.0  ;;  %v1351_v34 = vadd.f32 %v1350_v30, %v1349_v28  ;;  %v1399_v35 = vadd.f32 %v1398_v31, %v1397_v29  ;;  %v1352_v36 = vpop.f32.mrb[30].mxu0  ;;  %v1400_v37 = vpop.f32.mrb[30].mxu1 }
 0x135   : > { %v1353_v38 = vpop.f32.mrb[31].mxu0  ;;  %v1401_v39 = vpop.f32.mrb[31].mxu1 }
 0x136   : > { %1080 = vst [vmem:[%s1685_s15 + $0x68] sm:$0xff] %v1048_v32  ;;  %1096 = vst [vmem:[%s1685_s15 + $0xe8] sm:$0xff] %v1064_v33  ;;  %v978_v40 = vmul.f32 %v1351_v34, %v1667_v51  ;;  %v994_v41 = vmul.f32 %v1399_v35, %v1667_v51  ;;  %v1354_v42 = vadd.f32 %v1353_v38, %v1352_v36 }
 0x137   : > { %v1402_v43 = vadd.f32 %v1401_v39, %v1400_v37 }
 0x138   : > { %v1017_v44 = vadd.f32 %v1672_v57, %v978_v40  ;;  %v1033_v45 = vadd.f32 %v1672_v57, %v994_v41  ;;  %v979_v46 = vmul.f32 %v1354_v42, %v1667_v51 }
 0x139   : > { %v995_v47 = vmul.f32 %v1402_v43, %v1667_v51 }
 0x13a   : > { %v1049_v48 = vmax.f32 %v1017_v44, 0.0  ;;  %v1065_v49 = vmax.f32 %v1033_v45, 0.0  ;;  %v1018_v50 = vadd.f32 %v1672_v57, %v979_v46 }
 0x13b   : > { %v1034_v52 = vadd.f32 %v1672_v57, %v995_v47 }
 0x13c   : > { %1081 = vst [vmem:[%s1685_s15 + $0x70] sm:$0xff] %v1049_v48  ;;  %1097 = vst [vmem:[%s1685_s15 + $0xf0] sm:$0xff] %v1065_v49  ;;  %v1050_v53 = vmax.f32 %v1018_v50, 0.0 }
 0x13d   : > { %v1066_v54 = vmax.f32 %v1034_v52, 0.0 }
 0x13e   : > { %1082 = vst [vmem:[%s1685_s15 + $0x78] sm:$0xff] %v1050_v53 }
 0x13f   : > { %1098 = vst [vmem:[%s1685_s15 + $0xf8] sm:$0xff] %v1066_v54 }
 0x140 PF: > { %s14_s17 = sadd.s32 1, %s1529_s17   ;;  %s1791_s15 = smov %s1525_s16 }
 0x141   : > { %p11_p5 = scmp.ge.s32.totalorder %s14_s17, 4   ;;  %s1792_s16 = smov %s1794_s18 }
 0x143   :  { %13 = sbr.rel (!%p11_p5) target bundleno = 2 (0x2), region = 83 }

// kernel: pose_resnet_dann_forward.27
= control target key start
LH: loop header
LB: loop body
LE: loop exit
PB: predicated region body
PF: predicated region fallthrough
CT: control target
= control target key end

     0   :  { %s873_s1 = inlined_call_operand.vmem [shape: bf16[256,128], index: 1, kind: input, shape index: {}]   ;;  %s874_s0 = inlined_call_operand.vmem [shape: bf16[128,256], index: 0, kind: input, shape index: {}]   ;;  %s875_s2 = inlined_call_operand.vmem [shape: f32[1,128], index: 2, kind: input, shape index: {}]   ;;  %s876_s3 = inlined_call_operand.vmem [shape: f32[1,128], index: 3, kind: input, shape index: {}]   ;;  %s877_s4 = inlined_call_operand.vmem [shape: f32[128,128], index: 4, kind: output, shape index: {}]  }
   0x1   :  { %v622_v0 = vld [vmem:[%s873_s1 + $0x40] sm:$0xff]   ;;  %v624_v2 = vld [vmem:[%s873_s1 + $0x48] sm:$0xff]   ;;  %v626_v4 = vld [vmem:[%s873_s1 + $0x50] sm:$0xff]  }
   0x2   :  { %v623_v1 = vld [vmem:[%s873_s1] sm:$0xff]   ;;  %542 = vmatprep.subr.bf16.mxu0 %v622_v0  ;;  %606 = vmatprep.subr.bf16.mxu1 %v622_v0  ;;  %v625_v3 = vld [vmem:[%s873_s1 + $0x8] sm:$0xff]   ;;  %v627_v5 = vld [vmem:[%s873_s1 + $0x10] sm:$0xff]  }
   0x3   :  { %543 = vmatpush3.bf16.msra.mxu0 %v623_v1  ;;  %614 = vmatpush3.bf16.msra.mxu1 %v623_v1  ;;  %v628_v6 = vld [vmem:[%s873_s1 + $0x58] sm:$0xff]   ;;  %v630_v8 = vld [vmem:[%s873_s1 + $0x60] sm:$0xff]   ;;  %v632_v10 = vld [vmem:[%s873_s1 + $0x68] sm:$0xff]  }
   0x4   :  { %544 = vmatprep.subr.bf16.mxu0 %v624_v2  ;;  %607 = vmatprep.subr.bf16.mxu1 %v624_v2  ;;  %v629_v7 = vld [vmem:[%s873_s1 + $0x18] sm:$0xff]   ;;  %v631_v9 = vld [vmem:[%s873_s1 + $0x20] sm:$0xff]   ;;  %v633_v13 = vld [vmem:[%s873_s1 + $0x28] sm:$0xff]  }
   0x5   :  { %v640_v11 = vld [vmem:[%s874_s0 + $0x4] ss:$8 sps:$4 sm:$0xff]   ;;  %v634_v14 = vld [vmem:[%s873_s1 + $0x70] sm:$0xff]   ;;  %v636_v16 = vld [vmem:[%s873_s1 + $0x78] sm:$0xff]  }
   0x6   :  { %v643_v12 = vld [vmem:[%s874_s0 + $0x44] ss:$8 sps:$4 sm:$0xff]   ;;  %310 = vmatprep.mubr.bf16.mxu0 %v640_v11  ;;  %v635_v15 = vld [vmem:[%s873_s1 + $0x30] sm:$0xff]   ;;  %v637_v17 = vld [vmem:[%s873_s1 + $0x38] sm:$0xff]  }
   0x7   :  { %545 = vmatpush3.bf16.msra.mxu0 %v625_v3  ;;  %615 = vmatpush3.bf16.msra.mxu1 %v625_v3  ;;  %v638_v18 = vld [vmem:[%s874_s0] ss:$8 sps:$4 sm:$0xff]   ;;  %v644_v20 = vld [vmem:[%s874_s0 + $0x14] ss:$8 sps:$4 sm:$0xff]   ;;  %v648_v22 = vld [vmem:[%s874_s0 + $0x10] ss:$8 sps:$4 sm:$0xff]  }
   0x8   :  { %546 = vmatprep.subr.bf16.mxu0 %v626_v4  ;;  %608 = vmatprep.subr.bf16.mxu1 %v626_v4  ;;  %v641_v19 = vld [vmem:[%s874_s0 + $0x40] ss:$8 sps:$4 sm:$0xff]   ;;  %v646_v21 = vld [vmem:[%s874_s0 + $0x54] ss:$8 sps:$4 sm:$0xff]   ;;  %v649_v23 = vld [vmem:[%s874_s0 + $0x50] ss:$8 sps:$4 sm:$0xff]  }
   0x9   :  { %342 = vmatprep.mubr.bf16.mxu1 %v643_v12  ;;  %v650_v24 = vld [vmem:[%s874_s0 + $0x24] ss:$8 sps:$4 sm:$0xff]   ;;  %v654_v26 = vld [vmem:[%s874_s0 + $0x20] ss:$8 sps:$4 sm:$0xff]   ;;  %v656_v28 = vld [vmem:[%s874_s0 + $0x34] ss:$8 sps:$4 sm:$0xff]  }
   0xa   :  { %v652_v25 = vld [vmem:[%s874_s0 + $0x64] ss:$8 sps:$4 sm:$0xff]   ;;  %v655_v27 = vld [vmem:[%s874_s0 + $0x60] ss:$8 sps:$4 sm:$0xff]   ;;  %v658_v29 = vld [vmem:[%s874_s0 + $0x74] ss:$8 sps:$4 sm:$0xff]  }
   0xb   :  { %547 = vmatpush3.bf16.msra.mxu0 %v627_v5  ;;  %616 = vmatpush3.bf16.msra.mxu1 %v627_v5  ;;  %v660_v30 = vld [vmem:[%s874_s0 + $0x30] ss:$8 sps:$4 sm:$0xff]   ;;  %v786_v35 = vld [vmem:[%s875_s2] ss:$0 sm:$0xff] }
   0xc   :  { %548 = vmatprep.subr.bf16.mxu0 %v628_v6  ;;  %609 = vmatprep.subr.bf16.mxu1 %v628_v6  ;;  %v661_v31 = vld [vmem:[%s874_s0 + $0x70] ss:$8 sps:$4 sm:$0xff]   ;;  %v791_v41 = vld [vmem:[%s876_s3] ss:$0 sm:$0xff] }
   0xf   :  { %549 = vmatpush3.bf16.msra.mxu0 %v629_v7  ;;  %617 = vmatpush3.bf16.msra.mxu1 %v629_v7 }
  0x10   :  { %550 = vmatprep.subr.bf16.mxu0 %v630_v8  ;;  %610 = vmatprep.subr.bf16.mxu1 %v630_v8 }
  0x13   :  { %551 = vmatpush3.bf16.msra.mxu0 %v631_v9  ;;  %618 = vmatpush3.bf16.msra.mxu1 %v631_v9 }
  0x14   :  { %552 = vmatprep.subr.bf16.mxu0 %v632_v10  ;;  %611 = vmatprep.subr.bf16.mxu1 %v632_v10 }
  0x17   :  { %553 = vmatpush3.bf16.msra.mxu0 %v633_v13  ;;  %619 = vmatpush3.bf16.msra.mxu1 %v633_v13 }
  0x18   :  { %554 = vmatprep.subr.bf16.mxu0 %v634_v14  ;;  %612 = vmatprep.subr.bf16.mxu1 %v634_v14 }
  0x1b   :  { %555 = vmatpush3.bf16.msra.mxu0 %v635_v15  ;;  %620 = vmatpush3.bf16.msra.mxu1 %v635_v15 }
  0x1c   :  { %556 = vmatprep.subr.bf16.mxu0 %v636_v16  ;;  %613 = vmatprep.subr.bf16.mxu1 %v636_v16 }
  0x1f   :  { %557 = vmatpush3.bf16.msra.mxu0 %v637_v17  ;;  %621 = vmatpush3.bf16.msra.mxu1 %v637_v17 }
  0x22   :  { %311 = vmatmul.mubr.bf16.vlgmr.msra.gmra.mrb[0].mxu0 %v638_v18  ;;  %343 = vmatmul.mubr.bf16.vlgmr.msra.gmra.mrb[0].mxu1 %v641_v19 }
  0x23   :  { %318 = vmatprep.mubr.bf16.mxu0 %v644_v20  ;;  %350 = vmatprep.mubr.bf16.mxu1 %v646_v21 }
  0x2a   :  { %319 = vmatmul.mubr.bf16.gmra.mrb[4].mxu0 %v648_v22  ;;  %351 = vmatmul.mubr.bf16.gmra.mrb[4].mxu1 %v649_v23 }
  0x2b   :  { %326 = vmatprep.mubr.bf16.mxu0 %v650_v24  ;;  %358 = vmatprep.mubr.bf16.mxu1 %v652_v25 }
  0x32   :  { %327 = vmatmul.mubr.bf16.gmra.mrb[8].mxu0 %v654_v26  ;;  %359 = vmatmul.mubr.bf16.gmra.mrb[8].mxu1 %v655_v27 }
  0x33   :  { %334 = vmatprep.mubr.bf16.mxu0 %v656_v28  ;;  %366 = vmatprep.mubr.bf16.mxu1 %v658_v29 }
  0x3a   :  { %335 = vmatmul.mubr.bf16.gmra.mrb[12].mxu0 %v660_v30  ;;  %367 = vmatmul.mubr.bf16.gmra.mrb[12].mxu1 %v661_v31 }
  0xf5   :  { %v558_v32 = vpop.f32.mrb[0].mxu0  ;;  %v582_v33 = vpop.f32.mrb[0].mxu1 }
  0xf6   :  { %v559_v34 = vpop.f32.mrb[1].mxu0  ;;  %v583_v36 = vpop.f32.mrb[1].mxu1 }
  0xf7   :  { %v560_v37 = vadd.f32 %v559_v34, %v558_v32  ;;  %v584_v38 = vadd.f32 %v583_v36, %v582_v33  ;;  %v561_v39 = vpop.f32.mrb[2].mxu0  ;;  %v585_v40 = vpop.f32.mrb[2].mxu1 }
  0xf8   :  { %v562_v42 = vpop.f32.mrb[3].mxu0  ;;  %v586_v43 = vpop.f32.mrb[3].mxu1 }
  0xf9   :  { %v433_v44 = vmul.f32 %v560_v37, %v786_v35  ;;  %v441_v45 = vmul.f32 %v584_v38, %v786_v35  ;;  %v563_v46 = vadd.f32 %v562_v42, %v561_v39  ;;  %v587_v47 = vadd.f32 %v586_v43, %v585_v40 }
  0xfb   :  { %v456_v48 = vadd.f32 %v791_v41, %v433_v44  ;;  %v464_v49 = vadd.f32 %v791_v41, %v441_v45  ;;  %v434_v50 = vmul.f32 %v563_v46, %v786_v35  ;;  %v442_v51 = vmul.f32 %v587_v47, %v786_v35 }
  0xfd   :  { %v472_v52 = vmax.f32 %v456_v48, 0.0  ;;  %v480_v53 = vmax.f32 %v464_v49, 0.0  ;;  %v457_v54 = vadd.f32 %v791_v41, %v434_v50  ;;  %v465_v55 = vadd.f32 %v791_v41, %v442_v51  ;;  %v564_v56 = vpop.f32.mrb[4].mxu0  ;;  %v588_v57 = vpop.f32.mrb[4].mxu1 }
  0xfe   :  { %v565_v58 = vpop.f32.mrb[5].mxu0  ;;  %v589_v59 = vpop.f32.mrb[5].mxu1 }
  0xff   :  { %488 = vst [vmem:[%s877_s4] sm:$0xff] %v472_v52  ;;  %496 = vst [vmem:[%s877_s4 + $0x40] sm:$0xff] %v480_v53  ;;  %v473_v60 = vmax.f32 %v457_v54, 0.0  ;;  %v481_v61 = vmax.f32 %v465_v55, 0.0  ;;  %v566_v62 = vadd.f32 %v565_v58, %v564_v56  ;;  %v590_v63 = vadd.f32 %v589_v59, %v588_v57  ;;  %v567_v0 = vpop.f32.mrb[6].mxu0  ;;  %v591_v1 = vpop.f32.mrb[6].mxu1 }
 0x100   :  { %v568_v2 = vpop.f32.mrb[7].mxu0  ;;  %v592_v3 = vpop.f32.mrb[7].mxu1 }
 0x101   :  { %489 = vst [vmem:[%s877_s4 + $0x8] sm:$0xff] %v473_v60  ;;  %497 = vst [vmem:[%s877_s4 + $0x48] sm:$0xff] %v481_v61  ;;  %v435_v4 = vmul.f32 %v566_v62, %v786_v35  ;;  %v443_v5 = vmul.f32 %v590_v63, %v786_v35  ;;  %v569_v6 = vadd.f32 %v568_v2, %v567_v0 }
 0x102   :  { %v593_v7 = vadd.f32 %v592_v3, %v591_v1 }
 0x103   :  { %v458_v8 = vadd.f32 %v791_v41, %v435_v4  ;;  %v466_v9 = vadd.f32 %v791_v41, %v443_v5  ;;  %v436_v10 = vmul.f32 %v569_v6, %v786_v35 }
 0x104   :  { %v444_v11 = vmul.f32 %v593_v7, %v786_v35 }
 0x105   :  { %v474_v12 = vmax.f32 %v458_v8, 0.0  ;;  %v482_v13 = vmax.f32 %v466_v9, 0.0  ;;  %v459_v14 = vadd.f32 %v791_v41, %v436_v10  ;;  %v570_v16 = vpop.f32.mrb[8].mxu0  ;;  %v594_v17 = vpop.f32.mrb[8].mxu1 }
 0x106   :  { %v467_v15 = vadd.f32 %v791_v41, %v444_v11  ;;  %v571_v18 = vpop.f32.mrb[9].mxu0  ;;  %v595_v19 = vpop.f32.mrb[9].mxu1 }
 0x107   :  { %490 = vst [vmem:[%s877_s4 + $0x10] sm:$0xff] %v474_v12  ;;  %498 = vst [vmem:[%s877_s4 + $0x50] sm:$0xff] %v482_v13  ;;  %v475_v20 = vmax.f32 %v459_v14, 0.0  ;;  %v572_v22 = vadd.f32 %v571_v18, %v570_v16  ;;  %v596_v23 = vadd.f32 %v595_v19, %v594_v17  ;;  %v573_v24 = vpop.f32.mrb[10].mxu0  ;;  %v597_v25 = vpop.f32.mrb[10].mxu1 }
 0x108   :  { %v483_v21 = vmax.f32 %v467_v15, 0.0  ;;  %v574_v26 = vpop.f32.mrb[11].mxu0  ;;  %v598_v27 = vpop.f32.mrb[11].mxu1 }
 0x109   :  { %491 = vst [vmem:[%s877_s4 + $0x18] sm:$0xff] %v475_v20  ;;  %v437_v28 = vmul.f32 %v572_v22, %v786_v35  ;;  %v445_v29 = vmul.f32 %v596_v23, %v786_v35  ;;  %v575_v30 = vadd.f32 %v574_v26, %v573_v24  ;;  %v599_v31 = vadd.f32 %v598_v27, %v597_v25 }
 0x10a   :  { %499 = vst [vmem:[%s877_s4 + $0x58] sm:$0xff] %v483_v21 }
 0x10b   :  { %v460_v32 = vadd.f32 %v791_v41, %v437_v28  ;;  %v468_v33 = vadd.f32 %v791_v41, %v445_v29  ;;  %v438_v34 = vmul.f32 %v575_v30, %v786_v35  ;;  %v446_v36 = vmul.f32 %v599_v31, %v786_v35 }
 0x10d   :  { %v476_v37 = vmax.f32 %v460_v32, 0.0  ;;  %v484_v38 = vmax.f32 %v468_v33, 0.0  ;;  %v461_v39 = vadd.f32 %v791_v41, %v438_v34  ;;  %v469_v40 = vadd.f32 %v791_v41, %v446_v36  ;;  %v576_v42 = vpop.f32.mrb[12].mxu0  ;;  %v600_v43 = vpop.f32.mrb[12].mxu1 }
 0x10e   :  { %v577_v44 = vpop.f32.mrb[13].mxu0  ;;  %v601_v45 = vpop.f32.mrb[13].mxu1 }
 0x10f   :  { %492 = vst [vmem:[%s877_s4 + $0x20] sm:$0xff] %v476_v37  ;;  %500 = vst [vmem:[%s877_s4 + $0x60] sm:$0xff] %v484_v38  ;;  %v477_v46 = vmax.f32 %v461_v39, 0.0  ;;  %v485_v47 = vmax.f32 %v469_v40, 0.0  ;;  %v578_v48 = vadd.f32 %v577_v44, %v576_v42  ;;  %v602_v49 = vadd.f32 %v601_v45, %v600_v43  ;;  %v579_v50 = vpop.f32.mrb[14].mxu0  ;;  %v603_v51 = vpop.f32.mrb[14].mxu1 }
 0x110   :  { %v580_v52 = vpop.f32.mrb[15].mxu0  ;;  %v604_v53 = vpop.f32.mrb[15].mxu1 }
 0x111   :  { %493 = vst [vmem:[%s877_s4 + $0x28] sm:$0xff] %v477_v46  ;;  %501 = vst [vmem:[%s877_s4 + $0x68] sm:$0xff] %v485_v47  ;;  %v439_v54 = vmul.f32 %v578_v48, %v786_v35  ;;  %v447_v55 = vmul.f32 %v602_v49, %v786_v35  ;;  %v581_v56 = vadd.f32 %v580_v52, %v579_v50 }
 0x112   :  { %v605_v57 = vadd.f32 %v604_v53, %v603_v51 }
 0x113   :  { %v462_v58 = vadd.f32 %v791_v41, %v439_v54  ;;  %v470_v59 = vadd.f32 %v791_v41, %v447_v55  ;;  %v440_v60 = vmul.f32 %v581_v56, %v786_v35 }
 0x114   :  { %v448_v61 = vmul.f32 %v605_v57, %v786_v35 }
 0x115   :  { %v478_v62 = vmax.f32 %v462_v58, 0.0  ;;  %v486_v63 = vmax.f32 %v470_v59, 0.0  ;;  %v463_v0 = vadd.f32 %v791_v41, %v440_v60 }
 0x116   :  { %v471_v1 = vadd.f32 %v791_v41, %v448_v61 }
 0x117   :  { %494 = vst [vmem:[%s877_s4 + $0x30] sm:$0xff] %v478_v62  ;;  %502 = vst [vmem:[%s877_s4 + $0x70] sm:$0xff] %v486_v63  ;;  %v479_v2 = vmax.f32 %v463_v0, 0.0 }
 0x118   :  { %v487_v3 = vmax.f32 %v471_v1, 0.0 }
 0x119   :  { %495 = vst [vmem:[%s877_s4 + $0x38] sm:$0xff] %v479_v2 }
 0x11a   :  { %503 = vst [vmem:[%s877_s4 + $0x78] sm:$0xff] %v487_v3 }

// kernel: pose_resnet_dann_forward.28
= control target key start
LH: loop header
LB: loop body
LE: loop exit
PB: predicated region body
PF: predicated region fallthrough
CT: control target
= control target key end

     0   :  { %s961_s1 = inlined_call_operand.vmem [shape: bf16[256,128], index: 1, kind: input, shape index: {}]   ;;  %s962_s0 = inlined_call_operand.vmem [shape: bf16[128,256], index: 0, kind: input, shape index: {}]   ;;  %s963_s2 = inlined_call_operand.vmem [shape: f32[1,128], index: 2, kind: input, shape index: {}]   ;;  %s964_s3 = inlined_call_operand.vmem [shape: f32[1,128], index: 3, kind: input, shape index: {}]   ;;  %s965_s4 = inlined_call_operand.vmem [shape: f32[128,128], index: 4, kind: input, shape index: {}]   ;;  %s966_s5 = inlined_call_operand.vmem [shape: f32[128,128], index: 5, kind: output, shape index: {}]  }
   0x1   :  { %v657_v0 = vld [vmem:[%s961_s1 + $0x40] sm:$0xff]   ;;  %v659_v2 = vld [vmem:[%s961_s1 + $0x48] sm:$0xff]   ;;  %v661_v4 = vld [vmem:[%s961_s1 + $0x50] sm:$0xff]  }
   0x2   :  { %v658_v1 = vld [vmem:[%s961_s1] sm:$0xff]   ;;  %577 = vmatprep.subr.bf16.mxu0 %v657_v0  ;;  %641 = vmatprep.subr.bf16.mxu1 %v657_v0  ;;  %v660_v3 = vld [vmem:[%s961_s1 + $0x8] sm:$0xff]   ;;  %v662_v5 = vld [vmem:[%s961_s1 + $0x10] sm:$0xff]  }
   0x3   :  { %578 = vmatpush3.bf16.msra.mxu0 %v658_v1  ;;  %649 = vmatpush3.bf16.msra.mxu1 %v658_v1  ;;  %v663_v6 = vld [vmem:[%s961_s1 + $0x58] sm:$0xff]   ;;  %v665_v8 = vld [vmem:[%s961_s1 + $0x60] sm:$0xff]   ;;  %v667_v10 = vld [vmem:[%s961_s1 + $0x68] sm:$0xff]  }
   0x4   :  { %579 = vmatprep.subr.bf16.mxu0 %v659_v2  ;;  %642 = vmatprep.subr.bf16.mxu1 %v659_v2  ;;  %v664_v7 = vld [vmem:[%s961_s1 + $0x18] sm:$0xff]   ;;  %v666_v9 = vld [vmem:[%s961_s1 + $0x20] sm:$0xff]   ;;  %v668_v13 = vld [vmem:[%s961_s1 + $0x28] sm:$0xff]  }
   0x5   :  { %v675_v11 = vld [vmem:[%s962_s0 + $0x4] ss:$8 sps:$4 sm:$0xff]   ;;  %v669_v14 = vld [vmem:[%s961_s1 + $0x70] sm:$0xff]   ;;  %v671_v16 = vld [vmem:[%s961_s1 + $0x78] sm:$0xff]  }
   0x6   :  { %v678_v12 = vld [vmem:[%s962_s0 + $0x44] ss:$8 sps:$4 sm:$0xff]   ;;  %313 = vmatprep.mubr.bf16.mxu0 %v675_v11  ;;  %v670_v15 = vld [vmem:[%s961_s1 + $0x30] sm:$0xff]   ;;  %v672_v17 = vld [vmem:[%s961_s1 + $0x38] sm:$0xff]  }
   0x7   :  { %580 = vmatpush3.bf16.msra.mxu0 %v660_v3  ;;  %650 = vmatpush3.bf16.msra.mxu1 %v660_v3  ;;  %v673_v18 = vld [vmem:[%s962_s0] ss:$8 sps:$4 sm:$0xff]   ;;  %v679_v20 = vld [vmem:[%s962_s0 + $0x14] ss:$8 sps:$4 sm:$0xff]   ;;  %v683_v22 = vld [vmem:[%s962_s0 + $0x10] ss:$8 sps:$4 sm:$0xff]  }
   0x8   :  { %581 = vmatprep.subr.bf16.mxu0 %v661_v4  ;;  %643 = vmatprep.subr.bf16.mxu1 %v661_v4  ;;  %v676_v19 = vld [vmem:[%s962_s0 + $0x40] ss:$8 sps:$4 sm:$0xff]   ;;  %v681_v21 = vld [vmem:[%s962_s0 + $0x54] ss:$8 sps:$4 sm:$0xff]   ;;  %v684_v23 = vld [vmem:[%s962_s0 + $0x50] ss:$8 sps:$4 sm:$0xff]  }
   0x9   :  { %345 = vmatprep.mubr.bf16.mxu1 %v678_v12  ;;  %v685_v24 = vld [vmem:[%s962_s0 + $0x24] ss:$8 sps:$4 sm:$0xff]   ;;  %v689_v26 = vld [vmem:[%s962_s0 + $0x20] ss:$8 sps:$4 sm:$0xff]   ;;  %v691_v28 = vld [vmem:[%s962_s0 + $0x34] ss:$8 sps:$4 sm:$0xff]  }
   0xa   :  { %v687_v25 = vld [vmem:[%s962_s0 + $0x64] ss:$8 sps:$4 sm:$0xff]   ;;  %v690_v27 = vld [vmem:[%s962_s0 + $0x60] ss:$8 sps:$4 sm:$0xff]   ;;  %v693_v29 = vld [vmem:[%s962_s0 + $0x74] ss:$8 sps:$4 sm:$0xff]  }
   0xb   :  { %582 = vmatpush3.bf16.msra.mxu0 %v662_v5  ;;  %651 = vmatpush3.bf16.msra.mxu1 %v662_v5  ;;  %v695_v30 = vld [vmem:[%s962_s0 + $0x30] ss:$8 sps:$4 sm:$0xff]   ;;  %v826_v35 = vld [vmem:[%s963_s2] ss:$0 sm:$0xff]  ;;  %v476_v54 = vld [vmem:[%s965_s4 + $0x8] sm:$0xff] }
   0xc   :  { %583 = vmatprep.subr.bf16.mxu0 %v663_v6  ;;  %644 = vmatprep.subr.bf16.mxu1 %v663_v6  ;;  %v696_v31 = vld [vmem:[%s962_s0 + $0x70] ss:$8 sps:$4 sm:$0xff]   ;;  %v831_v41 = vld [vmem:[%s964_s3] ss:$0 sm:$0xff]  ;;  %v484_v55 = vld [vmem:[%s965_s4 + $0x48] sm:$0xff] }
   0xd   :  { %v475_v48 = vld [vmem:[%s965_s4] sm:$0xff] }
   0xe   :  { %v483_v49 = vld [vmem:[%s965_s4 + $0x40] sm:$0xff] }
   0xf   :  { %584 = vmatpush3.bf16.msra.mxu0 %v664_v7  ;;  %652 = vmatpush3.bf16.msra.mxu1 %v664_v7 }
  0x10   :  { %585 = vmatprep.subr.bf16.mxu0 %v665_v8  ;;  %645 = vmatprep.subr.bf16.mxu1 %v665_v8 }
  0x13   :  { %586 = vmatpush3.bf16.msra.mxu0 %v666_v9  ;;  %653 = vmatpush3.bf16.msra.mxu1 %v666_v9 }
  0x14   :  { %587 = vmatprep.subr.bf16.mxu0 %v667_v10  ;;  %646 = vmatprep.subr.bf16.mxu1 %v667_v10 }
  0x17   :  { %588 = vmatpush3.bf16.msra.mxu0 %v668_v13  ;;  %654 = vmatpush3.bf16.msra.mxu1 %v668_v13 }
  0x18   :  { %589 = vmatprep.subr.bf16.mxu0 %v669_v14  ;;  %647 = vmatprep.subr.bf16.mxu1 %v669_v14 }
  0x1b   :  { %590 = vmatpush3.bf16.msra.mxu0 %v670_v15  ;;  %655 = vmatpush3.bf16.msra.mxu1 %v670_v15 }
  0x1c   :  { %591 = vmatprep.subr.bf16.mxu0 %v671_v16  ;;  %648 = vmatprep.subr.bf16.mxu1 %v671_v16  ;;  %v477_v16 = vld [vmem:[%s965_s4 + $0x10] sm:$0xff] }
  0x1f   :  { %592 = vmatpush3.bf16.msra.mxu0 %v672_v17  ;;  %656 = vmatpush3.bf16.msra.mxu1 %v672_v17  ;;  %v485_v17 = vld [vmem:[%s965_s4 + $0x50] sm:$0xff] }
  0x22   :  { %314 = vmatmul.mubr.bf16.vlgmr.msra.gmra.mrb[0].mxu0 %v673_v18  ;;  %346 = vmatmul.mubr.bf16.vlgmr.msra.gmra.mrb[0].mxu1 %v676_v19 }
  0x23   :  { %321 = vmatprep.mubr.bf16.mxu0 %v679_v20  ;;  %353 = vmatprep.mubr.bf16.mxu1 %v681_v21 }
  0x2a   :  { %322 = vmatmul.mubr.bf16.gmra.mrb[4].mxu0 %v683_v22  ;;  %354 = vmatmul.mubr.bf16.gmra.mrb[4].mxu1 %v684_v23  ;;  %v478_v22 = vld [vmem:[%s965_s4 + $0x18] sm:$0xff] }
  0x2b   :  { %329 = vmatprep.mubr.bf16.mxu0 %v685_v24  ;;  %361 = vmatprep.mubr.bf16.mxu1 %v687_v25  ;;  %v486_v23 = vld [vmem:[%s965_s4 + $0x58] sm:$0xff] }
  0x32   :  { %330 = vmatmul.mubr.bf16.gmra.mrb[8].mxu0 %v689_v26  ;;  %362 = vmatmul.mubr.bf16.gmra.mrb[8].mxu1 %v690_v27 }
  0x33   :  { %337 = vmatprep.mubr.bf16.mxu0 %v691_v28  ;;  %369 = vmatprep.mubr.bf16.mxu1 %v693_v29 }
  0x3a   :  { %338 = vmatmul.mubr.bf16.gmra.mrb[12].mxu0 %v695_v30  ;;  %370 = vmatmul.mubr.bf16.gmra.mrb[12].mxu1 %v696_v31 }
  0xf5   :  { %v593_v32 = vpop.f32.mrb[0].mxu0  ;;  %v617_v33 = vpop.f32.mrb[0].mxu1 }
  0xf6   :  { %v594_v34 = vpop.f32.mrb[1].mxu0  ;;  %v618_v36 = vpop.f32.mrb[1].mxu1 }
  0xf7   :  { %v595_v37 = vadd.f32 %v594_v34, %v593_v32  ;;  %v619_v38 = vadd.f32 %v618_v36, %v617_v33  ;;  %v596_v39 = vpop.f32.mrb[2].mxu0  ;;  %v620_v40 = vpop.f32.mrb[2].mxu1 }
  0xf8   :  { %v597_v42 = vpop.f32.mrb[3].mxu0  ;;  %v621_v43 = vpop.f32.mrb[3].mxu1 }
  0xf9   :  { %v436_v44 = vmul.f32 %v595_v37, %v826_v35  ;;  %v444_v45 = vmul.f32 %v619_v38, %v826_v35  ;;  %v598_v46 = vadd.f32 %v597_v42, %v596_v39  ;;  %v622_v47 = vadd.f32 %v621_v43, %v620_v40 }
  0xfb   :  { %v459_v50 = vadd.f32 %v831_v41, %v436_v44  ;;  %v467_v51 = vadd.f32 %v831_v41, %v444_v45  ;;  %v437_v52 = vmul.f32 %v598_v46, %v826_v35  ;;  %v445_v53 = vmul.f32 %v622_v47, %v826_v35 }
  0xfd   :  { %v491_v56 = vadd.f32 %v475_v48, %v459_v50  ;;  %v499_v57 = vadd.f32 %v483_v49, %v467_v51  ;;  %v460_v58 = vadd.f32 %v831_v41, %v437_v52  ;;  %v468_v59 = vadd.f32 %v831_v41, %v445_v53  ;;  %v599_v60 = vpop.f32.mrb[4].mxu0  ;;  %v623_v61 = vpop.f32.mrb[4].mxu1  ;;  %v479_v48 = vld [vmem:[%s965_s4 + $0x20] sm:$0xff] }
  0xfe   :  { %v600_v62 = vpop.f32.mrb[5].mxu0  ;;  %v624_v63 = vpop.f32.mrb[5].mxu1  ;;  %v487_v49 = vld [vmem:[%s965_s4 + $0x60] sm:$0xff] }
  0xff   :  { %v507_v0 = vmax.f32 %v491_v56, 0.0  ;;  %v515_v1 = vmax.f32 %v499_v57, 0.0  ;;  %v492_v2 = vadd.f32 %v476_v54, %v460_v58  ;;  %v500_v3 = vadd.f32 %v484_v55, %v468_v59  ;;  %v602_v4 = vpop.f32.mrb[6].mxu0  ;;  %v626_v5 = vpop.f32.mrb[6].mxu1  ;;  %v480_v58 = vld [vmem:[%s965_s4 + $0x28] sm:$0xff] }
 0x100   :  { %v601_v6 = vadd.f32 %v600_v62, %v599_v60  ;;  %v625_v7 = vadd.f32 %v624_v63, %v623_v61  ;;  %v603_v8 = vpop.f32.mrb[7].mxu0  ;;  %v627_v9 = vpop.f32.mrb[7].mxu1  ;;  %v488_v59 = vld [vmem:[%s965_s4 + $0x68] sm:$0xff] }
 0x101   :  { %523 = vst [vmem:[%s966_s5] sm:$0xff] %v507_v0  ;;  %531 = vst [vmem:[%s966_s5 + $0x40] sm:$0xff] %v515_v1  ;;  %v508_v10 = vmax.f32 %v492_v2, 0.0  ;;  %v516_v11 = vmax.f32 %v500_v3, 0.0  ;;  %v604_v12 = vadd.f32 %v603_v8, %v602_v4  ;;  %v628_v13 = vadd.f32 %v627_v9, %v626_v5 }
 0x102   :  { %v438_v14 = vmul.f32 %v601_v6, %v826_v35  ;;  %v446_v15 = vmul.f32 %v625_v7, %v826_v35 }
 0x103   :  { %524 = vst [vmem:[%s966_s5 + $0x8] sm:$0xff] %v508_v10  ;;  %532 = vst [vmem:[%s966_s5 + $0x48] sm:$0xff] %v516_v11  ;;  %v439_v18 = vmul.f32 %v604_v12, %v826_v35  ;;  %v447_v19 = vmul.f32 %v628_v13, %v826_v35 }
 0x104   :  { %v461_v20 = vadd.f32 %v831_v41, %v438_v14  ;;  %v469_v21 = vadd.f32 %v831_v41, %v446_v15 }
 0x105   :  { %v462_v24 = vadd.f32 %v831_v41, %v439_v18  ;;  %v470_v25 = vadd.f32 %v831_v41, %v447_v19  ;;  %v605_v26 = vpop.f32.mrb[8].mxu0  ;;  %v629_v27 = vpop.f32.mrb[8].mxu1  ;;  %v481_v18 = vld [vmem:[%s965_s4 + $0x30] sm:$0xff] }
 0x106   :  { %v493_v28 = vadd.f32 %v477_v16, %v461_v20  ;;  %v501_v29 = vadd.f32 %v485_v17, %v469_v21  ;;  %v606_v30 = vpop.f32.mrb[9].mxu0  ;;  %v630_v31 = vpop.f32.mrb[9].mxu1  ;;  %v489_v19 = vld [vmem:[%s965_s4 + $0x70] sm:$0xff] }
 0x107   :  { %v494_v32 = vadd.f32 %v478_v22, %v462_v24  ;;  %v502_v33 = vadd.f32 %v486_v23, %v470_v25  ;;  %v607_v34 = vadd.f32 %v606_v30, %v605_v26  ;;  %v631_v36 = vadd.f32 %v630_v31, %v629_v27  ;;  %v608_v37 = vpop.f32.mrb[10].mxu0  ;;  %v632_v38 = vpop.f32.mrb[10].mxu1  ;;  %v482_v24 = vld [vmem:[%s965_s4 + $0x38] sm:$0xff] }
 0x108   :  { %v509_v39 = vmax.f32 %v493_v28, 0.0  ;;  %v517_v40 = vmax.f32 %v501_v29, 0.0  ;;  %v609_v42 = vpop.f32.mrb[11].mxu0  ;;  %v633_v43 = vpop.f32.mrb[11].mxu1  ;;  %v490_v25 = vld [vmem:[%s965_s4 + $0x78] sm:$0xff] }
 0x109   :  { %v510_v44 = vmax.f32 %v494_v32, 0.0  ;;  %v518_v45 = vmax.f32 %v502_v33, 0.0  ;;  %v440_v46 = vmul.f32 %v607_v34, %v826_v35  ;;  %v448_v47 = vmul.f32 %v631_v36, %v826_v35 }
 0x10a   :  { %525 = vst [vmem:[%s966_s5 + $0x10] sm:$0xff] %v509_v39  ;;  %533 = vst [vmem:[%s966_s5 + $0x50] sm:$0xff] %v517_v40  ;;  %v610_v50 = vadd.f32 %v609_v42, %v608_v37  ;;  %v634_v51 = vadd.f32 %v633_v43, %v632_v38 }
 0x10b   :  { %526 = vst [vmem:[%s966_s5 + $0x18] sm:$0xff] %v510_v44  ;;  %534 = vst [vmem:[%s966_s5 + $0x58] sm:$0xff] %v518_v45  ;;  %v463_v52 = vadd.f32 %v831_v41, %v440_v46  ;;  %v471_v53 = vadd.f32 %v831_v41, %v448_v47 }
 0x10c   :  { %v441_v54 = vmul.f32 %v610_v50, %v826_v35  ;;  %v449_v55 = vmul.f32 %v634_v51, %v826_v35 }
 0x10d   :  { %v495_v56 = vadd.f32 %v479_v48, %v463_v52  ;;  %v503_v57 = vadd.f32 %v487_v49, %v471_v53  ;;  %v611_v60 = vpop.f32.mrb[12].mxu0  ;;  %v635_v61 = vpop.f32.mrb[12].mxu1 }
 0x10e   :  { %v464_v62 = vadd.f32 %v831_v41, %v441_v54  ;;  %v472_v63 = vadd.f32 %v831_v41, %v449_v55  ;;  %v612_v0 = vpop.f32.mrb[13].mxu0  ;;  %v636_v1 = vpop.f32.mrb[13].mxu1 }
 0x10f   :  { %v511_v2 = vmax.f32 %v495_v56, 0.0  ;;  %v519_v3 = vmax.f32 %v503_v57, 0.0  ;;  %v613_v4 = vadd.f32 %v612_v0, %v611_v60  ;;  %v637_v5 = vadd.f32 %v636_v1, %v635_v61  ;;  %v614_v6 = vpop.f32.mrb[14].mxu0  ;;  %v638_v7 = vpop.f32.mrb[14].mxu1 }
 0x110   :  { %v496_v8 = vadd.f32 %v480_v58, %v464_v62  ;;  %v504_v9 = vadd.f32 %v488_v59, %v472_v63  ;;  %v615_v10 = vpop.f32.mrb[15].mxu0  ;;  %v639_v11 = vpop.f32.mrb[15].mxu1 }
 0x111   :  { %527 = vst [vmem:[%s966_s5 + $0x20] sm:$0xff] %v511_v2  ;;  %535 = vst [vmem:[%s966_s5 + $0x60] sm:$0xff] %v519_v3  ;;  %v442_v12 = vmul.f32 %v613_v4, %v826_v35  ;;  %v450_v13 = vmul.f32 %v637_v5, %v826_v35  ;;  %v616_v14 = vadd.f32 %v615_v10, %v614_v6 }
 0x112   :  { %v640_v15 = vadd.f32 %v639_v11, %v638_v7  ;;  %v512_v16 = vmax.f32 %v496_v8, 0.0  ;;  %v520_v17 = vmax.f32 %v504_v9, 0.0 }
 0x113   :  { %v465_v20 = vadd.f32 %v831_v41, %v442_v12  ;;  %v473_v21 = vadd.f32 %v831_v41, %v450_v13  ;;  %v443_v22 = vmul.f32 %v616_v14, %v826_v35 }
 0x114   :  { %v451_v23 = vmul.f32 %v640_v15, %v826_v35  ;;  %528 = vst [vmem:[%s966_s5 + $0x28] sm:$0xff] %v512_v16  ;;  %536 = vst [vmem:[%s966_s5 + $0x68] sm:$0xff] %v520_v17 }
 0x115   :  { %v497_v26 = vadd.f32 %v481_v18, %v465_v20  ;;  %v505_v27 = vadd.f32 %v489_v19, %v473_v21  ;;  %v466_v35 = vadd.f32 %v831_v41, %v443_v22 }
 0x116   :  { %v474_v28 = vadd.f32 %v831_v41, %v451_v23 }
 0x117   :  { %v513_v29 = vmax.f32 %v497_v26, 0.0  ;;  %v521_v30 = vmax.f32 %v505_v27, 0.0  ;;  %v498_v31 = vadd.f32 %v482_v24, %v466_v35 }
 0x118   :  { %v506_v32 = vadd.f32 %v490_v25, %v474_v28 }
 0x119   :  { %529 = vst [vmem:[%s966_s5 + $0x30] sm:$0xff] %v513_v29  ;;  %537 = vst [vmem:[%s966_s5 + $0x70] sm:$0xff] %v521_v30  ;;  %v514_v33 = vmax.f32 %v498_v31, 0.0 }
 0x11a   :  { %v522_v34 = vmax.f32 %v506_v32, 0.0 }
 0x11b   :  { %530 = vst [vmem:[%s966_s5 + $0x38] sm:$0xff] %v514_v33 }
 0x11c   :  { %538 = vst [vmem:[%s966_s5 + $0x78] sm:$0xff] %v522_v34 }

// kernel: pose_resnet_dann_forward.31
= control target key start
LH: loop header
LB: loop body
LE: loop exit
PB: predicated region body
PF: predicated region fallthrough
CT: control target
= control target key end

     0   :  { %s471_s1 = inlined_call_operand.vmem [shape: bf16[256,128], index: 1, kind: input, shape index: {}]   ;;  %s472_s0 = inlined_call_operand.vmem [shape: bf16[32,256], index: 0, kind: input, shape index: {}]   ;;  %s473_s2 = inlined_call_operand.vmem [shape: f32[1,128], index: 2, kind: input, shape index: {}]   ;;  %s474_s3 = inlined_call_operand.vmem [shape: f32[1,128], index: 3, kind: input, shape index: {}]   ;;  %s475_s4 = inlined_call_operand.vmem [shape: f32[32,128], index: 4, kind: output, shape index: {}]  }
   0x1   :  { %v346_v0 = vld [vmem:[%s471_s1 + $0x40] sm:$0xff]   ;;  %v348_v2 = vld [vmem:[%s471_s1 + $0x48] sm:$0xff]   ;;  %v350_v4 = vld [vmem:[%s471_s1 + $0x50] sm:$0xff]  }
   0x2   :  { %v347_v1 = vld [vmem:[%s471_s1] sm:$0xff]   ;;  %302 = vmatprep.subr.bf16.mxu0 %v346_v0  ;;  %330 = vmatprep.subr.bf16.mxu1 %v346_v0  ;;  %v349_v3 = vld [vmem:[%s471_s1 + $0x8] sm:$0xff]   ;;  %v351_v5 = vld [vmem:[%s471_s1 + $0x10] sm:$0xff]  }
   0x3   :  { %303 = vmatpush3.bf16.msra.mxu0 %v347_v1  ;;  %338 = vmatpush3.bf16.msra.mxu1 %v347_v1  ;;  %v352_v6 = vld [vmem:[%s471_s1 + $0x58] sm:$0xff]   ;;  %v354_v8 = vld [vmem:[%s471_s1 + $0x60] sm:$0xff]   ;;  %v356_v10 = vld [vmem:[%s471_s1 + $0x68] sm:$0xff]  }
   0x4   :  { %304 = vmatprep.subr.bf16.mxu0 %v348_v2  ;;  %331 = vmatprep.subr.bf16.mxu1 %v348_v2  ;;  %v353_v7 = vld [vmem:[%s471_s1 + $0x18] sm:$0xff]   ;;  %v355_v9 = vld [vmem:[%s471_s1 + $0x20] sm:$0xff]   ;;  %v357_v13 = vld [vmem:[%s471_s1 + $0x28] sm:$0xff]  }
   0x5   :  { %v364_v11 = vld [vmem:[%s472_s0 + $0x4] ss:$8 sps:$4 sm:$0xff]   ;;  %v367_v12 = vld [vmem:[%s472_s0 + $0x14] ss:$8 sps:$4 sm:$0xff]   ;;  %v362_v18 = vld [vmem:[%s472_s0] ss:$8 sps:$4 sm:$0xff]  }
   0x6   :  { %v358_v14 = vld [vmem:[%s471_s1 + $0x70] sm:$0xff]   ;;  %214 = vmatprep.mubr.bf16.mxu0 %v364_v11  ;;  %222 = vmatprep.mubr.bf16.mxu1 %v367_v12  ;;  %v360_v16 = vld [vmem:[%s471_s1 + $0x78] sm:$0xff]   ;;  %v300_v23 = vld [vmem:[%s473_s2] ss:$0 sm:$0xff] }
   0x7   :  { %305 = vmatpush3.bf16.msra.mxu0 %v349_v3  ;;  %339 = vmatpush3.bf16.msra.mxu1 %v349_v3  ;;  %v359_v15 = vld [vmem:[%s471_s1 + $0x30] sm:$0xff]   ;;  %v361_v17 = vld [vmem:[%s471_s1 + $0x38] sm:$0xff]   ;;  %v301_v29 = vld [vmem:[%s474_s3] ss:$0 sm:$0xff] }
   0x8   :  { %306 = vmatprep.subr.bf16.mxu0 %v350_v4  ;;  %332 = vmatprep.subr.bf16.mxu1 %v350_v4  ;;  %v365_v19 = vld [vmem:[%s472_s0 + $0x10] ss:$8 sps:$4 sm:$0xff]  }
   0xb   :  { %307 = vmatpush3.bf16.msra.mxu0 %v351_v5  ;;  %340 = vmatpush3.bf16.msra.mxu1 %v351_v5 }
   0xc   :  { %308 = vmatprep.subr.bf16.mxu0 %v352_v6  ;;  %333 = vmatprep.subr.bf16.mxu1 %v352_v6 }
   0xf   :  { %309 = vmatpush3.bf16.msra.mxu0 %v353_v7  ;;  %341 = vmatpush3.bf16.msra.mxu1 %v353_v7 }
  0x10   :  { %310 = vmatprep.subr.bf16.mxu0 %v354_v8  ;;  %334 = vmatprep.subr.bf16.mxu1 %v354_v8 }
  0x13   :  { %311 = vmatpush3.bf16.msra.mxu0 %v355_v9  ;;  %342 = vmatpush3.bf16.msra.mxu1 %v355_v9 }
  0x14   :  { %312 = vmatprep.subr.bf16.mxu0 %v356_v10  ;;  %335 = vmatprep.subr.bf16.mxu1 %v356_v10 }
  0x17   :  { %313 = vmatpush3.bf16.msra.mxu0 %v357_v13  ;;  %343 = vmatpush3.bf16.msra.mxu1 %v357_v13 }
  0x18   :  { %314 = vmatprep.subr.bf16.mxu0 %v358_v14  ;;  %336 = vmatprep.subr.bf16.mxu1 %v358_v14 }
  0x1b   :  { %315 = vmatpush3.bf16.msra.mxu0 %v359_v15  ;;  %344 = vmatpush3.bf16.msra.mxu1 %v359_v15 }
  0x1c   :  { %316 = vmatprep.subr.bf16.mxu0 %v360_v16  ;;  %337 = vmatprep.subr.bf16.mxu1 %v360_v16 }
  0x1f   :  { %317 = vmatpush3.bf16.msra.mxu0 %v361_v17  ;;  %345 = vmatpush3.bf16.msra.mxu1 %v361_v17 }
  0x22   :  { %215 = vmatmul.mubr.bf16.vlgmr.msra.gmra.mrb[0].mxu0 %v362_v18  ;;  %223 = vmatmul.mubr.bf16.vlgmr.msra.gmra.mrb[0].mxu1 %v365_v19 }
  0xf5   :  { %v318_v20 = vpop.f32.mrb[0].mxu0  ;;  %v324_v21 = vpop.f32.mrb[0].mxu1 }
  0xf6   :  { %v319_v22 = vpop.f32.mrb[1].mxu0  ;;  %v325_v24 = vpop.f32.mrb[1].mxu1 }
  0xf7   :  { %v320_v25 = vadd.f32 %v319_v22, %v318_v20  ;;  %v326_v26 = vadd.f32 %v325_v24, %v324_v21  ;;  %v321_v27 = vpop.f32.mrb[2].mxu0  ;;  %v327_v28 = vpop.f32.mrb[2].mxu1 }
  0xf8   :  { %v322_v30 = vpop.f32.mrb[3].mxu0  ;;  %v328_v31 = vpop.f32.mrb[3].mxu1 }
  0xf9   :  { %v253_v32 = vmul.f32 %v320_v25, %v300_v23  ;;  %v255_v33 = vmul.f32 %v326_v26, %v300_v23  ;;  %v323_v34 = vadd.f32 %v322_v30, %v321_v27  ;;  %v329_v35 = vadd.f32 %v328_v31, %v327_v28 }
  0xfb   :  { %v264_v36 = vadd.f32 %v301_v29, %v253_v32  ;;  %v266_v37 = vadd.f32 %v301_v29, %v255_v33  ;;  %v254_v38 = vmul.f32 %v323_v34, %v300_v23  ;;  %v256_v39 = vmul.f32 %v329_v35, %v300_v23 }
  0xfd   :  { %v268_v40 = vmax.f32 %v264_v36, 0.0  ;;  %v270_v41 = vmax.f32 %v266_v37, 0.0  ;;  %v265_v42 = vadd.f32 %v301_v29, %v254_v38  ;;  %v267_v43 = vadd.f32 %v301_v29, %v256_v39 }
  0xff   :  { %272 = vst [vmem:[%s475_s4] sm:$0xff] %v268_v40  ;;  %274 = vst [vmem:[%s475_s4 + $0x10] sm:$0xff] %v270_v41  ;;  %v269_v44 = vmax.f32 %v265_v42, 0.0  ;;  %v271_v45 = vmax.f32 %v267_v43, 0.0 }
 0x101   :  { %273 = vst [vmem:[%s475_s4 + $0x8] sm:$0xff] %v269_v44  ;;  %275 = vst [vmem:[%s475_s4 + $0x18] sm:$0xff] %v271_v45 }

// kernel: pose_resnet_dann_forward.32
= control target key start
LH: loop header
LB: loop body
LE: loop exit
PB: predicated region body
PF: predicated region fallthrough
CT: control target
= control target key end

     0   :  { %s329_s1 = inlined_call_operand.vmem [shape: bf16[128,128], index: 1, kind: input, shape index: {}]   ;;  %s330_s0 = inlined_call_operand.vmem [shape: bf16[32,128], index: 0, kind: input, shape index: {}]   ;;  %s331_s2 = inlined_call_operand.vmem [shape: f32[1,128], index: 2, kind: input, shape index: {}]   ;;  %s332_s3 = inlined_call_operand.vmem [shape: f32[1,128], index: 3, kind: input, shape index: {}]   ;;  %s333_s4 = inlined_call_operand.vmem [shape: f32[32,128], index: 4, kind: output, shape index: {}]  }
   0x1   :  { %v246_v0 = vld [vmem:[%s329_s1] sm:$0xff]   ;;  %v247_v1 = vld [vmem:[%s329_s1 + $0x8] sm:$0xff]   ;;  %v248_v2 = vld [vmem:[%s329_s1 + $0x10] sm:$0xff]  }
   0x2   :  { %226 = vmatprep.subr.bf16.mxu0 %v246_v0  ;;  %v249_v3 = vld [vmem:[%s329_s1 + $0x18] sm:$0xff]   ;;  %v254_v4 = vld [vmem:[%s330_s0] sm:$0xff]   ;;  %v251_v6 = vld [vmem:[%s329_s1 + $0x28] sm:$0xff]  }
   0x3   :  { %227 = vmatpush3.bf16.msra.mxu0 %v246_v0  ;;  %242 = vmatprep.mubr.bf16.mxu0 %v254_v4  ;;  %v250_v5 = vld [vmem:[%s329_s1 + $0x20] sm:$0xff]   ;;  %v252_v7 = vld [vmem:[%s329_s1 + $0x30] sm:$0xff]   ;;  %v253_v8 = vld [vmem:[%s329_s1 + $0x38] sm:$0xff]  }
   0x4   :  { %228 = vmatprep.subr.bf16.mxu0 %v247_v1  ;;  %v255_v9 = vld [vmem:[%s330_s0 + $0x8] sm:$0xff]   ;;  %v214_v10 = vld [vmem:[%s331_s2] ss:$0 sm:$0xff] }
   0x5   :  { %v215_v12 = vld [vmem:[%s332_s3] ss:$0 sm:$0xff] }
   0x7   :  { %229 = vmatpush3.bf16.msra.mxu0 %v247_v1 }
   0x8   :  { %230 = vmatprep.subr.bf16.mxu0 %v248_v2 }
   0xb   :  { %231 = vmatpush3.bf16.msra.mxu0 %v248_v2 }
   0xc   :  { %232 = vmatprep.subr.bf16.mxu0 %v249_v3 }
   0xf   :  { %233 = vmatpush3.bf16.msra.mxu0 %v249_v3 }
  0x10   :  { %234 = vmatprep.subr.bf16.mxu0 %v250_v5 }
  0x13   :  { %235 = vmatpush3.bf16.msra.mxu0 %v250_v5 }
  0x14   :  { %236 = vmatprep.subr.bf16.mxu0 %v251_v6 }
  0x17   :  { %237 = vmatpush3.bf16.msra.mxu0 %v251_v6 }
  0x18   :  { %238 = vmatprep.subr.bf16.mxu0 %v252_v7 }
  0x1b   :  { %239 = vmatpush3.bf16.msra.mxu0 %v252_v7 }
  0x1c   :  { %240 = vmatprep.subr.bf16.mxu0 %v253_v8 }
  0x1f   :  { %241 = vmatpush3.bf16.msra.mxu0 %v253_v8 }
  0x22   :  { %243 = vmatmul.mubr.bf16.vlgmr.msra.gmra.mrb[0].mxu0 %v255_v9 }
  0xf5   :  { %v244_v11 = vpop.f32.mrb[0].mxu0 }
  0xf6   :  { %v183_v13 = vmul.f32 %v244_v11, %v214_v10  ;;  %v144_v14 = vpop.f32.mrb[1].mxu0 }
  0xf7   :  { %v181_v15 = vmul.f32 %v214_v10, %v144_v14  ;;  %v245_v16 = vpop.f32.mrb[2].mxu0 }
  0xf8   :  { %v194_v17 = vadd.f32 %v215_v12, %v183_v13  ;;  %v184_v18 = vmul.f32 %v245_v16, %v214_v10  ;;  %v147_v19 = vpop.f32.mrb[3].mxu0 }
  0xf9   :  { %v192_v20 = vadd.f32 %v215_v12, %v181_v15  ;;  %v182_v21 = vmul.f32 %v214_v10, %v147_v19 }
  0xfa   :  { %198 = vst [vmem:[%s333_s4 + $0x10] sm:$0xff] %v194_v17  ;;  %v195_v22 = vadd.f32 %v215_v12, %v184_v18 }
  0xfb   :  { %196 = vst [vmem:[%s333_s4] sm:$0xff] %v192_v20  ;;  %v193_v23 = vadd.f32 %v215_v12, %v182_v21 }
  0xfc   :  { %199 = vst [vmem:[%s333_s4 + $0x18] sm:$0xff] %v195_v22 }
  0xfd   :  { %197 = vst [vmem:[%s333_s4 + $0x8] sm:$0xff] %v193_v23 }

// kernel: pose_resnet_dann_forward.33
= control target key start
LH: loop header
LB: loop body
LE: loop exit
PB: predicated region body
PF: predicated region fallthrough
CT: control target
= control target key end

     0   :  { %s692_s1 = inlined_call_operand.vmem [shape: bf16[384,128], index: 1, kind: input, shape index: {}]   ;;  %s693_s0 = inlined_call_operand.vmem [shape: bf16[32,384], index: 0, kind: input, shape index: {}]   ;;  %s694_s2 = inlined_call_operand.vmem [shape: f32[1,128], index: 2, kind: input, shape index: {}]   ;;  %s695_s3 = inlined_call_operand.vmem [shape: f32[1,128], index: 3, kind: input, shape index: {}]   ;;  %s696_s4 = inlined_call_operand.vmem [shape: f32[32,128], index: 4, kind: input, shape index: {}]   ;;  %s697_s5 = inlined_call_operand.vmem [shape: f32[32,128], index: 5, kind: output, shape index: {}]  }
   0x1   :  { %v510_v0 = vld [vmem:[%s692_s1 + $0x40] sm:$0xff]   ;;  %v513_v3 = vld [vmem:[%s692_s1 + $0x48] sm:$0xff]   ;;  %v516_v6 = vld [vmem:[%s692_s1 + $0x50] sm:$0xff]  }
   0x2   :  { %v511_v1 = vld [vmem:[%s692_s1] sm:$0xff]   ;;  %452 = vmatprep.subr.bf16.mxu0 %v510_v0  ;;  %v514_v4 = vld [vmem:[%s692_s1 + $0x8] sm:$0xff]   ;;  %v517_v7 = vld [vmem:[%s692_s1 + $0x10] sm:$0xff]  }
   0x3   :  { %v512_v2 = vld [vmem:[%s692_s1 + $0x80] sm:$0xff]   ;;  %453 = vmatpush3.bf16.msra.mxu0 %v511_v1  ;;  %v515_v5 = vld [vmem:[%s692_s1 + $0x88] sm:$0xff]   ;;  %v518_v8 = vld [vmem:[%s692_s1 + $0x90] sm:$0xff]  }
   0x4   :  { %490 = vmatprep.subr.bf16.mxu1 %v512_v2  ;;  %454 = vmatprep.subr.bf16.mxu0 %v513_v3  ;;  %v519_v9 = vld [vmem:[%s692_s1 + $0x58] sm:$0xff]   ;;  %v522_v12 = vld [vmem:[%s692_s1 + $0x60] sm:$0xff]   ;;  %v525_v15 = vld [vmem:[%s692_s1 + $0x68] sm:$0xff]  }
   0x5   :  { %491 = vmatpush3.bf16.msra.mxu1 %v512_v2  ;;  %v520_v10 = vld [vmem:[%s692_s1 + $0x18] sm:$0xff]   ;;  %v524_v13 = vld [vmem:[%s692_s1 + $0xa0] sm:$0xff]   ;;  %v527_v16 = vld [vmem:[%s692_s1 + $0xa8] sm:$0xff]  }
   0x6   :  { %492 = vmatprep.subr.bf16.mxu1 %v515_v5  ;;  %v521_v11 = vld [vmem:[%s692_s1 + $0x98] sm:$0xff]   ;;  %v523_v14 = vld [vmem:[%s692_s1 + $0x20] sm:$0xff]   ;;  %v526_v17 = vld [vmem:[%s692_s1 + $0x28] sm:$0xff]  }
   0x7   :  { %455 = vmatpush3.bf16.msra.mxu0 %v514_v4  ;;  %v528_v18 = vld [vmem:[%s692_s1 + $0x70] sm:$0xff]   ;;  %v531_v21 = vld [vmem:[%s692_s1 + $0x78] sm:$0xff]   ;;  %v534_v26 = vld [vmem:[%s693_s0] ss:$12 sps:$4 sm:$0xff]  }
   0x8   :  { %456 = vmatprep.subr.bf16.mxu0 %v516_v6  ;;  %v529_v19 = vld [vmem:[%s692_s1 + $0x30] sm:$0xff]   ;;  %v533_v22 = vld [vmem:[%s692_s1 + $0xb8] sm:$0xff]   ;;  %v538_v28 = vld [vmem:[%s693_s0 + $0x20] ss:$12 sps:$4 sm:$0xff]  }
   0x9   :  { %493 = vmatpush3.bf16.msra.mxu1 %v515_v5  ;;  %v530_v20 = vld [vmem:[%s692_s1 + $0xb0] sm:$0xff]   ;;  %v532_v25 = vld [vmem:[%s692_s1 + $0x38] sm:$0xff]   ;;  %v450_v37 = vld [vmem:[%s694_s2] ss:$0 sm:$0xff] }
   0xa   :  { %494 = vmatprep.subr.bf16.mxu1 %v518_v8  ;;  %v536_v23 = vld [vmem:[%s693_s0 + $0x4] ss:$12 sps:$4 sm:$0xff]   ;;  %v537_v24 = vld [vmem:[%s693_s0 + $0x8] ss:$12 sps:$4 sm:$0xff]   ;;  %v451_v41 = vld [vmem:[%s695_s3] ss:$0 sm:$0xff] }
   0xb   :  { %457 = vmatpush3.bf16.msra.mxu0 %v517_v7  ;;  %297 = vmatprep.mubr.bf16.mxu0 %v536_v23  ;;  %v539_v27 = vld [vmem:[%s693_s0 + $0x1c] ss:$12 sps:$4 sm:$0xff]   ;;  %v541_v29 = vld [vmem:[%s693_s0 + $0x18] ss:$12 sps:$4 sm:$0xff]   ;;  %v402_v63 = vld [vmem:[%s696_s4 + $0x10] sm:$0xff] }
   0xc   :  { %458 = vmatprep.subr.bf16.mxu0 %v519_v9  ;;  %506 = vmatprep.mubr.bf16.mxu1 %v537_v24  ;;  %v400_v45 = vld [vmem:[%s696_s4] sm:$0xff]  ;;  %v401_v49 = vld [vmem:[%s696_s4 + $0x8] sm:$0xff]  ;;  %v403_v2 = vld [vmem:[%s696_s4 + $0x18] sm:$0xff] }
   0xd   :  { %495 = vmatpush3.bf16.msra.mxu1 %v518_v8 }
   0xe   :  { %496 = vmatprep.subr.bf16.mxu1 %v521_v11 }
   0xf   :  { %459 = vmatpush3.bf16.msra.mxu0 %v520_v10 }
  0x10   :  { %460 = vmatprep.subr.bf16.mxu0 %v522_v12 }
  0x11   :  { %497 = vmatpush3.bf16.msra.mxu1 %v521_v11 }
  0x12   :  { %498 = vmatprep.subr.bf16.mxu1 %v524_v13 }
  0x13   :  { %461 = vmatpush3.bf16.msra.mxu0 %v523_v14 }
  0x14   :  { %462 = vmatprep.subr.bf16.mxu0 %v525_v15 }
  0x15   :  { %499 = vmatpush3.bf16.msra.mxu1 %v524_v13 }
  0x16   :  { %500 = vmatprep.subr.bf16.mxu1 %v527_v16 }
  0x17   :  { %463 = vmatpush3.bf16.msra.mxu0 %v526_v17 }
  0x18   :  { %464 = vmatprep.subr.bf16.mxu0 %v528_v18 }
  0x19   :  { %501 = vmatpush3.bf16.msra.mxu1 %v527_v16 }
  0x1a   :  { %502 = vmatprep.subr.bf16.mxu1 %v530_v20 }
  0x1b   :  { %465 = vmatpush3.bf16.msra.mxu0 %v529_v19 }
  0x1c   :  { %466 = vmatprep.subr.bf16.mxu0 %v531_v21 }
  0x1d   :  { %503 = vmatpush3.bf16.msra.mxu1 %v530_v20 }
  0x1e   :  { %504 = vmatprep.subr.bf16.mxu1 %v533_v22 }
  0x1f   :  { %467 = vmatpush3.bf16.msra.mxu0 %v532_v25 }
  0x21   :  { %505 = vmatpush3.bf16.msra.mxu1 %v533_v22 }
  0x22   :  { %298 = vmatmul.mubr.bf16.vlgmr.msra.gmra.mrb[0].mxu0 %v534_v26 }
  0x23   :  { %305 = vmatprep.mubr.bf16.mxu0 %v539_v27 }
  0x24   :  { %507 = vmatmul.mubr.bf16.vlgmr.msra.gmra.mrb[0].mxu1 %v538_v28 }
  0x2a   :  { %306 = vmatmul.mubr.bf16.gmra.mrb[4].mxu0 %v541_v29 }
  0xf5   :  { %v468_v30 = vpop.f32.mrb[0].mxu0 }
  0xf6   :  { %v469_v31 = vpop.f32.mrb[1].mxu0 }
  0xf7   :  { %v470_v32 = vadd.f32 %v469_v31, %v468_v30  ;;  %v471_v33 = vpop.f32.mrb[2].mxu0  ;;  %v508_v34 = vpop.f32.mrb[0].mxu1 }
  0xf8   :  { %v472_v35 = vpop.f32.mrb[3].mxu0  ;;  %v348_v36 = vpop.f32.mrb[1].mxu1 }
  0xf9   :  { %v473_v38 = vadd.f32 %v472_v35, %v471_v33  ;;  %v349_v39 = vadd.f32 %v470_v32, %v348_v36  ;;  %v509_v40 = vpop.f32.mrb[2].mxu1 }
  0xfa   :  { %v351_v42 = vpop.f32.mrb[3].mxu1 }
  0xfb   :  { %v385_v43 = vmul.f32 %v450_v37, %v349_v39  ;;  %v352_v44 = vadd.f32 %v473_v38, %v351_v42 }
  0xfd   :  { %v396_v46 = vadd.f32 %v451_v41, %v385_v43  ;;  %v386_v47 = vmul.f32 %v450_v37, %v352_v44  ;;  %v474_v48 = vpop.f32.mrb[4].mxu0 }
  0xfe   :  { %v475_v50 = vpop.f32.mrb[5].mxu0 }
  0xff   :  { %v404_v51 = vadd.f32 %v400_v45, %v396_v46  ;;  %v397_v52 = vadd.f32 %v451_v41, %v386_v47  ;;  %v476_v53 = vadd.f32 %v475_v50, %v474_v48  ;;  %v477_v54 = vpop.f32.mrb[6].mxu0 }
 0x100   :  { %v478_v55 = vpop.f32.mrb[7].mxu0 }
 0x101   :  { %v408_v56 = vmax.f32 %v404_v51, 0.0  ;;  %v405_v57 = vadd.f32 %v401_v49, %v397_v52  ;;  %v357_v58 = vadd.f32 %v508_v34, %v476_v53  ;;  %v479_v59 = vadd.f32 %v478_v55, %v477_v54 }
 0x103   :  { %412 = vst [vmem:[%s697_s5] sm:$0xff] %v408_v56  ;;  %v409_v60 = vmax.f32 %v405_v57, 0.0  ;;  %v387_v61 = vmul.f32 %v450_v37, %v357_v58  ;;  %v360_v62 = vadd.f32 %v509_v40, %v479_v59 }
 0x105   :  { %413 = vst [vmem:[%s697_s5 + $0x8] sm:$0xff] %v409_v60  ;;  %v398_v0 = vadd.f32 %v451_v41, %v387_v61  ;;  %v388_v1 = vmul.f32 %v450_v37, %v360_v62 }
 0x107   :  { %v406_v3 = vadd.f32 %v402_v63, %v398_v0  ;;  %v399_v4 = vadd.f32 %v451_v41, %v388_v1 }
 0x109   :  { %v410_v5 = vmax.f32 %v406_v3, 0.0  ;;  %v407_v6 = vadd.f32 %v403_v2, %v399_v4 }
 0x10b   :  { %414 = vst [vmem:[%s697_s5 + $0x10] sm:$0xff] %v410_v5  ;;  %v411_v7 = vmax.f32 %v407_v6, 0.0 }
 0x10d   :  { %415 = vst [vmem:[%s697_s5 + $0x18] sm:$0xff] %v411_v7 }

// kernel: pose_resnet_dann_forward.34
= control target key start
LH: loop header
LB: loop body
LE: loop exit
PB: predicated region body
PF: predicated region fallthrough
CT: control target
= control target key end

     0   :  { %s664_s1 = inlined_call_operand.vmem [shape: bf16[384,128], index: 1, kind: input, shape index: {}]   ;;  %s665_s0 = inlined_call_operand.vmem [shape: bf16[32,384], index: 0, kind: input, shape index: {}]   ;;  %s666_s2 = inlined_call_operand.vmem [shape: f32[1,128], index: 2, kind: input, shape index: {}]   ;;  %s667_s3 = inlined_call_operand.vmem [shape: f32[1,128], index: 3, kind: input, shape index: {}]   ;;  %s668_s4 = inlined_call_operand.vmem [shape: f32[32,128], index: 4, kind: output, shape index: {}]  }
   0x1   :  { %v499_v0 = vld [vmem:[%s664_s1 + $0x40] sm:$0xff]   ;;  %v502_v3 = vld [vmem:[%s664_s1 + $0x48] sm:$0xff]   ;;  %v505_v6 = vld [vmem:[%s664_s1 + $0x50] sm:$0xff]  }
   0x2   :  { %v500_v1 = vld [vmem:[%s664_s1] sm:$0xff]   ;;  %441 = vmatprep.subr.bf16.mxu0 %v499_v0  ;;  %v503_v4 = vld [vmem:[%s664_s1 + $0x8] sm:$0xff]   ;;  %v506_v7 = vld [vmem:[%s664_s1 + $0x10] sm:$0xff]  }
   0x3   :  { %v501_v2 = vld [vmem:[%s664_s1 + $0x80] sm:$0xff]   ;;  %442 = vmatpush3.bf16.msra.mxu0 %v500_v1  ;;  %v504_v5 = vld [vmem:[%s664_s1 + $0x88] sm:$0xff]   ;;  %v507_v8 = vld [vmem:[%s664_s1 + $0x90] sm:$0xff]  }
   0x4   :  { %479 = vmatprep.subr.bf16.mxu1 %v501_v2  ;;  %443 = vmatprep.subr.bf16.mxu0 %v502_v3  ;;  %v508_v9 = vld [vmem:[%s664_s1 + $0x58] sm:$0xff]   ;;  %v511_v12 = vld [vmem:[%s664_s1 + $0x60] sm:$0xff]   ;;  %v514_v15 = vld [vmem:[%s664_s1 + $0x68] sm:$0xff]  }
   0x5   :  { %480 = vmatpush3.bf16.msra.mxu1 %v501_v2  ;;  %v509_v10 = vld [vmem:[%s664_s1 + $0x18] sm:$0xff]   ;;  %v513_v13 = vld [vmem:[%s664_s1 + $0xa0] sm:$0xff]   ;;  %v516_v16 = vld [vmem:[%s664_s1 + $0xa8] sm:$0xff]  }
   0x6   :  { %481 = vmatprep.subr.bf16.mxu1 %v504_v5  ;;  %v510_v11 = vld [vmem:[%s664_s1 + $0x98] sm:$0xff]   ;;  %v512_v14 = vld [vmem:[%s664_s1 + $0x20] sm:$0xff]   ;;  %v515_v17 = vld [vmem:[%s664_s1 + $0x28] sm:$0xff]  }
   0x7   :  { %444 = vmatpush3.bf16.msra.mxu0 %v503_v4  ;;  %v517_v18 = vld [vmem:[%s664_s1 + $0x70] sm:$0xff]   ;;  %v520_v21 = vld [vmem:[%s664_s1 + $0x78] sm:$0xff]   ;;  %v523_v26 = vld [vmem:[%s665_s0] ss:$12 sps:$4 sm:$0xff]  }
   0x8   :  { %445 = vmatprep.subr.bf16.mxu0 %v505_v6  ;;  %v518_v19 = vld [vmem:[%s664_s1 + $0x30] sm:$0xff]   ;;  %v522_v22 = vld [vmem:[%s664_s1 + $0xb8] sm:$0xff]   ;;  %v527_v28 = vld [vmem:[%s665_s0 + $0x20] ss:$12 sps:$4 sm:$0xff]  }
   0x9   :  { %482 = vmatpush3.bf16.msra.mxu1 %v504_v5  ;;  %v519_v20 = vld [vmem:[%s664_s1 + $0xb0] sm:$0xff]   ;;  %v521_v25 = vld [vmem:[%s664_s1 + $0x38] sm:$0xff]   ;;  %v439_v37 = vld [vmem:[%s666_s2] ss:$0 sm:$0xff] }
   0xa   :  { %483 = vmatprep.subr.bf16.mxu1 %v507_v8  ;;  %v525_v23 = vld [vmem:[%s665_s0 + $0x4] ss:$12 sps:$4 sm:$0xff]   ;;  %v526_v24 = vld [vmem:[%s665_s0 + $0x8] ss:$12 sps:$4 sm:$0xff]   ;;  %v440_v41 = vld [vmem:[%s667_s3] ss:$0 sm:$0xff] }
   0xb   :  { %446 = vmatpush3.bf16.msra.mxu0 %v506_v7  ;;  %294 = vmatprep.mubr.bf16.mxu0 %v525_v23  ;;  %v528_v27 = vld [vmem:[%s665_s0 + $0x1c] ss:$12 sps:$4 sm:$0xff]   ;;  %v530_v29 = vld [vmem:[%s665_s0 + $0x18] ss:$12 sps:$4 sm:$0xff]  }
   0xc   :  { %447 = vmatprep.subr.bf16.mxu0 %v508_v9  ;;  %495 = vmatprep.mubr.bf16.mxu1 %v526_v24 }
   0xd   :  { %484 = vmatpush3.bf16.msra.mxu1 %v507_v8 }
   0xe   :  { %485 = vmatprep.subr.bf16.mxu1 %v510_v11 }
   0xf   :  { %448 = vmatpush3.bf16.msra.mxu0 %v509_v10 }
  0x10   :  { %449 = vmatprep.subr.bf16.mxu0 %v511_v12 }
  0x11   :  { %486 = vmatpush3.bf16.msra.mxu1 %v510_v11 }
  0x12   :  { %487 = vmatprep.subr.bf16.mxu1 %v513_v13 }
  0x13   :  { %450 = vmatpush3.bf16.msra.mxu0 %v512_v14 }
  0x14   :  { %451 = vmatprep.subr.bf16.mxu0 %v514_v15 }
  0x15   :  { %488 = vmatpush3.bf16.msra.mxu1 %v513_v13 }
  0x16   :  { %489 = vmatprep.subr.bf16.mxu1 %v516_v16 }
  0x17   :  { %452 = vmatpush3.bf16.msra.mxu0 %v515_v17 }
  0x18   :  { %453 = vmatprep.subr.bf16.mxu0 %v517_v18 }
  0x19   :  { %490 = vmatpush3.bf16.msra.mxu1 %v516_v16 }
  0x1a   :  { %491 = vmatprep.subr.bf16.mxu1 %v519_v20 }
  0x1b   :  { %454 = vmatpush3.bf16.msra.mxu0 %v518_v19 }
  0x1c   :  { %455 = vmatprep.subr.bf16.mxu0 %v520_v21 }
  0x1d   :  { %492 = vmatpush3.bf16.msra.mxu1 %v519_v20 }
  0x1e   :  { %493 = vmatprep.subr.bf16.mxu1 %v522_v22 }
  0x1f   :  { %456 = vmatpush3.bf16.msra.mxu0 %v521_v25 }
  0x21   :  { %494 = vmatpush3.bf16.msra.mxu1 %v522_v22 }
  0x22   :  { %295 = vmatmul.mubr.bf16.vlgmr.msra.gmra.mrb[0].mxu0 %v523_v26 }
  0x23   :  { %302 = vmatprep.mubr.bf16.mxu0 %v528_v27 }
  0x24   :  { %496 = vmatmul.mubr.bf16.vlgmr.msra.gmra.mrb[0].mxu1 %v527_v28 }
  0x2a   :  { %303 = vmatmul.mubr.bf16.gmra.mrb[4].mxu0 %v530_v29 }
  0xf5   :  { %v457_v30 = vpop.f32.mrb[0].mxu0 }
  0xf6   :  { %v458_v31 = vpop.f32.mrb[1].mxu0 }
  0xf7   :  { %v459_v32 = vadd.f32 %v458_v31, %v457_v30  ;;  %v460_v33 = vpop.f32.mrb[2].mxu0  ;;  %v497_v34 = vpop.f32.mrb[0].mxu1 }
  0xf8   :  { %v461_v35 = vpop.f32.mrb[3].mxu0  ;;  %v345_v36 = vpop.f32.mrb[1].mxu1 }
  0xf9   :  { %v462_v38 = vadd.f32 %v461_v35, %v460_v33  ;;  %v346_v39 = vadd.f32 %v459_v32, %v345_v36  ;;  %v498_v40 = vpop.f32.mrb[2].mxu1 }
  0xfa   :  { %v348_v42 = vpop.f32.mrb[3].mxu1 }
  0xfb   :  { %v382_v43 = vmul.f32 %v439_v37, %v346_v39  ;;  %v349_v44 = vadd.f32 %v462_v38, %v348_v42 }
  0xfd   :  { %v393_v45 = vadd.f32 %v440_v41, %v382_v43  ;;  %v383_v46 = vmul.f32 %v439_v37, %v349_v44  ;;  %v463_v47 = vpop.f32.mrb[4].mxu0 }
  0xfe   :  { %v464_v48 = vpop.f32.mrb[5].mxu0 }
  0xff   :  { %v397_v49 = vmax.f32 %v393_v45, 0.0  ;;  %v394_v50 = vadd.f32 %v440_v41, %v383_v46  ;;  %v465_v51 = vadd.f32 %v464_v48, %v463_v47  ;;  %v466_v52 = vpop.f32.mrb[6].mxu0 }
 0x100   :  { %v467_v53 = vpop.f32.mrb[7].mxu0 }
 0x101   :  { %401 = vst [vmem:[%s668_s4] sm:$0xff] %v397_v49  ;;  %v398_v54 = vmax.f32 %v394_v50, 0.0  ;;  %v354_v55 = vadd.f32 %v497_v34, %v465_v51  ;;  %v468_v56 = vadd.f32 %v467_v53, %v466_v52 }
 0x103   :  { %402 = vst [vmem:[%s668_s4 + $0x8] sm:$0xff] %v398_v54  ;;  %v384_v57 = vmul.f32 %v439_v37, %v354_v55  ;;  %v357_v58 = vadd.f32 %v498_v40, %v468_v56 }
 0x105   :  { %v395_v59 = vadd.f32 %v440_v41, %v384_v57  ;;  %v385_v60 = vmul.f32 %v439_v37, %v357_v58 }
 0x107   :  { %v399_v61 = vmax.f32 %v395_v59, 0.0  ;;  %v396_v62 = vadd.f32 %v440_v41, %v385_v60 }
 0x109   :  { %403 = vst [vmem:[%s668_s4 + $0x10] sm:$0xff] %v399_v61  ;;  %v400_v63 = vmax.f32 %v396_v62, 0.0 }
 0x10b   :  { %404 = vst [vmem:[%s668_s4 + $0x18] sm:$0xff] %v400_v63 }

// kernel: pose_resnet_dann_forward.37
= control target key start
LH: loop header
LB: loop body
LE: loop exit
PB: predicated region body
PF: predicated region fallthrough
CT: control target
= control target key end

     0   :  { %v205_v0 = vmov 0.0   ;;  %vm206_vm0 = vmmov 0   ;;  %s268_s1 = inlined_call_operand.vmem [shape: bf16[128,128], index: 1, kind: input, shape index: {}]   ;;  %s269_s0 = inlined_call_operand.vmem [shape: bf16[8,128], index: 0, kind: input, shape index: {}]   ;;  %s270_s2 = inlined_call_operand.vmem [shape: f32[1,128], index: 2, kind: input, shape index: {}]   ;;  %s271_s3 = inlined_call_operand.vmem [shape: f32[1,128], index: 3, kind: input, shape index: {}]   ;;  %s272_s4 = inlined_call_operand.vmem [shape: f32[8,128], index: 4, kind: output, shape index: {}]  }
   0x1   :  { %175 = vmatprep.subr.bf16.mxu0 %v205_v0  ;;  %v197_v1 = vld [vmem:[%s268_s1] sm:$0xff]   ;;  %191 = vmatprep.mubr.msk.bf16.mxu0 %vm206_vm0, %v205_v0  ;;  %v198_v2 = vld [vmem:[%s268_s1 + $0x8] sm:$0xff]   ;;  %v199_v3 = vld [vmem:[%s268_s1 + $0x10] sm:$0xff]  }
   0x2   :  { %176 = vmatpush3.bf16.msra.mxu0 %v197_v1  ;;  %v200_v4 = vld [vmem:[%s268_s1 + $0x18] sm:$0xff]   ;;  %v201_v5 = vld [vmem:[%s268_s1 + $0x20] sm:$0xff]   ;;  %v202_v6 = vld [vmem:[%s268_s1 + $0x28] sm:$0xff]  }
   0x3   :  { %177 = vmatprep.subr.bf16.mxu0 %v205_v0  ;;  %v203_v7 = vld [vmem:[%s268_s1 + $0x30] sm:$0xff]   ;;  %v204_v8 = vld [vmem:[%s268_s1 + $0x38] sm:$0xff]   ;;  %v24_v9 = vld [vmem:[%s269_s0] sm:$0xf] }
   0x4   :  { %v164_v10 = vld [vmem:[%s270_s2] ss:$0 sm:$0xff] }
   0x5   :  { %v165_v12 = vld [vmem:[%s271_s3] ss:$0 sm:$0xff] }
   0x6   :  { %178 = vmatpush3.bf16.msra.mxu0 %v198_v2 }
   0x7   :  { %179 = vmatprep.subr.bf16.mxu0 %v205_v0 }
   0xa   :  { %180 = vmatpush3.bf16.msra.mxu0 %v199_v3 }
   0xb   :  { %181 = vmatprep.subr.bf16.mxu0 %v205_v0 }
   0xe   :  { %182 = vmatpush3.bf16.msra.mxu0 %v200_v4 }
   0xf   :  { %183 = vmatprep.subr.bf16.mxu0 %v205_v0 }
  0x12   :  { %184 = vmatpush3.bf16.msra.mxu0 %v201_v5 }
  0x13   :  { %185 = vmatprep.subr.bf16.mxu0 %v205_v0 }
  0x16   :  { %186 = vmatpush3.bf16.msra.mxu0 %v202_v6 }
  0x17   :  { %187 = vmatprep.subr.bf16.mxu0 %v205_v0 }
  0x1a   :  { %188 = vmatpush3.bf16.msra.mxu0 %v203_v7 }
  0x1b   :  { %189 = vmatprep.subr.bf16.mxu0 %v205_v0 }
  0x1e   :  { %190 = vmatpush3.bf16.msra.mxu0 %v204_v8 }
  0x21   :  { %192 = vmatmul.mubr.bf16.vlgmr.msra.gmra.mrb[0].mxu0 %v24_v9 }
  0xf4   :  { %v123_v11 = vpop.f32.mrb[0].mxu0 }
  0xf5   :  { %v142_v13 = vmul.f32 %v164_v10, %v123_v11  ;;  %v193_v14 = vpop.f32.mrb[1].mxu0 }
  0xf6   :  { %v126_v15 = vpop.f32.mrb[2].mxu0 }
  0xf7   :  { %v150_v16 = vadd.f32 %v165_v12, %v142_v13  ;;  %v194_v17 = vpop.f32.mrb[3].mxu0 }
  0xf9   :  { %151 = vst [vmem:[%s272_s4] sm:$0xff] %v150_v16 }

// kernel: pose_resnet_dann_forward.36
= control target key start
LH: loop header
LB: loop body
LE: loop exit
PB: predicated region body
PF: predicated region fallthrough
CT: control target
= control target key end

     0   :  { %v446_v1 = vmov 0.0   ;;  %vm447_vm0 = vmmov 0   ;;  %s560_s1 = inlined_call_operand.vmem [shape: bf16[384,128], index: 1, kind: input, shape index: {}]   ;;  %s561_s0 = inlined_call_operand.vmem [shape: bf16[8,384], index: 0, kind: input, shape index: {}]   ;;  %s562_s2 = inlined_call_operand.vmem [shape: f32[1,128], index: 2, kind: input, shape index: {}]   ;;  %s563_s3 = inlined_call_operand.vmem [shape: f32[1,128], index: 3, kind: input, shape index: {}]   ;;  %s564_s4 = inlined_call_operand.vmem [shape: f32[8,128], index: 4, kind: output, shape index: {}]  }
   0x1   :  { %v419_v0 = vld [vmem:[%s560_s1 + $0x40] sm:$0xff]   ;;  %397 = vmatprep.subr.bf16.mxu1 %v446_v1  ;;  %413 = vmatprep.mubr.msk.bf16.mxu1 %vm447_vm0, %v446_v1  ;;  %v422_v4 = vld [vmem:[%s560_s1 + $0x48] sm:$0xff]   ;;  %v425_v7 = vld [vmem:[%s560_s1 + $0x50] sm:$0xff]  }
   0x2   :  { %v420_v2 = vld [vmem:[%s560_s1] sm:$0xff]   ;;  %366 = vmatprep.subr.bf16.mxu0 %v419_v0  ;;  %v423_v5 = vld [vmem:[%s560_s1 + $0x8] sm:$0xff]   ;;  %v426_v8 = vld [vmem:[%s560_s1 + $0x10] sm:$0xff]  }
   0x3   :  { %v421_v3 = vld [vmem:[%s560_s1 + $0x80] sm:$0xff]   ;;  %367 = vmatpush3.bf16.msra.mxu0 %v420_v2  ;;  %v424_v6 = vld [vmem:[%s560_s1 + $0x88] sm:$0xff]   ;;  %v427_v9 = vld [vmem:[%s560_s1 + $0x90] sm:$0xff]  }
   0x4   :  { %398 = vmatpush3.bf16.msra.mxu1 %v421_v3  ;;  %368 = vmatprep.subr.bf16.mxu0 %v422_v4  ;;  %v428_v10 = vld [vmem:[%s560_s1 + $0x58] sm:$0xff]   ;;  %v431_v13 = vld [vmem:[%s560_s1 + $0x60] sm:$0xff]   ;;  %v434_v16 = vld [vmem:[%s560_s1 + $0x68] sm:$0xff]  }
   0x5   :  { %399 = vmatprep.subr.bf16.mxu1 %v446_v1  ;;  %v429_v11 = vld [vmem:[%s560_s1 + $0x18] sm:$0xff]   ;;  %v432_v14 = vld [vmem:[%s560_s1 + $0x20] sm:$0xff]   ;;  %v435_v17 = vld [vmem:[%s560_s1 + $0x28] sm:$0xff]  }
   0x6   :  { %v430_v12 = vld [vmem:[%s560_s1 + $0x98] sm:$0xff]   ;;  %v433_v15 = vld [vmem:[%s560_s1 + $0xa0] sm:$0xff]   ;;  %v436_v18 = vld [vmem:[%s560_s1 + $0xa8] sm:$0xff]  }
   0x7   :  { %369 = vmatpush3.bf16.msra.mxu0 %v423_v5  ;;  %v437_v19 = vld [vmem:[%s560_s1 + $0x70] sm:$0xff]   ;;  %v440_v22 = vld [vmem:[%s560_s1 + $0x78] sm:$0xff]   ;;  %v24_v23 = vld [vmem:[%s561_s0] sm:$0xff] }
   0x8   :  { %400 = vmatpush3.bf16.msra.mxu1 %v424_v6  ;;  %370 = vmatprep.subr.bf16.mxu0 %v425_v7  ;;  %v438_v20 = vld [vmem:[%s560_s1 + $0x30] sm:$0xff]   ;;  %v338_v24 = vcombine.high %v24_v23, %v24_v23  ;;  %v441_v25 = vld [vmem:[%s560_s1 + $0x38] sm:$0xff]   ;;  %v337_v27 = vcombine.low %v24_v23, %v24_v23  ;;  %v445_v28 = vld [vmem:[%s561_s0 + $0x8] ss:$0 sps:$4 sm:$0xff]  }
   0x9   :  { %401 = vmatprep.subr.bf16.mxu1 %v446_v1  ;;  %v439_v21 = vld [vmem:[%s560_s1 + $0xb0] sm:$0xff]   ;;  %v442_v26 = vld [vmem:[%s560_s1 + $0xb8] sm:$0xff]   ;;  %v364_v35 = vld [vmem:[%s562_s2] ss:$0 sm:$0xff] }
   0xa   :  { %261 = vmatprep.mubr.bf16.mxu0 %v338_v24  ;;  %v365_v40 = vld [vmem:[%s563_s3] ss:$0 sm:$0xff] }
   0xb   :  { %371 = vmatpush3.bf16.msra.mxu0 %v426_v8 }
   0xc   :  { %402 = vmatpush3.bf16.msra.mxu1 %v427_v9  ;;  %372 = vmatprep.subr.bf16.mxu0 %v428_v10 }
   0xd   :  { %403 = vmatprep.subr.bf16.mxu1 %v446_v1 }
   0xf   :  { %373 = vmatpush3.bf16.msra.mxu0 %v429_v11 }
  0x10   :  { %404 = vmatpush3.bf16.msra.mxu1 %v430_v12  ;;  %374 = vmatprep.subr.bf16.mxu0 %v431_v13 }
  0x11   :  { %405 = vmatprep.subr.bf16.mxu1 %v446_v1 }
  0x13   :  { %375 = vmatpush3.bf16.msra.mxu0 %v432_v14 }
  0x14   :  { %406 = vmatpush3.bf16.msra.mxu1 %v433_v15  ;;  %376 = vmatprep.subr.bf16.mxu0 %v434_v16 }
  0x15   :  { %407 = vmatprep.subr.bf16.mxu1 %v446_v1 }
  0x17   :  { %377 = vmatpush3.bf16.msra.mxu0 %v435_v17 }
  0x18   :  { %408 = vmatpush3.bf16.msra.mxu1 %v436_v18  ;;  %378 = vmatprep.subr.bf16.mxu0 %v437_v19 }
  0x19   :  { %409 = vmatprep.subr.bf16.mxu1 %v446_v1 }
  0x1b   :  { %379 = vmatpush3.bf16.msra.mxu0 %v438_v20 }
  0x1c   :  { %410 = vmatpush3.bf16.msra.mxu1 %v439_v21  ;;  %380 = vmatprep.subr.bf16.mxu0 %v440_v22 }
  0x1d   :  { %411 = vmatprep.subr.bf16.mxu1 %v446_v1 }
  0x1f   :  { %381 = vmatpush3.bf16.msra.mxu0 %v441_v25 }
  0x20   :  { %412 = vmatpush3.bf16.msra.mxu1 %v442_v26 }
  0x22   :  { %262 = vmatmul.mubr.bf16.vlgmr.msra.gmra.mrb[0].mxu0 %v337_v27 }
  0x23   :  { %414 = vmatmul.mubr.bf16.vlgmr.msra.gmra.mrb[0].mxu1 %v445_v28 }
  0xf5   :  { %v382_v29 = vpop.f32.mrb[0].mxu0 }
  0xf6   :  { %v303_v30 = vpop.f32.mrb[0].mxu1  ;;  %v383_v31 = vpop.f32.mrb[1].mxu0 }
  0xf7   :  { %v384_v32 = vadd.f32 %v383_v31, %v382_v29  ;;  %v415_v33 = vpop.f32.mrb[1].mxu1  ;;  %v385_v34 = vpop.f32.mrb[2].mxu0 }
  0xf8   :  { %v306_v36 = vpop.f32.mrb[2].mxu1  ;;  %v386_v37 = vpop.f32.mrb[3].mxu0 }
  0xf9   :  { %v304_v38 = vadd.f32 %v384_v32, %v303_v30  ;;  %v416_v39 = vpop.f32.mrb[3].mxu1 }
  0xfb   :  { %v322_v41 = vmul.f32 %v364_v35, %v304_v38 }
  0xfd   :  { %v330_v42 = vadd.f32 %v365_v40, %v322_v41 }
  0xff   :  { %v331_v43 = vmax.f32 %v330_v42, 0.0 }
 0x101   :  { %332 = vst [vmem:[%s564_s4] sm:$0xff] %v331_v43 }

// kernel: pose_resnet_dann_forward.39
= control target key start
LH: loop header
LB: loop body
LE: loop exit
PB: predicated region body
PF: predicated region fallthrough
CT: control target
= control target key end

     0   :  { %s689_s15 = smov 0   ;;  %s691_s16 = smov 0   ;;  %s741_s0 = inlined_call_operand.vmem [shape: bf16[8,640], index: 0, kind: input, shape index: {}]   ;;  %s742_s1 = inlined_call_operand.vmem [shape: bf16[640,128], index: 1, kind: input, shape index: {}]   ;;  %s743_s2 = inlined_call_operand.vmem [shape: f32[1,128], index: 2, kind: input, shape index: {}]   ;;  %s744_s3 = inlined_call_operand.vmem [shape: f32[1,128], index: 3, kind: input, shape index: {}]   ;;  %s745_s4 = inlined_call_operand.vmem [shape: f32[8,128], index: 4, kind: output, shape index: {}]  }
   0x1   :  { %s693_s17 = smov 0  }
   0x2 LB: > { %s26_s18 = sadd.s32 1, %s655_s16  ;;  %p554_p0 = scmp.ge.s32.totalorder %s659_s17, 1  ;;  %s659_s17 = sphi %s693_s17, %s14_s17   ;;  %s655_s16 = sphi %s691_s16, %s747_s16   ;;  %s651_s15 = sphi %s689_s15, %s746_s15  }
   0x3   : > { %p27_p1 = scmp.ge.s32.totalorder %s26_s18, 5  ;;  %p220_p2 = scmp.lt.s32.totalorder %s659_s17, 6 }
   0x5   : > { %s749_s18 = smov (%p27_p1, %s26_s18), 0  ;;  %p221_p3 = pnand %p554_p0, %p220_p2 }
   0x6   : > { %p267_p4 = scmp.lt.s32.totalorder (!%p221_p3), %s651_s15, 4  ;;  %s556_s19 = sshll.u32 (!%p221_p3), %s651_s15, 4 }
   0x7   : > { %224 = sbr.rel (%p221_p3) target bundleno = 284 (0x11c), region = 36  ;;  %p274_p5 = scmp.lt.s32.totalorder (!%p221_p3), %s556_s19, 79 }
   0x8   : > { %p558_p6 = scmp.ne.s32.totalorder (!%p221_p3), %s651_s15, 0 }
   0xe   : > { %s268_s20 = scalar_select %p267_p4, %s651_s15, 4 }
   0xf   : > { %s751_s19 = smov (!%p274_p5, %s556_s19), 79  ;;  %299 = sbr.rel (%p558_p6) target bundleno = 22 (0x16), region = 40 }
  0x10   : > { %s555_s21 = sshll.u32 %s268_s20, 2  ;;  %s557_s25 = sshll.u32 %s751_s19, 2  ;;  %v661_v0 = vmov (!%p558_p6), 0.0  }
  0x11   : > { %s715_s24 = scalar_lea.vmem %s741_s0, %s555_s21  ;;  %s280_s28 = scalar_lea.vmem %s742_s1, %s557_s25  ;;  %300 = vst [vmem:[#allocation2] sm:$0xff] (!%p558_p6), %v661_v0 }
  0x16 PF: > { %v629_v1 = vld [vmem:[%s280_s28] sm:$0xff]   ;;  %v662_v2 = vmov 0.0   ;;  %v630_v3 = vld [vmem:[%s280_s28 + $0x8] sm:$0xff]   ;;  %vm663_vm0 = vmmov 0   ;;  %v631_v4 = vld [vmem:[%s280_s28 + $0x10] sm:$0xff]   ;;  %p567_p7 = scmp.ne.s32.totalorder %s651_s15, 4 }
  0x17   : > { %582 = vmatprep.subr.bf16.mxu0 %v662_v2  ;;  %598 = vmatprep.mubr.msk.bf16.mxu0 %vm663_vm0, %v662_v2  ;;  %v632_v5 = vld [vmem:[%s280_s28 + $0x18] sm:$0xff]   ;;  %v633_v6 = vld [vmem:[%s280_s28 + $0x20] sm:$0xff]   ;;  %v634_v7 = vld [vmem:[%s280_s28 + $0x28] sm:$0xff]  }
  0x18   : > { %583 = vmatpush3.bf16.msra.mxu0 %v629_v1  ;;  %v635_v8 = vld [vmem:[%s280_s28 + $0x30] sm:$0xff]   ;;  %v636_v9 = vld [vmem:[%s280_s28 + $0x38] sm:$0xff]   ;;  %v302_v10 = vld [vmem:[%s715_s24] sm:$0xf] }
  0x19   : > { %584 = vmatprep.subr.bf16.mxu0 %v662_v2  ;;  %v301_v11 = vld [vmem:[#allocation2] sm:$0xff] }
  0x1a   : > { %v568_v18 = vld [vmem:[%s743_s2] ss:$0 sm:$0xff] (!%p567_p7) }
  0x1b   : > { %v569_v19 = vld [vmem:[%s744_s3] ss:$0 sm:$0xff] (!%p567_p7) }
  0x1c   : > { %585 = vmatpush3.bf16.msra.mxu0 %v630_v3 }
  0x1d   : > { %586 = vmatprep.subr.bf16.mxu0 %v662_v2 }
  0x20   : > { %587 = vmatpush3.bf16.msra.mxu0 %v631_v4 }
  0x21   : > { %588 = vmatprep.subr.bf16.mxu0 %v662_v2 }
  0x24   : > { %589 = vmatpush3.bf16.msra.mxu0 %v632_v5 }
  0x25   : > { %590 = vmatprep.subr.bf16.mxu0 %v662_v2 }
  0x28   : > { %591 = vmatpush3.bf16.msra.mxu0 %v633_v6 }
  0x29   : > { %592 = vmatprep.subr.bf16.mxu0 %v662_v2 }
  0x2c   : > { %593 = vmatpush3.bf16.msra.mxu0 %v634_v7 }
  0x2d   : > { %594 = vmatprep.subr.bf16.mxu0 %v662_v2 }
  0x30   : > { %595 = vmatpush3.bf16.msra.mxu0 %v635_v8 }
  0x31   : > { %596 = vmatprep.subr.bf16.mxu0 %v662_v2 }
  0x34   : > { %597 = vmatpush3.bf16.msra.mxu0 %v636_v9 }
  0x37   : > { %599 = vmatmul.mubr.bf16.vlgmr.msra.gmra.mrb[0].mxu0 %v302_v10 }
 0x107   : > { %412 = sbr.rel (%p567_p7) target bundleno = 284 (0x11c), region = 44 }
 0x10a   : > { %v401_v12 = vpop.f32.mrb[0].mxu0 }
 0x10b   : > { %v407_v13 = vadd.f32 %v401_v12, %v301_v11  ;;  %v600_v14 = vpop.f32.mrb[1].mxu0 }
 0x10c   : > { %v404_v15 = vpop.f32.mrb[2].mxu0 }
 0x10d   : > { %408 = vst [vmem:[#allocation2] sm:$0xff] %v407_v13  ;;  %v601_v16 = vpop.f32.mrb[3].mxu0 }
 0x114   : > { %v413_v17 = vld [vmem:[#allocation2] sm:$0xff] }
 0x115   : > { %v421_v20 = vmul.f32 %v568_v18, %v413_v17 }
 0x117   : > { %v429_v21 = vadd.f32 %v569_v19, %v421_v20 }
 0x119   : > { %v430_v22 = vmax.f32 %v429_v21, 0.0 }
 0x11b   : > { %431 = vst [vmem:[%s745_s4] sm:$0xff] %v430_v22 }
 0x11c PF: > { %s14_s17 = sadd.s32 1, %s659_s17   ;;  %s746_s15 = smov %s655_s16 }
 0x11d   : > { %p11_p8 = scmp.ge.s32.totalorder %s14_s17, 7   ;;  %s747_s16 = smov %s749_s18 }
 0x11f   :  { %13 = sbr.rel (!%p11_p8) target bundleno = 2 (0x2), region = 83 }

// kernel: pose_resnet_dann_forward.38
= control target key start
LH: loop header
LB: loop body
LE: loop exit
PB: predicated region body
PF: predicated region fallthrough
CT: control target
= control target key end

     0   :  { %s770_s18 = smov 0   ;;  %s772_s19 = smov 0   ;;  %s825_s0 = inlined_call_operand.vmem [shape: bf16[8,640], index: 0, kind: input, shape index: {}]   ;;  %s826_s1 = inlined_call_operand.vmem [shape: bf16[640,128], index: 1, kind: input, shape index: {}]   ;;  %s827_s2 = inlined_call_operand.vmem [shape: f32[1,128], index: 2, kind: input, shape index: {}]   ;;  %s828_s3 = inlined_call_operand.vmem [shape: f32[1,128], index: 3, kind: input, shape index: {}]   ;;  %s829_s4 = inlined_call_operand.vmem [shape: f32[8,128], index: 4, kind: input, shape index: {}]   ;;  %s830_s5 = inlined_call_operand.vmem [shape: f32[8,128], index: 5, kind: output, shape index: {}]  }
   0x1   :  { %s774_s20 = smov 0  }
   0x2 LB: > { %s27_s21 = sadd.s32 1, %s731_s19  ;;  %p630_p0 = scmp.ge.s32.totalorder %s735_s20, 1  ;;  %s735_s20 = sphi %s774_s20, %s15_s20   ;;  %s731_s19 = sphi %s772_s19, %s832_s19   ;;  %s727_s18 = sphi %s770_s18, %s831_s18  }
   0x3   : > { %p28_p1 = scmp.ge.s32.totalorder %s27_s21, 5  ;;  %p259_p2 = scmp.lt.s32.totalorder %s735_s20, 6 }
   0x5   : > { %s834_s21 = smov (%p28_p1, %s27_s21), 0  ;;  %p260_p3 = pnand %p630_p0, %p259_p2 }
   0x6   : > { %p315_p4 = scmp.lt.s32.totalorder (!%p260_p3), %s727_s18, 4  ;;  %s632_s22 = sshll.u32 (!%p260_p3), %s727_s18, 4 }
   0x7   : > { %263 = sbr.rel (%p260_p3) target bundleno = 286 (0x11e), region = 40  ;;  %p322_p5 = scmp.lt.s32.totalorder (!%p260_p3), %s632_s22, 79 }
   0x8   : > { %p634_p6 = scmp.ne.s32.totalorder (!%p260_p3), %s727_s18, 0 }
   0xe   : > { %s316_s23 = scalar_select %p315_p4, %s727_s18, 4 }
   0xf   : > { %s836_s22 = smov (!%p322_p5, %s632_s22), 79  ;;  %354 = sbr.rel (%p634_p6) target bundleno = 22 (0x16), region = 44 }
  0x10   : > { %s631_s24 = sshll.u32 %s316_s23, 2  ;;  %s633_s28 = sshll.u32 %s836_s22, 2  ;;  %v737_v0 = vmov (!%p634_p6), 0.0  }
  0x11   : > { %s796_s27 = scalar_lea.vmem %s825_s0, %s631_s24  ;;  %s328_s6 = scalar_lea.vmem %s826_s1, %s633_s28  ;;  %355 = vst [vmem:[#allocation2] sm:$0xff] (!%p634_p6), %v737_v0 }
  0x16 PF: > { %v705_v1 = vld [vmem:[%s328_s6] sm:$0xff]   ;;  %v738_v2 = vmov 0.0   ;;  %v706_v3 = vld [vmem:[%s328_s6 + $0x8] sm:$0xff]   ;;  %vm739_vm0 = vmmov 0   ;;  %v707_v4 = vld [vmem:[%s328_s6 + $0x10] sm:$0xff]   ;;  %p643_p7 = scmp.ne.s32.totalorder %s727_s18, 4 }
  0x17   : > { %658 = vmatprep.subr.bf16.mxu0 %v738_v2  ;;  %674 = vmatprep.mubr.msk.bf16.mxu0 %vm739_vm0, %v738_v2  ;;  %v708_v5 = vld [vmem:[%s328_s6 + $0x18] sm:$0xff]   ;;  %v709_v6 = vld [vmem:[%s328_s6 + $0x20] sm:$0xff]   ;;  %v710_v7 = vld [vmem:[%s328_s6 + $0x28] sm:$0xff]  }
  0x18   : > { %659 = vmatpush3.bf16.msra.mxu0 %v705_v1  ;;  %v711_v8 = vld [vmem:[%s328_s6 + $0x30] sm:$0xff]   ;;  %v712_v9 = vld [vmem:[%s328_s6 + $0x38] sm:$0xff]   ;;  %v357_v10 = vld [vmem:[%s796_s27] sm:$0xf] }
  0x19   : > { %660 = vmatprep.subr.bf16.mxu0 %v738_v2  ;;  %v356_v11 = vld [vmem:[#allocation2] sm:$0xff] }
  0x1a   : > { %v644_v18 = vld [vmem:[%s827_s2] ss:$0 sm:$0xff] (!%p643_p7) }
  0x1b   : > { %v645_v19 = vld [vmem:[%s828_s3] ss:$0 sm:$0xff] (!%p643_p7) }
  0x1c   : > { %661 = vmatpush3.bf16.msra.mxu0 %v706_v3  ;;  %v485_v21 = vld [vmem:[%s829_s4] sm:$0xff] (!%p643_p7) }
  0x1d   : > { %662 = vmatprep.subr.bf16.mxu0 %v738_v2 }
  0x20   : > { %663 = vmatpush3.bf16.msra.mxu0 %v707_v4 }
  0x21   : > { %664 = vmatprep.subr.bf16.mxu0 %v738_v2 }
  0x24   : > { %665 = vmatpush3.bf16.msra.mxu0 %v708_v5 }
  0x25   : > { %666 = vmatprep.subr.bf16.mxu0 %v738_v2 }
  0x28   : > { %667 = vmatpush3.bf16.msra.mxu0 %v709_v6 }
  0x29   : > { %668 = vmatprep.subr.bf16.mxu0 %v738_v2 }
  0x2c   : > { %669 = vmatpush3.bf16.msra.mxu0 %v710_v7 }
  0x2d   : > { %670 = vmatprep.subr.bf16.mxu0 %v738_v2 }
  0x30   : > { %671 = vmatpush3.bf16.msra.mxu0 %v711_v8 }
  0x31   : > { %672 = vmatprep.subr.bf16.mxu0 %v738_v2 }
  0x34   : > { %673 = vmatpush3.bf16.msra.mxu0 %v712_v9 }
  0x37   : > { %675 = vmatmul.mubr.bf16.vlgmr.msra.gmra.mrb[0].mxu0 %v357_v10 }
 0x107   : > { %467 = sbr.rel (%p643_p7) target bundleno = 286 (0x11e), region = 48 }
 0x10a   : > { %v456_v12 = vpop.f32.mrb[0].mxu0 }
 0x10b   : > { %v462_v13 = vadd.f32 %v456_v12, %v356_v11  ;;  %v676_v14 = vpop.f32.mrb[1].mxu0 }
 0x10c   : > { %v459_v15 = vpop.f32.mrb[2].mxu0 }
 0x10d   : > { %463 = vst [vmem:[#allocation2] sm:$0xff] %v462_v13  ;;  %v677_v16 = vpop.f32.mrb[3].mxu0 }
 0x114   : > { %v468_v17 = vld [vmem:[#allocation2] sm:$0xff] }
 0x115   : > { %v476_v20 = vmul.f32 %v644_v18, %v468_v17 }
 0x117   : > { %v484_v22 = vadd.f32 %v645_v19, %v476_v20 }
 0x119   : > { %v486_v23 = vadd.f32 %v485_v21, %v484_v22 }
 0x11b   : > { %v487_v24 = vmax.f32 %v486_v23, 0.0 }
 0x11d   : > { %488 = vst [vmem:[%s830_s5] sm:$0xff] %v487_v24 }
 0x11e PF: > { %s15_s20 = sadd.s32 1, %s735_s20   ;;  %s831_s18 = smov %s731_s19 }
 0x11f   : > { %p12_p8 = scmp.ge.s32.totalorder %s15_s20, 7   ;;  %s832_s19 = smov %s834_s21 }
 0x121   :  { %14 = sbr.rel (!%p12_p8) target bundleno = 2 (0x2), region = 90 }

// kernel: pose_resnet_dann_forward.43
= control target key start
LH: loop header
LB: loop body
LE: loop exit
PB: predicated region body
PF: predicated region fallthrough
CT: control target
= control target key end

     0   :  { %s1014_s18 = smov 0   ;;  %s1016_s19 = smov 0   ;;  %s1095_s0 = inlined_call_operand.vmem [shape: bf16[8,1152], index: 0, kind: input, shape index: {}]   ;;  %s1096_s1 = inlined_call_operand.vmem [shape: bf16[1152,128], index: 1, kind: input, shape index: {}]   ;;  %s1097_s2 = inlined_call_operand.vmem [shape: f32[1,128], index: 2, kind: input, shape index: {}]   ;;  %s1098_s3 = inlined_call_operand.vmem [shape: f32[1,128], index: 3, kind: input, shape index: {}]   ;;  %s1099_s4 = inlined_call_operand.vmem [shape: f32[8,128], index: 4, kind: input, shape index: {}]   ;;  %s1100_s5 = inlined_call_operand.vmem [shape: f32[8,128], index: 5, kind: output, shape index: {}]  }
   0x1   :  { %s1018_s20 = smov 0  }
   0x2 LB: > { %s27_s21 = sadd.s32 1, %s975_s19  ;;  %p815_p0 = scmp.ge.s32.totalorder %s979_s20, 1  ;;  %s979_s20 = sphi %s1018_s20, %s15_s20   ;;  %s975_s19 = sphi %s1016_s19, %s1102_s19   ;;  %s971_s18 = sphi %s1014_s18, %s1101_s18  }
   0x3   : > { %p28_p1 = scmp.ge.s32.totalorder %s27_s21, 3  ;;  %p261_p2 = scmp.lt.s32.totalorder %s979_s20, 4 }
   0x5   : > { %s1104_s21 = smov (%p28_p1, %s27_s21), 0  ;;  %p262_p3 = pnand %p815_p0, %p261_p2 }
   0x6   : > { %s316_s22 = smul.u32 (!%p262_p3), 3, %s971_s18  ;;  %p818_p6 = scmp.ne.s32.totalorder (!%p262_p3), %s971_s18, 0 }
   0x7   : > { %265 = sbr.rel (%p262_p3) target bundleno = 293 (0x125), region = 40 }
   0x8   : > { %s326_s23 = smul.u32 (!%p262_p3), 48, %s971_s18  ;;  %p319_p4 = scmp.lt.s32.totalorder (!%p262_p3), %s316_s22, 8 }
   0xa   : > { %p327_p5 = scmp.lt.s32.totalorder (!%p262_p3), %s326_s23, 143 }
   0xe   : > { %s1106_s22 = smov (!%p319_p4, %s316_s22), 8  ;;  %s1108_s23 = smov (!%p327_p5, %s326_s23), 143 }
   0xf   : > { %s816_s24 = sshll.u32 %s1106_s22, 2  ;;  %s817_s28 = sshll.u32 %s1108_s23, 2  ;;  %v981_v0 = vmov (!%p818_p6), 0.0  }
  0x10   : > { %s1039_s27 = scalar_lea.vmem %s1095_s0, %s816_s24  ;;  %s1044_s6 = scalar_lea.vmem %s1096_s1, %s817_s28  ;;  %360 = vst [vmem:[#allocation2] sm:$0xff] (!%p818_p6), %v981_v0 }
  0x11   : > { %359 = sbr.rel (%p818_p6) target bundleno = 24 (0x18), region = 44 }
  0x18 PF: > { %v930_v1 = vld [vmem:[%s1044_s6 + $0x40] sm:$0xff]   ;;  %v982_v2 = vmov 0.0   ;;  %vm983_vm0 = vmmov 0   ;;  %v933_v5 = vld [vmem:[%s1044_s6 + $0x48] sm:$0xff]   ;;  %v936_v8 = vld [vmem:[%s1044_s6 + $0x50] sm:$0xff]   ;;  %p846_p7 = scmp.ne.s32.totalorder %s971_s18, 2 }
  0x19   : > { %883 = vmatprep.subr.bf16.mxu1 %v982_v2  ;;  %v931_v3 = vld [vmem:[%s1044_s6] sm:$0xff]   ;;  %852 = vmatprep.subr.bf16.mxu0 %v930_v1  ;;  %v934_v6 = vld [vmem:[%s1044_s6 + $0x8] sm:$0xff]   ;;  %v937_v9 = vld [vmem:[%s1044_s6 + $0x10] sm:$0xff]  }
  0x1a   : > { %v932_v4 = vld [vmem:[%s1044_s6 + $0x80] sm:$0xff]   ;;  %899 = vmatprep.mubr.msk.bf16.mxu1 %vm983_vm0, %v982_v2  ;;  %853 = vmatpush3.bf16.msra.mxu0 %v931_v3  ;;  %v935_v7 = vld [vmem:[%s1044_s6 + $0x88] sm:$0xff]   ;;  %v938_v10 = vld [vmem:[%s1044_s6 + $0x90] sm:$0xff]  }
  0x1b   : > { %884 = vmatpush3.bf16.msra.mxu1 %v932_v4  ;;  %854 = vmatprep.subr.bf16.mxu0 %v933_v5  ;;  %v939_v11 = vld [vmem:[%s1044_s6 + $0x58] sm:$0xff]   ;;  %v942_v14 = vld [vmem:[%s1044_s6 + $0x60] sm:$0xff]   ;;  %v945_v17 = vld [vmem:[%s1044_s6 + $0x68] sm:$0xff]  }
  0x1c   : > { %885 = vmatprep.subr.bf16.mxu1 %v982_v2  ;;  %v940_v12 = vld [vmem:[%s1044_s6 + $0x18] sm:$0xff]   ;;  %v943_v15 = vld [vmem:[%s1044_s6 + $0x20] sm:$0xff]   ;;  %v946_v18 = vld [vmem:[%s1044_s6 + $0x28] sm:$0xff]  }
  0x1d   : > { %v941_v13 = vld [vmem:[%s1044_s6 + $0x98] sm:$0xff]   ;;  %v944_v16 = vld [vmem:[%s1044_s6 + $0xa0] sm:$0xff]   ;;  %v947_v19 = vld [vmem:[%s1044_s6 + $0xa8] sm:$0xff]  }
  0x1e   : > { %855 = vmatpush3.bf16.msra.mxu0 %v934_v6  ;;  %v948_v20 = vld [vmem:[%s1044_s6 + $0x70] sm:$0xff]   ;;  %v951_v23 = vld [vmem:[%s1044_s6 + $0x78] sm:$0xff]   ;;  %v362_v24 = vld [vmem:[%s1039_s27] sm:$0xff] }
  0x1f   : > { %886 = vmatpush3.bf16.msra.mxu1 %v935_v7  ;;  %856 = vmatprep.subr.bf16.mxu0 %v936_v8  ;;  %v949_v21 = vld [vmem:[%s1044_s6 + $0x30] sm:$0xff]   ;;  %v820_v25 = vcombine.high %v362_v24, %v362_v24  ;;  %v952_v26 = vld [vmem:[%s1044_s6 + $0x38] sm:$0xff]   ;;  %v819_v28 = vcombine.low %v362_v24, %v362_v24  ;;  %v956_v29 = vld [vmem:[%s1039_s27 + $0x8] ss:$0 sps:$4 sm:$0xff]  }
  0x20   : > { %887 = vmatprep.subr.bf16.mxu1 %v982_v2  ;;  %v950_v22 = vld [vmem:[%s1044_s6 + $0xb0] sm:$0xff]   ;;  %v953_v27 = vld [vmem:[%s1044_s6 + $0xb8] sm:$0xff]   ;;  %v361_v36 = vld [vmem:[#allocation2] sm:$0xff] }
  0x21   : > { %599 = vmatprep.mubr.bf16.mxu0 %v820_v25  ;;  %v847_v43 = vld [vmem:[%s1097_s2] ss:$0 sm:$0xff] (!%p846_p7) }
  0x22   : > { %857 = vmatpush3.bf16.msra.mxu0 %v937_v9  ;;  %v848_v44 = vld [vmem:[%s1098_s3] ss:$0 sm:$0xff] (!%p846_p7) }
  0x23   : > { %888 = vmatpush3.bf16.msra.mxu1 %v938_v10  ;;  %858 = vmatprep.subr.bf16.mxu0 %v939_v11  ;;  %v670_v46 = vld [vmem:[%s1099_s4] sm:$0xff] (!%p846_p7) }
  0x24   : > { %889 = vmatprep.subr.bf16.mxu1 %v982_v2 }
  0x26   : > { %859 = vmatpush3.bf16.msra.mxu0 %v940_v12 }
  0x27   : > { %890 = vmatpush3.bf16.msra.mxu1 %v941_v13  ;;  %860 = vmatprep.subr.bf16.mxu0 %v942_v14 }
  0x28   : > { %891 = vmatprep.subr.bf16.mxu1 %v982_v2 }
  0x2a   : > { %861 = vmatpush3.bf16.msra.mxu0 %v943_v15 }
  0x2b   : > { %892 = vmatpush3.bf16.msra.mxu1 %v944_v16  ;;  %862 = vmatprep.subr.bf16.mxu0 %v945_v17 }
  0x2c   : > { %893 = vmatprep.subr.bf16.mxu1 %v982_v2 }
  0x2e   : > { %863 = vmatpush3.bf16.msra.mxu0 %v946_v18 }
  0x2f   : > { %894 = vmatpush3.bf16.msra.mxu1 %v947_v19  ;;  %864 = vmatprep.subr.bf16.mxu0 %v948_v20 }
  0x30   : > { %895 = vmatprep.subr.bf16.mxu1 %v982_v2 }
  0x32   : > { %865 = vmatpush3.bf16.msra.mxu0 %v949_v21 }
  0x33   : > { %896 = vmatpush3.bf16.msra.mxu1 %v950_v22  ;;  %866 = vmatprep.subr.bf16.mxu0 %v951_v23 }
  0x34   : > { %897 = vmatprep.subr.bf16.mxu1 %v982_v2 }
  0x36   : > { %867 = vmatpush3.bf16.msra.mxu0 %v952_v26 }
  0x37   : > { %898 = vmatpush3.bf16.msra.mxu1 %v953_v27 }
  0x39   : > { %600 = vmatmul.mubr.bf16.vlgmr.msra.gmra.mrb[0].mxu0 %v819_v28 }
  0x3a   : > { %900 = vmatmul.mubr.bf16.vlgmr.msra.gmra.mrb[0].mxu1 %v956_v29 }
 0x10c   : > { %v868_v30 = vpop.f32.mrb[0].mxu0 }
 0x10d   : > { %v641_v31 = vpop.f32.mrb[0].mxu1  ;;  %v869_v32 = vpop.f32.mrb[1].mxu0 }
 0x10e   : > { %v870_v33 = vadd.f32 %v869_v32, %v868_v30  ;;  %v901_v34 = vpop.f32.mrb[1].mxu1  ;;  %v871_v35 = vpop.f32.mrb[2].mxu0  ;;  %652 = sbr.rel (%p846_p7) target bundleno = 293 (0x125), region = 48 }
 0x10f   : > { %v644_v37 = vpop.f32.mrb[2].mxu1  ;;  %v872_v38 = vpop.f32.mrb[3].mxu0 }
 0x110   : > { %v642_v39 = vadd.f32 %v870_v33, %v641_v31  ;;  %v902_v40 = vpop.f32.mrb[3].mxu1 }
 0x112   : > { %v647_v41 = vadd.f32 %v642_v39, %v361_v36 }
 0x114   : > { %648 = vst [vmem:[#allocation2] sm:$0xff] %v647_v41 }
 0x11b   : > { %v653_v42 = vld [vmem:[#allocation2] sm:$0xff] }
 0x11c   : > { %v661_v45 = vmul.f32 %v847_v43, %v653_v42 }
 0x11e   : > { %v669_v47 = vadd.f32 %v848_v44, %v661_v45 }
 0x120   : > { %v671_v48 = vadd.f32 %v670_v46, %v669_v47 }
 0x122   : > { %v672_v49 = vmax.f32 %v671_v48, 0.0 }
 0x124   : > { %673 = vst [vmem:[%s1100_s5] sm:$0xff] %v672_v49 }
 0x125 PF: > { %s15_s20 = sadd.s32 1, %s979_s20   ;;  %s1101_s18 = smov %s975_s19 }
 0x126   : > { %p12_p8 = scmp.ge.s32.totalorder %s15_s20, 5   ;;  %s1102_s19 = smov %s1104_s21 }
 0x128   :  { %14 = sbr.rel (!%p12_p8) target bundleno = 2 (0x2), region = 90 }

// kernel: pose_resnet_dann_forward.44
= control target key start
LH: loop header
LB: loop body
LE: loop exit
PB: predicated region body
PF: predicated region fallthrough
CT: control target
= control target key end

     0   :  { %s933_s15 = smov 0   ;;  %s935_s16 = smov 0   ;;  %s1011_s0 = inlined_call_operand.vmem [shape: bf16[8,1152], index: 0, kind: input, shape index: {}]   ;;  %s1012_s1 = inlined_call_operand.vmem [shape: bf16[1152,128], index: 1, kind: input, shape index: {}]   ;;  %s1013_s2 = inlined_call_operand.vmem [shape: f32[1,128], index: 2, kind: input, shape index: {}]   ;;  %s1014_s3 = inlined_call_operand.vmem [shape: f32[1,128], index: 3, kind: input, shape index: {}]   ;;  %s1015_s4 = inlined_call_operand.vmem [shape: f32[8,128], index: 4, kind: output, shape index: {}]  }
   0x1   :  { %s937_s17 = smov 0  }
   0x2 LB: > { %s26_s18 = sadd.s32 1, %s899_s16  ;;  %p739_p0 = scmp.ge.s32.totalorder %s903_s17, 1  ;;  %s903_s17 = sphi %s937_s17, %s14_s17   ;;  %s899_s16 = sphi %s935_s16, %s1017_s16   ;;  %s895_s15 = sphi %s933_s15, %s1016_s15  }
   0x3   : > { %p27_p1 = scmp.ge.s32.totalorder %s26_s18, 3  ;;  %p222_p2 = scmp.lt.s32.totalorder %s903_s17, 4 }
   0x5   : > { %s1019_s18 = smov (%p27_p1, %s26_s18), 0  ;;  %p223_p3 = pnand %p739_p0, %p222_p2 }
   0x6   : > { %s268_s19 = smul.u32 (!%p223_p3), 3, %s895_s15  ;;  %p742_p6 = scmp.ne.s32.totalorder (!%p223_p3), %s895_s15, 0 }
   0x7   : > { %226 = sbr.rel (%p223_p3) target bundleno = 291 (0x123), region = 36 }
   0x8   : > { %s278_s20 = smul.u32 (!%p223_p3), 48, %s895_s15  ;;  %p271_p4 = scmp.lt.s32.totalorder (!%p223_p3), %s268_s19, 8 }
   0xa   : > { %p279_p5 = scmp.lt.s32.totalorder (!%p223_p3), %s278_s20, 143 }
   0xe   : > { %s1021_s19 = smov (!%p271_p4, %s268_s19), 8  ;;  %s1023_s20 = smov (!%p279_p5, %s278_s20), 143 }
   0xf   : > { %s740_s21 = sshll.u32 %s1021_s19, 2  ;;  %s741_s25 = sshll.u32 %s1023_s20, 2  ;;  %v905_v0 = vmov (!%p742_p6), 0.0  }
  0x10   : > { %s958_s24 = scalar_lea.vmem %s1011_s0, %s740_s21  ;;  %s963_s28 = scalar_lea.vmem %s1012_s1, %s741_s25  ;;  %305 = vst [vmem:[#allocation2] sm:$0xff] (!%p742_p6), %v905_v0 }
  0x11   : > { %304 = sbr.rel (%p742_p6) target bundleno = 24 (0x18), region = 40 }
  0x18 PF: > { %v854_v1 = vld [vmem:[%s963_s28 + $0x40] sm:$0xff]   ;;  %v906_v2 = vmov 0.0   ;;  %vm907_vm0 = vmmov 0   ;;  %v857_v5 = vld [vmem:[%s963_s28 + $0x48] sm:$0xff]   ;;  %v860_v8 = vld [vmem:[%s963_s28 + $0x50] sm:$0xff]   ;;  %p770_p7 = scmp.ne.s32.totalorder %s895_s15, 2 }
  0x19   : > { %807 = vmatprep.subr.bf16.mxu1 %v906_v2  ;;  %v855_v3 = vld [vmem:[%s963_s28] sm:$0xff]   ;;  %776 = vmatprep.subr.bf16.mxu0 %v854_v1  ;;  %v858_v6 = vld [vmem:[%s963_s28 + $0x8] sm:$0xff]   ;;  %v861_v9 = vld [vmem:[%s963_s28 + $0x10] sm:$0xff]  }
  0x1a   : > { %v856_v4 = vld [vmem:[%s963_s28 + $0x80] sm:$0xff]   ;;  %823 = vmatprep.mubr.msk.bf16.mxu1 %vm907_vm0, %v906_v2  ;;  %777 = vmatpush3.bf16.msra.mxu0 %v855_v3  ;;  %v859_v7 = vld [vmem:[%s963_s28 + $0x88] sm:$0xff]   ;;  %v862_v10 = vld [vmem:[%s963_s28 + $0x90] sm:$0xff]  }
  0x1b   : > { %808 = vmatpush3.bf16.msra.mxu1 %v856_v4  ;;  %778 = vmatprep.subr.bf16.mxu0 %v857_v5  ;;  %v863_v11 = vld [vmem:[%s963_s28 + $0x58] sm:$0xff]   ;;  %v866_v14 = vld [vmem:[%s963_s28 + $0x60] sm:$0xff]   ;;  %v869_v17 = vld [vmem:[%s963_s28 + $0x68] sm:$0xff]  }
  0x1c   : > { %809 = vmatprep.subr.bf16.mxu1 %v906_v2  ;;  %v864_v12 = vld [vmem:[%s963_s28 + $0x18] sm:$0xff]   ;;  %v867_v15 = vld [vmem:[%s963_s28 + $0x20] sm:$0xff]   ;;  %v870_v18 = vld [vmem:[%s963_s28 + $0x28] sm:$0xff]  }
  0x1d   : > { %v865_v13 = vld [vmem:[%s963_s28 + $0x98] sm:$0xff]   ;;  %v868_v16 = vld [vmem:[%s963_s28 + $0xa0] sm:$0xff]   ;;  %v871_v19 = vld [vmem:[%s963_s28 + $0xa8] sm:$0xff]  }
  0x1e   : > { %779 = vmatpush3.bf16.msra.mxu0 %v858_v6  ;;  %v872_v20 = vld [vmem:[%s963_s28 + $0x70] sm:$0xff]   ;;  %v875_v23 = vld [vmem:[%s963_s28 + $0x78] sm:$0xff]   ;;  %v307_v24 = vld [vmem:[%s958_s24] sm:$0xff] }
  0x1f   : > { %810 = vmatpush3.bf16.msra.mxu1 %v859_v7  ;;  %780 = vmatprep.subr.bf16.mxu0 %v860_v8  ;;  %v873_v21 = vld [vmem:[%s963_s28 + $0x30] sm:$0xff]   ;;  %v744_v25 = vcombine.high %v307_v24, %v307_v24  ;;  %v876_v26 = vld [vmem:[%s963_s28 + $0x38] sm:$0xff]   ;;  %v743_v28 = vcombine.low %v307_v24, %v307_v24  ;;  %v880_v29 = vld [vmem:[%s958_s24 + $0x8] ss:$0 sps:$4 sm:$0xff]  }
  0x20   : > { %811 = vmatprep.subr.bf16.mxu1 %v906_v2  ;;  %v874_v22 = vld [vmem:[%s963_s28 + $0xb0] sm:$0xff]   ;;  %v877_v27 = vld [vmem:[%s963_s28 + $0xb8] sm:$0xff]   ;;  %v306_v36 = vld [vmem:[#allocation2] sm:$0xff] }
  0x21   : > { %544 = vmatprep.mubr.bf16.mxu0 %v744_v25  ;;  %v771_v43 = vld [vmem:[%s1013_s2] ss:$0 sm:$0xff] (!%p770_p7) }
  0x22   : > { %781 = vmatpush3.bf16.msra.mxu0 %v861_v9  ;;  %v772_v44 = vld [vmem:[%s1014_s3] ss:$0 sm:$0xff] (!%p770_p7) }
  0x23   : > { %812 = vmatpush3.bf16.msra.mxu1 %v862_v10  ;;  %782 = vmatprep.subr.bf16.mxu0 %v863_v11 }
  0x24   : > { %813 = vmatprep.subr.bf16.mxu1 %v906_v2 }
  0x26   : > { %783 = vmatpush3.bf16.msra.mxu0 %v864_v12 }
  0x27   : > { %814 = vmatpush3.bf16.msra.mxu1 %v865_v13  ;;  %784 = vmatprep.subr.bf16.mxu0 %v866_v14 }
  0x28   : > { %815 = vmatprep.subr.bf16.mxu1 %v906_v2 }
  0x2a   : > { %785 = vmatpush3.bf16.msra.mxu0 %v867_v15 }
  0x2b   : > { %816 = vmatpush3.bf16.msra.mxu1 %v868_v16  ;;  %786 = vmatprep.subr.bf16.mxu0 %v869_v17 }
  0x2c   : > { %817 = vmatprep.subr.bf16.mxu1 %v906_v2 }
  0x2e   : > { %787 = vmatpush3.bf16.msra.mxu0 %v870_v18 }
  0x2f   : > { %818 = vmatpush3.bf16.msra.mxu1 %v871_v19  ;;  %788 = vmatprep.subr.bf16.mxu0 %v872_v20 }
  0x30   : > { %819 = vmatprep.subr.bf16.mxu1 %v906_v2 }
  0x32   : > { %789 = vmatpush3.bf16.msra.mxu0 %v873_v21 }
  0x33   : > { %820 = vmatpush3.bf16.msra.mxu1 %v874_v22  ;;  %790 = vmatprep.subr.bf16.mxu0 %v875_v23 }
  0x34   : > { %821 = vmatprep.subr.bf16.mxu1 %v906_v2 }
  0x36   : > { %791 = vmatpush3.bf16.msra.mxu0 %v876_v26 }
  0x37   : > { %822 = vmatpush3.bf16.msra.mxu1 %v877_v27 }
  0x39   : > { %545 = vmatmul.mubr.bf16.vlgmr.msra.gmra.mrb[0].mxu0 %v743_v28 }
  0x3a   : > { %824 = vmatmul.mubr.bf16.vlgmr.msra.gmra.mrb[0].mxu1 %v880_v29 }
 0x10c   : > { %v792_v30 = vpop.f32.mrb[0].mxu0 }
 0x10d   : > { %v586_v31 = vpop.f32.mrb[0].mxu1  ;;  %v793_v32 = vpop.f32.mrb[1].mxu0 }
 0x10e   : > { %v794_v33 = vadd.f32 %v793_v32, %v792_v30  ;;  %v825_v34 = vpop.f32.mrb[1].mxu1  ;;  %v795_v35 = vpop.f32.mrb[2].mxu0  ;;  %597 = sbr.rel (%p770_p7) target bundleno = 291 (0x123), region = 44 }
 0x10f   : > { %v589_v37 = vpop.f32.mrb[2].mxu1  ;;  %v796_v38 = vpop.f32.mrb[3].mxu0 }
 0x110   : > { %v587_v39 = vadd.f32 %v794_v33, %v586_v31  ;;  %v826_v40 = vpop.f32.mrb[3].mxu1 }
 0x112   : > { %v592_v41 = vadd.f32 %v587_v39, %v306_v36 }
 0x114   : > { %593 = vst [vmem:[#allocation2] sm:$0xff] %v592_v41 }
 0x11b   : > { %v598_v42 = vld [vmem:[#allocation2] sm:$0xff] }
 0x11c   : > { %v606_v45 = vmul.f32 %v771_v43, %v598_v42 }
 0x11e   : > { %v614_v46 = vadd.f32 %v772_v44, %v606_v45 }
 0x120   : > { %v615_v47 = vmax.f32 %v614_v46, 0.0 }
 0x122   : > { %616 = vst [vmem:[%s1015_s4] sm:$0xff] %v615_v47 }
 0x123 PF: > { %s14_s17 = sadd.s32 1, %s903_s17   ;;  %s1016_s15 = smov %s899_s16 }
 0x124   : > { %p11_p8 = scmp.ge.s32.totalorder %s14_s17, 5   ;;  %s1017_s16 = smov %s1019_s18 }
 0x126   :  { %13 = sbr.rel (!%p11_p8) target bundleno = 2 (0x2), region = 83 }

// kernel: pose_resnet_dann_forward.46
= control target key start
LH: loop header
LB: loop body
LE: loop exit
PB: predicated region body
PF: predicated region fallthrough
CT: control target
= control target key end

     0   :  { %s1234_s15 = smov 0   ;;  %s1236_s16 = smov 0   ;;  %s1483_s0 = inlined_call_operand.vmem [shape: bf16[8,1152], index: 0, kind: input, shape index: {}]   ;;  %s1484_s1 = inlined_call_operand.vmem [shape: bf16[1152,256], index: 1, kind: input, shape index: {}]   ;;  %s1485_s2 = inlined_call_operand.vmem [shape: f32[1,256], index: 2, kind: input, shape index: {}]   ;;  %s1486_s3 = inlined_call_operand.vmem [shape: f32[1,256], index: 3, kind: input, shape index: {}]   ;;  %s1487_s4 = inlined_call_operand.vmem [shape: f32[8,256], index: 4, kind: output, shape index: {}]  }
   0x1   :  { %s1238_s17 = smov 0   ;;  %s1240_s18 = smov 0  }
   0x2   :  { %s1242_s19 = smov 0   ;;  %s1244_s20 = smov 0  }
   0x3   :  { %s1246_s21 = smov 0  }
   0x4 LB: > { %s26_s22 = sadd.s32 1, %s1196_s19  ;;  %s29_s23 = sadd.s32 1, %s1200_s20  ;;  %s1204_s21 = sphi %s1246_s21, %s14_s21   ;;  %s1200_s20 = sphi %s1244_s20, %s1493_s20   ;;  %s1196_s19 = sphi %s1242_s19, %s1492_s19   ;;  %s1192_s18 = sphi %s1240_s18, %s1491_s18   ;;  %s1188_s17 = sphi %s1238_s17, %s1490_s17   ;;  %s1184_s16 = sphi %s1236_s16, %s1489_s16   ;;  %s1180_s15 = sphi %s1234_s15, %s1488_s15  }
   0x5   : > { %p27_p0 = scmp.ge.s32.totalorder %s26_s22, 3  ;;  %p77_p1 = scmp.ne.s32.totalorder %s1184_s16, %s1180_s15 }
   0x6   : > { %p78_p2 = scmp.eq.s32.totalorder %s1204_s21, 0  ;;  %s70_s27 = sadd.s32 1, %s1184_s16 }
   0x7   : > { %s1495_s22 = smov (%p27_p0, %s26_s22), 0  ;;  %s1497_s23 = smov (!%p27_p0, %s29_s23), %s1200_s20 }
   0x8   : > { %p79_p3 = por %p78_p2, %p77_p1  ;;  %p31_p4 = scmp.ge.s32.totalorder %s1497_s23, 2 }
   0x9   : > { %s65_s24 = ssub.s32 %s1196_s19, %s1495_s22  ;;  %p971_p6 = scmp.ge.s32.totalorder %s1204_s21, 6 }
   0xa   : > { %s1499_s23 = smov (%p31_p4, %s1497_s23), 0 }
   0xb   : > { %s66_s25 = ssub.s32 %s1200_s20, %s1499_s23  ;;  %183 = sbr.rel (%p971_p6) target bundleno = 57 (0x39), region = 16 }
   0xc   : > { %s67_s26 = sor.u32 %s66_s25, %s65_s24 }
   0xd   : > { %p68_p5 = scmp.eq.s32.totalorder %s67_s26, 0 }
   0xf   : > { %s1285_s28 = scalar_select %p68_p5, %s1184_s16, %s70_s27  }
  0x12   : > { %199 = sbr.rel (!%p79_p3) target bundleno = 57 (0x39), region = 24  ;;  %s201_s29 = sand.u32 (%p79_p3), 1, %s1184_s16  }
  0x13   : > { %s1010_s30 = smul.u32 (%p79_p3), 96, %s1196_s19 }
  0x14   : > { %s1062_s5 = smul.u32 (%p79_p3), 192, %s201_s29 }
  0x15   : > { %s206_s6 = sadd.s32 (%p79_p3), %s1200_s20, %s1010_s30 }
  0x16   : > { %s973_s7 = sshll.u32 (%p79_p3), %s206_s6, 2  ;;  %s1299_s11 = scalar_lea.vmem (%p79_p3), [#allocation3], %s1062_s5 }
  0x17   : > { %s1294_s10 = scalar_lea.vmem (%p79_p3), %s1484_s1, %s973_s7 }
  0x18   : > { %v224_v0 = vld [vmem:[%s1294_s10] sm:$0xf] (%p79_p3)  ;;  %v226_v1 = vld [vmem:[%s1294_s10 + $0x8] sm:$0xf] (%p79_p3)  ;;  %v228_v2 = vld [vmem:[%s1294_s10 + $0x10] sm:$0xf] (%p79_p3) }
  0x19   : > { %225 = vst [vmem:[%s1299_s11] sm:$0xf] %v224_v0  ;;  %227 = vst [vmem:[%s1299_s11 + $0x4] sm:$0xf] %v226_v1  ;;  %v230_v3 = vld [vmem:[%s1294_s10 + $0x18] sm:$0xf] }
  0x1a   : > { %229 = vst [vmem:[%s1299_s11 + $0x8] sm:$0xf] %v228_v2  ;;  %v232_v4 = vld [vmem:[%s1294_s10 + $0x20] sm:$0xf]  ;;  %v234_v5 = vld [vmem:[%s1294_s10 + $0x28] sm:$0xf] }
  0x1b   : > { %231 = vst [vmem:[%s1299_s11 + $0xc] sm:$0xf] %v230_v3  ;;  %233 = vst [vmem:[%s1299_s11 + $0x10] sm:$0xf] %v232_v4  ;;  %v236_v6 = vld [vmem:[%s1294_s10 + $0x30] sm:$0xf] }
  0x1c   : > { %235 = vst [vmem:[%s1299_s11 + $0x14] sm:$0xf] %v234_v5  ;;  %v238_v7 = vld [vmem:[%s1294_s10 + $0x38] sm:$0xf]  ;;  %v240_v8 = vld [vmem:[%s1294_s10 + $0x40] sm:$0xf] }
  0x1d   : > { %237 = vst [vmem:[%s1299_s11 + $0x18] sm:$0xf] %v236_v6  ;;  %239 = vst [vmem:[%s1299_s11 + $0x1c] sm:$0xf] %v238_v7  ;;  %v242_v9 = vld [vmem:[%s1294_s10 + $0x48] sm:$0xf] }
  0x1e   : > { %241 = vst [vmem:[%s1299_s11 + $0x20] sm:$0xf] %v240_v8  ;;  %v244_v10 = vld [vmem:[%s1294_s10 + $0x50] sm:$0xf]  ;;  %v246_v11 = vld [vmem:[%s1294_s10 + $0x58] sm:$0xf] }
  0x1f   : > { %243 = vst [vmem:[%s1299_s11 + $0x24] sm:$0xf] %v242_v9  ;;  %245 = vst [vmem:[%s1299_s11 + $0x28] sm:$0xf] %v244_v10  ;;  %v248_v12 = vld [vmem:[%s1294_s10 + $0x60] sm:$0xf] }
  0x20   : > { %247 = vst [vmem:[%s1299_s11 + $0x2c] sm:$0xf] %v246_v11  ;;  %v250_v13 = vld [vmem:[%s1294_s10 + $0x68] sm:$0xf]  ;;  %v252_v14 = vld [vmem:[%s1294_s10 + $0x70] sm:$0xf] }
  0x21   : > { %249 = vst [vmem:[%s1299_s11 + $0x30] sm:$0xf] %v248_v12  ;;  %251 = vst [vmem:[%s1299_s11 + $0x34] sm:$0xf] %v250_v13  ;;  %v254_v15 = vld [vmem:[%s1294_s10 + $0x78] sm:$0xf] }
  0x22   : > { %253 = vst [vmem:[%s1299_s11 + $0x38] sm:$0xf] %v252_v14  ;;  %v256_v16 = vld [vmem:[%s1294_s10 + $0x80] sm:$0xf]  ;;  %v258_v17 = vld [vmem:[%s1294_s10 + $0x88] sm:$0xf] }
  0x23   : > { %255 = vst [vmem:[%s1299_s11 + $0x3c] sm:$0xf] %v254_v15  ;;  %257 = vst [vmem:[%s1299_s11 + $0x40] sm:$0xf] %v256_v16  ;;  %v260_v18 = vld [vmem:[%s1294_s10 + $0x90] sm:$0xf] }
  0x24   : > { %259 = vst [vmem:[%s1299_s11 + $0x44] sm:$0xf] %v258_v17  ;;  %v262_v19 = vld [vmem:[%s1294_s10 + $0x98] sm:$0xf]  ;;  %v264_v20 = vld [vmem:[%s1294_s10 + $0xa0] sm:$0xf] }
  0x25   : > { %261 = vst [vmem:[%s1299_s11 + $0x48] sm:$0xf] %v260_v18  ;;  %263 = vst [vmem:[%s1299_s11 + $0x4c] sm:$0xf] %v262_v19  ;;  %v266_v21 = vld [vmem:[%s1294_s10 + $0xa8] sm:$0xf] }
  0x26   : > { %265 = vst [vmem:[%s1299_s11 + $0x50] sm:$0xf] %v264_v20  ;;  %v268_v22 = vld [vmem:[%s1294_s10 + $0xb0] sm:$0xf]  ;;  %v270_v23 = vld [vmem:[%s1294_s10 + $0xb8] sm:$0xf] }
  0x27   : > { %267 = vst [vmem:[%s1299_s11 + $0x54] sm:$0xf] %v266_v21  ;;  %269 = vst [vmem:[%s1299_s11 + $0x58] sm:$0xf] %v268_v22  ;;  %v272_v24 = vld [vmem:[%s1294_s10 + $0xc0] sm:$0xf] }
  0x28   : > { %271 = vst [vmem:[%s1299_s11 + $0x5c] sm:$0xf] %v270_v23  ;;  %v274_v25 = vld [vmem:[%s1294_s10 + $0xc8] sm:$0xf]  ;;  %v276_v26 = vld [vmem:[%s1294_s10 + $0xd0] sm:$0xf] }
  0x29   : > { %273 = vst [vmem:[%s1299_s11 + $0x60] sm:$0xf] %v272_v24  ;;  %275 = vst [vmem:[%s1299_s11 + $0x64] sm:$0xf] %v274_v25  ;;  %v278_v27 = vld [vmem:[%s1294_s10 + $0xd8] sm:$0xf] }
  0x2a   : > { %277 = vst [vmem:[%s1299_s11 + $0x68] sm:$0xf] %v276_v26  ;;  %v280_v28 = vld [vmem:[%s1294_s10 + $0xe0] sm:$0xf]  ;;  %v282_v29 = vld [vmem:[%s1294_s10 + $0xe8] sm:$0xf] }
  0x2b   : > { %279 = vst [vmem:[%s1299_s11 + $0x6c] sm:$0xf] %v278_v27  ;;  %281 = vst [vmem:[%s1299_s11 + $0x70] sm:$0xf] %v280_v28  ;;  %v284_v30 = vld [vmem:[%s1294_s10 + $0xf0] sm:$0xf] }
  0x2c   : > { %283 = vst [vmem:[%s1299_s11 + $0x74] sm:$0xf] %v282_v29  ;;  %v286_v31 = vld [vmem:[%s1294_s10 + $0xf8] sm:$0xf]  ;;  %v288_v32 = vld [vmem:[%s1294_s10 + $0x100] sm:$0xf] }
  0x2d   : > { %285 = vst [vmem:[%s1299_s11 + $0x78] sm:$0xf] %v284_v30  ;;  %287 = vst [vmem:[%s1299_s11 + $0x7c] sm:$0xf] %v286_v31  ;;  %v290_v33 = vld [vmem:[%s1294_s10 + $0x108] sm:$0xf] }
  0x2e   : > { %289 = vst [vmem:[%s1299_s11 + $0x80] sm:$0xf] %v288_v32  ;;  %v292_v34 = vld [vmem:[%s1294_s10 + $0x110] sm:$0xf]  ;;  %v294_v35 = vld [vmem:[%s1294_s10 + $0x118] sm:$0xf] }
  0x2f   : > { %291 = vst [vmem:[%s1299_s11 + $0x84] sm:$0xf] %v290_v33  ;;  %293 = vst [vmem:[%s1299_s11 + $0x88] sm:$0xf] %v292_v34  ;;  %v296_v36 = vld [vmem:[%s1294_s10 + $0x120] sm:$0xf] }
  0x30   : > { %295 = vst [vmem:[%s1299_s11 + $0x8c] sm:$0xf] %v294_v35  ;;  %v298_v37 = vld [vmem:[%s1294_s10 + $0x128] sm:$0xf]  ;;  %v300_v38 = vld [vmem:[%s1294_s10 + $0x130] sm:$0xf] }
  0x31   : > { %297 = vst [vmem:[%s1299_s11 + $0x90] sm:$0xf] %v296_v36  ;;  %299 = vst [vmem:[%s1299_s11 + $0x94] sm:$0xf] %v298_v37  ;;  %v302_v39 = vld [vmem:[%s1294_s10 + $0x138] sm:$0xf] }
  0x32   : > { %301 = vst [vmem:[%s1299_s11 + $0x98] sm:$0xf] %v300_v38  ;;  %v304_v40 = vld [vmem:[%s1294_s10 + $0x140] sm:$0xf]  ;;  %v306_v41 = vld [vmem:[%s1294_s10 + $0x148] sm:$0xf] }
  0x33   : > { %303 = vst [vmem:[%s1299_s11 + $0x9c] sm:$0xf] %v302_v39  ;;  %305 = vst [vmem:[%s1299_s11 + $0xa0] sm:$0xf] %v304_v40  ;;  %v308_v42 = vld [vmem:[%s1294_s10 + $0x150] sm:$0xf] }
  0x34   : > { %307 = vst [vmem:[%s1299_s11 + $0xa4] sm:$0xf] %v306_v41  ;;  %v310_v43 = vld [vmem:[%s1294_s10 + $0x158] sm:$0xf]  ;;  %v312_v44 = vld [vmem:[%s1294_s10 + $0x160] sm:$0xf] }
  0x35   : > { %309 = vst [vmem:[%s1299_s11 + $0xa8] sm:$0xf] %v308_v42  ;;  %311 = vst [vmem:[%s1299_s11 + $0xac] sm:$0xf] %v310_v43  ;;  %v314_v45 = vld [vmem:[%s1294_s10 + $0x168] sm:$0xf] }
  0x36   : > { %313 = vst [vmem:[%s1299_s11 + $0xb0] sm:$0xf] %v312_v44  ;;  %v316_v46 = vld [vmem:[%s1294_s10 + $0x170] sm:$0xf]  ;;  %v318_v47 = vld [vmem:[%s1294_s10 + $0x178] sm:$0xf] }
  0x37   : > { %315 = vst [vmem:[%s1299_s11 + $0xb4] sm:$0xf] %v314_v45  ;;  %317 = vst [vmem:[%s1299_s11 + $0xb8] sm:$0xf] %v316_v46 }
  0x38   : > { %319 = vst [vmem:[%s1299_s11 + $0xbc] sm:$0xf] %v318_v47 }
  0x39 PF: > { %p974_p7 = scmp.ge.s32.totalorder %s1204_s21, 1  ;;  %p449_p8 = scmp.lt.s32.totalorder %s1204_s21, 7 }
  0x3b   : > { %p450_p9 = pnand %p974_p7, %p449_p8 }
  0x3c   : > { %s456_s12 = sand.u32 (!%p450_p9), 1, %s1180_s15   ;;  %s499_s13 = smul.u32 (!%p450_p9), 3, %s1188_s17 }
  0x3d   : > { %453 = sbr.rel (%p450_p9) target bundleno = 345 (0x159), region = 73  ;;  %p510_p10 = scmp.lt.s32.totalorder (!%p450_p9), %s1192_s18, 1 }
  0x3e   : > { %s1063_s14 = smul.u32 (!%p450_p9), 192, %s456_s12  ;;  %p502_p11 = scmp.lt.s32.totalorder (!%p450_p9), %s499_s13, 8 }
  0x3f   : > { %p977_p12 = scmp.ne.s32.totalorder (!%p450_p9), %s1188_s17, 0 }
  0x40   : > { %s1421_s12 = scalar_lea.vmem (!%p450_p9), [#allocation3], %s1063_s14 }
  0x44   : > { %s1501_s13 = smov (!%p502_p11, %s499_s13), 8  ;;  %s1503_s18 = smov (!%p510_p10, %s1192_s18), 1 }
  0x45   : > { %s975_s24 = sshll.u32 %s1501_s13, 2  ;;  %s512_s15 = scalar_lea.vmem %s1485_s2, %s1503_s18  ;;  %v1206_v48 = vmov (!%p977_p12), 0.0  }
  0x46   : > { %s1405_s27 = scalar_lea.vmem %s1483_s0, %s975_s24  ;;  %s515_s7 = scalar_lea.vmem %s1486_s3, %s1503_s18  ;;  %529 = vst [vmem:[#allocation2] sm:$0xff] (!%p977_p12), %v1206_v48 }
  0x47   : > { %s976_s8 = sshll.u32 %s1503_s18, 3  ;;  %528 = sbr.rel (%p977_p12) target bundleno = 78 (0x4e), region = 81 }
  0x48   : > { %s1419_s11 = scalar_lea.vmem %s1487_s4, %s976_s8 }
  0x4e PF: > { %v1123_v49 = vld [vmem:[%s1421_s12 + $0x40] sm:$0xff]   ;;  %v1207_v50 = vmov 0.0   ;;  %vm1208_vm0 = vmmov 0   ;;  %v1126_v53 = vld [vmem:[%s1421_s12 + $0x48] sm:$0xff]   ;;  %v1129_v56 = vld [vmem:[%s1421_s12 + $0x50] sm:$0xff]   ;;  %p1005_p13 = scmp.ne.s32.totalorder %s1188_s17, 2 }
  0x4f   : > { %1042 = vmatprep.subr.bf16.mxu1 %v1207_v50  ;;  %v1124_v51 = vld [vmem:[%s1421_s12] sm:$0xff]   ;;  %1011 = vmatprep.subr.bf16.mxu0 %v1123_v49  ;;  %v1127_v54 = vld [vmem:[%s1421_s12 + $0x8] sm:$0xff]   ;;  %v1130_v57 = vld [vmem:[%s1421_s12 + $0x10] sm:$0xff]  }
  0x50   : > { %v1125_v52 = vld [vmem:[%s1421_s12 + $0x80] sm:$0xff]   ;;  %1058 = vmatprep.mubr.msk.bf16.mxu1 %vm1208_vm0, %v1207_v50  ;;  %1012 = vmatpush3.bf16.msra.mxu0 %v1124_v51  ;;  %v1128_v55 = vld [vmem:[%s1421_s12 + $0x88] sm:$0xff]   ;;  %v1131_v58 = vld [vmem:[%s1421_s12 + $0x90] sm:$0xff]  }
  0x51   : > { %1043 = vmatpush3.bf16.msra.mxu1 %v1125_v52  ;;  %1013 = vmatprep.subr.bf16.mxu0 %v1126_v53  ;;  %v1132_v59 = vld [vmem:[%s1421_s12 + $0x58] sm:$0xff]   ;;  %v1135_v62 = vld [vmem:[%s1421_s12 + $0x60] sm:$0xff]   ;;  %v1138_v1 = vld [vmem:[%s1421_s12 + $0x68] sm:$0xff]  }
  0x52   : > { %1044 = vmatprep.subr.bf16.mxu1 %v1207_v50  ;;  %v1133_v60 = vld [vmem:[%s1421_s12 + $0x18] sm:$0xff]   ;;  %v1136_v63 = vld [vmem:[%s1421_s12 + $0x20] sm:$0xff]   ;;  %v1139_v2 = vld [vmem:[%s1421_s12 + $0x28] sm:$0xff]  }
  0x53   : > { %v1134_v61 = vld [vmem:[%s1421_s12 + $0x98] sm:$0xff]   ;;  %v1137_v0 = vld [vmem:[%s1421_s12 + $0xa0] sm:$0xff]   ;;  %v1140_v3 = vld [vmem:[%s1421_s12 + $0xa8] sm:$0xff]  }
  0x54   : > { %1014 = vmatpush3.bf16.msra.mxu0 %v1127_v54  ;;  %v1141_v4 = vld [vmem:[%s1421_s12 + $0x70] sm:$0xff]   ;;  %v1144_v7 = vld [vmem:[%s1421_s12 + $0x78] sm:$0xff]   ;;  %v1149_v13 = vld [vmem:[%s1405_s27 + $0x8] ss:$0 sps:$4 sm:$0xff]  }
  0x55   : > { %1045 = vmatpush3.bf16.msra.mxu1 %v1128_v55  ;;  %1015 = vmatprep.subr.bf16.mxu0 %v1129_v56  ;;  %v1142_v5 = vld [vmem:[%s1421_s12 + $0x30] sm:$0xff]   ;;  %v531_v8 = vld [vmem:[%s1405_s27] sm:$0xff] }
  0x56   : > { %1046 = vmatprep.subr.bf16.mxu1 %v1207_v50  ;;  %v1143_v6 = vld [vmem:[%s1421_s12 + $0xb0] sm:$0xff]   ;;  %v979_v9 = vcombine.high %v531_v8, %v531_v8  ;;  %v1145_v10 = vld [vmem:[%s1421_s12 + $0x38] sm:$0xff]   ;;  %v978_v12 = vcombine.low %v531_v8, %v531_v8 }
  0x57   : > { %v1146_v11 = vld [vmem:[%s1421_s12 + $0xb8] sm:$0xff]  }
  0x58   : > { %1016 = vmatpush3.bf16.msra.mxu0 %v1130_v57  ;;  %768 = vmatprep.mubr.bf16.mxu0 %v979_v9  ;;  %v530_v20 = vld [vmem:[#allocation2] sm:$0xff] }
  0x59   : > { %1047 = vmatpush3.bf16.msra.mxu1 %v1131_v58  ;;  %1017 = vmatprep.subr.bf16.mxu0 %v1132_v59  ;;  %v1006_v27 = vld [vmem:[%s512_s15] ss:$0 sm:$0xff] (!%p1005_p13) }
  0x5a   : > { %1048 = vmatprep.subr.bf16.mxu1 %v1207_v50  ;;  %v1007_v28 = vld [vmem:[%s515_s7] ss:$0 sm:$0xff] (!%p1005_p13) }
  0x5c   : > { %1018 = vmatpush3.bf16.msra.mxu0 %v1133_v60 }
  0x5d   : > { %1049 = vmatpush3.bf16.msra.mxu1 %v1134_v61  ;;  %1019 = vmatprep.subr.bf16.mxu0 %v1135_v62 }
  0x5e   : > { %1050 = vmatprep.subr.bf16.mxu1 %v1207_v50 }
  0x60   : > { %1020 = vmatpush3.bf16.msra.mxu0 %v1136_v63 }
  0x61   : > { %1051 = vmatpush3.bf16.msra.mxu1 %v1137_v0  ;;  %1021 = vmatprep.subr.bf16.mxu0 %v1138_v1 }
  0x62   : > { %1052 = vmatprep.subr.bf16.mxu1 %v1207_v50 }
  0x64   : > { %1022 = vmatpush3.bf16.msra.mxu0 %v1139_v2 }
  0x65   : > { %1053 = vmatpush3.bf16.msra.mxu1 %v1140_v3  ;;  %1023 = vmatprep.subr.bf16.mxu0 %v1141_v4 }
  0x66   : > { %1054 = vmatprep.subr.bf16.mxu1 %v1207_v50 }
  0x68   : > { %1024 = vmatpush3.bf16.msra.mxu0 %v1142_v5 }
  0x69   : > { %1055 = vmatpush3.bf16.msra.mxu1 %v1143_v6  ;;  %1025 = vmatprep.subr.bf16.mxu0 %v1144_v7 }
  0x6a   : > { %1056 = vmatprep.subr.bf16.mxu1 %v1207_v50 }
  0x6c   : > { %1026 = vmatpush3.bf16.msra.mxu0 %v1145_v10 }
  0x6d   : > { %1057 = vmatpush3.bf16.msra.mxu1 %v1146_v11 }
  0x6f   : > { %769 = vmatmul.mubr.bf16.vlgmr.msra.gmra.mrb[0].mxu0 %v978_v12 }
  0x70   : > { %1059 = vmatmul.mubr.bf16.vlgmr.msra.gmra.mrb[0].mxu1 %v1149_v13 }
 0x142   : > { %v1027_v14 = vpop.f32.mrb[0].mxu0 }
 0x143   : > { %v810_v15 = vpop.f32.mrb[0].mxu1  ;;  %v1028_v16 = vpop.f32.mrb[1].mxu0 }
 0x144   : > { %v1029_v17 = vadd.f32 %v1028_v16, %v1027_v14  ;;  %v1060_v18 = vpop.f32.mrb[1].mxu1  ;;  %v1030_v19 = vpop.f32.mrb[2].mxu0  ;;  %821 = sbr.rel (%p1005_p13) target bundleno = 345 (0x159), region = 85 }
 0x145   : > { %v813_v21 = vpop.f32.mrb[2].mxu1  ;;  %v1031_v22 = vpop.f32.mrb[3].mxu0 }
 0x146   : > { %v811_v23 = vadd.f32 %v1029_v17, %v810_v15  ;;  %v1061_v24 = vpop.f32.mrb[3].mxu1 }
 0x148   : > { %v816_v25 = vadd.f32 %v811_v23, %v530_v20 }
 0x14a   : > { %817 = vst [vmem:[#allocation2] sm:$0xff] %v816_v25 }
 0x151   : > { %v822_v26 = vld [vmem:[#allocation2] sm:$0xff] }
 0x152   : > { %v830_v29 = vmul.f32 %v1006_v27, %v822_v26 }
 0x154   : > { %v838_v30 = vadd.f32 %v1007_v28, %v830_v29 }
 0x156   : > { %v839_v31 = vmax.f32 %v838_v30, 0.0 }
 0x158   : > { %840 = vst [vmem:[%s1419_s11] sm:$0xff] %v839_v31 }
 0x159 PF: > { %s14_s21 = sadd.s32 1, %s1204_s21   ;;  %s1488_s15 = smov %s1184_s16 }
 0x15a   : > { %p11_p0 = scmp.ge.s32.totalorder %s14_s21, 8   ;;  %s1489_s16 = smov %s1285_s28 }
 0x15b   : > { %s1490_s17 = smov %s1196_s19  ;;  %s1491_s18 = smov %s1200_s20 }
 0x15c   : > { %s1492_s19 = smov %s1495_s22  ;;  %s1493_s20 = smov %s1499_s23 }
 0x15d   :  { %13 = sbr.rel (!%p11_p0) target bundleno = 4 (0x4), region = 129 }

// kernel: pose_resnet_dann_forward.47
= control target key start
LH: loop header
LB: loop body
LE: loop exit
PB: predicated region body
PF: predicated region fallthrough
CT: control target
= control target key end

     0   :  { %s862_s15 = smov 0   ;;  %s864_s16 = smov 0   ;;  %s1003_s0 = inlined_call_operand.vmem [shape: bf16[8,640], index: 0, kind: input, shape index: {}]   ;;  %s1004_s1 = inlined_call_operand.vmem [shape: bf16[640,256], index: 1, kind: input, shape index: {}]   ;;  %s1005_s2 = inlined_call_operand.vmem [shape: f32[1,256], index: 2, kind: input, shape index: {}]   ;;  %s1006_s3 = inlined_call_operand.vmem [shape: f32[1,256], index: 3, kind: input, shape index: {}]   ;;  %s1007_s4 = inlined_call_operand.vmem [shape: f32[8,256], index: 4, kind: output, shape index: {}]  }
   0x1   :  { %s866_s17 = smov 0   ;;  %s868_s18 = smov 0  }
   0x2   :  { %s870_s19 = smov 0   ;;  %s872_s20 = smov 0  }
   0x3   :  { %s874_s21 = smov 0  }
   0x4 LB: > { %s26_s22 = sadd.s32 1, %s824_s19  ;;  %s29_s23 = sadd.s32 1, %s828_s20  ;;  %s832_s21 = sphi %s874_s21, %s14_s21   ;;  %s828_s20 = sphi %s872_s20, %s1013_s20   ;;  %s824_s19 = sphi %s870_s19, %s1012_s19   ;;  %s820_s18 = sphi %s868_s18, %s1011_s18   ;;  %s816_s17 = sphi %s866_s17, %s1010_s17   ;;  %s812_s16 = sphi %s864_s16, %s1009_s16   ;;  %s808_s15 = sphi %s862_s15, %s1008_s15  }
   0x5   : > { %p27_p0 = scmp.ge.s32.totalorder %s26_s22, 5  ;;  %p77_p1 = scmp.ne.s32.totalorder %s812_s16, %s808_s15 }
   0x6   : > { %p78_p2 = scmp.eq.s32.totalorder %s832_s21, 0  ;;  %s70_s27 = sadd.s32 1, %s812_s16 }
   0x7   : > { %s1015_s22 = smov (%p27_p0, %s26_s22), 0  ;;  %s1017_s23 = smov (!%p27_p0, %s29_s23), %s828_s20 }
   0x8   : > { %p79_p3 = por %p78_p2, %p77_p1  ;;  %p31_p4 = scmp.ge.s32.totalorder %s1017_s23, 2 }
   0x9   : > { %s65_s24 = ssub.s32 %s824_s19, %s1015_s22  ;;  %p658_p6 = scmp.ge.s32.totalorder %s832_s21, 10 }
   0xa   : > { %s1019_s23 = smov (%p31_p4, %s1017_s23), 0 }
   0xb   : > { %s66_s25 = ssub.s32 %s828_s20, %s1019_s23  ;;  %183 = sbr.rel (%p658_p6) target bundleno = 34 (0x22), region = 16 }
   0xc   : > { %s67_s26 = sor.u32 %s66_s25, %s65_s24 }
   0xd   : > { %p68_p5 = scmp.eq.s32.totalorder %s67_s26, 0 }
   0xf   : > { %s913_s28 = scalar_select %p68_p5, %s812_s16, %s70_s27  }
  0x12   : > { %197 = sbr.rel (!%p79_p3) target bundleno = 34 (0x22), region = 24  ;;  %s199_s29 = sand.u32 (%p79_p3), 1, %s812_s16  }
  0x13   : > { %s681_s30 = sshll.u32 (%p79_p3), %s824_s19, 5  ;;  %s659_s5 = sshll.u32 (%p79_p3), %s199_s29, 6 }
  0x14   : > { %s204_s6 = sadd.s32 (%p79_p3), %s828_s20, %s681_s30  ;;  %s201_s11 = scalar_lea.vmem (%p79_p3), [#allocation3], %s659_s5 }
  0x15   : > { %s662_s7 = sshll.u32 (%p79_p3), %s204_s6, 2 }
  0x16   : > { %s922_s10 = scalar_lea.vmem (%p79_p3), %s1004_s1, %s662_s7 }
  0x17   : > { %v222_v0 = vld [vmem:[%s922_s10] sm:$0xf] (%p79_p3)  ;;  %v224_v1 = vld [vmem:[%s922_s10 + $0x8] sm:$0xf] (%p79_p3)  ;;  %v226_v2 = vld [vmem:[%s922_s10 + $0x10] sm:$0xf] (%p79_p3) }
  0x18   : > { %223 = vst [vmem:[%s201_s11] sm:$0xf] (%p79_p3), %v222_v0  ;;  %225 = vst [vmem:[%s201_s11 + $0x4] sm:$0xf] (%p79_p3), %v224_v1  ;;  %v228_v3 = vld [vmem:[%s922_s10 + $0x18] sm:$0xf] (%p79_p3) }
  0x19   : > { %227 = vst [vmem:[%s201_s11 + $0x8] sm:$0xf] %v226_v2  ;;  %v230_v4 = vld [vmem:[%s922_s10 + $0x20] sm:$0xf]  ;;  %v232_v5 = vld [vmem:[%s922_s10 + $0x28] sm:$0xf] }
  0x1a   : > { %229 = vst [vmem:[%s201_s11 + $0xc] sm:$0xf] %v228_v3  ;;  %231 = vst [vmem:[%s201_s11 + $0x10] sm:$0xf] %v230_v4  ;;  %v234_v6 = vld [vmem:[%s922_s10 + $0x30] sm:$0xf] }
  0x1b   : > { %233 = vst [vmem:[%s201_s11 + $0x14] sm:$0xf] %v232_v5  ;;  %v236_v7 = vld [vmem:[%s922_s10 + $0x38] sm:$0xf]  ;;  %v238_v8 = vld [vmem:[%s922_s10 + $0x40] sm:$0xf] }
  0x1c   : > { %235 = vst [vmem:[%s201_s11 + $0x18] sm:$0xf] %v234_v6  ;;  %237 = vst [vmem:[%s201_s11 + $0x1c] sm:$0xf] %v236_v7  ;;  %v240_v9 = vld [vmem:[%s922_s10 + $0x48] sm:$0xf] }
  0x1d   : > { %239 = vst [vmem:[%s201_s11 + $0x20] sm:$0xf] %v238_v8  ;;  %v242_v10 = vld [vmem:[%s922_s10 + $0x50] sm:$0xf]  ;;  %v244_v11 = vld [vmem:[%s922_s10 + $0x58] sm:$0xf] }
  0x1e   : > { %241 = vst [vmem:[%s201_s11 + $0x24] sm:$0xf] %v240_v9  ;;  %243 = vst [vmem:[%s201_s11 + $0x28] sm:$0xf] %v242_v10  ;;  %v246_v12 = vld [vmem:[%s922_s10 + $0x60] sm:$0xf] }
  0x1f   : > { %245 = vst [vmem:[%s201_s11 + $0x2c] sm:$0xf] %v244_v11  ;;  %v248_v13 = vld [vmem:[%s922_s10 + $0x68] sm:$0xf]  ;;  %v250_v14 = vld [vmem:[%s922_s10 + $0x70] sm:$0xf] }
  0x20   : > { %247 = vst [vmem:[%s201_s11 + $0x30] sm:$0xf] %v246_v12  ;;  %249 = vst [vmem:[%s201_s11 + $0x34] sm:$0xf] %v248_v13  ;;  %v252_v15 = vld [vmem:[%s922_s10 + $0x78] sm:$0xf] }
  0x21   : > { %251 = vst [vmem:[%s201_s11 + $0x38] sm:$0xf] %v250_v14  ;;  %253 = vst [vmem:[%s201_s11 + $0x3c] sm:$0xf] %v252_v15 }
  0x22 PF: > { %p663_p7 = scmp.ge.s32.totalorder %s832_s21, 1  ;;  %p319_p8 = scmp.lt.s32.totalorder %s832_s21, 11 }
  0x24   : > { %p320_p9 = pnand %p663_p7, %p319_p8 }
  0x25   : > { %s326_s12 = sand.u32 (!%p320_p9), 1, %s808_s15   ;;  %p370_p10 = scmp.lt.s32.totalorder (!%p320_p9), %s816_s17, 4 }
  0x26   : > { %323 = sbr.rel (%p320_p9) target bundleno = 315 (0x13b), region = 73  ;;  %s664_s13 = sshll.u32 (!%p320_p9), %s326_s12, 6 }
  0x27   : > { %p377_p11 = scmp.lt.s32.totalorder (!%p320_p9), %s820_s18, 1  ;;  %s328_s12 = scalar_lea.vmem (!%p320_p9), [#allocation3], %s664_s13 }
  0x28   : > { %p667_p12 = scmp.ne.s32.totalorder (!%p320_p9), %s816_s17, 0 }
  0x2d   : > { %s371_s14 = scalar_select %p370_p10, %s816_s17, 4 }
  0x2e   : > { %s1021_s18 = smov (!%p377_p11, %s820_s18), 1  ;;  %395 = sbr.rel (%p667_p12) target bundleno = 53 (0x35), region = 81 }
  0x2f   : > { %s665_s24 = sshll.u32 %s371_s14, 2  ;;  %s379_s5 = scalar_lea.vmem %s1005_s2, %s1021_s18  ;;  %v834_v16 = vmov (!%p667_p12), 0.0  }
  0x30   : > { %s952_s27 = scalar_lea.vmem %s1003_s0, %s665_s24  ;;  %s382_s7 = scalar_lea.vmem %s1006_s3, %s1021_s18  ;;  %396 = vst [vmem:[#allocation2] sm:$0xff] (!%p667_p12), %v834_v16 }
  0x31   : > { %s666_s8 = sshll.u32 %s1021_s18, 3 }
  0x32   : > { %s966_s11 = scalar_lea.vmem %s1007_s4, %s666_s8 }
  0x35 PF: > { %v770_v17 = vld [vmem:[%s328_s12] sm:$0xff]   ;;  %v835_v18 = vmov 0.0   ;;  %v771_v19 = vld [vmem:[%s328_s12 + $0x8] sm:$0xff]   ;;  %vm836_vm0 = vmmov 0   ;;  %v772_v20 = vld [vmem:[%s328_s12 + $0x10] sm:$0xff]   ;;  %p676_p13 = scmp.ne.s32.totalorder %s816_s17, 4 }
  0x36   : > { %691 = vmatprep.subr.bf16.mxu0 %v835_v18  ;;  %707 = vmatprep.mubr.msk.bf16.mxu0 %vm836_vm0, %v835_v18  ;;  %v773_v21 = vld [vmem:[%s328_s12 + $0x18] sm:$0xff]   ;;  %v774_v22 = vld [vmem:[%s328_s12 + $0x20] sm:$0xff]   ;;  %v775_v23 = vld [vmem:[%s328_s12 + $0x28] sm:$0xff]  }
  0x37   : > { %692 = vmatpush3.bf16.msra.mxu0 %v770_v17  ;;  %v776_v24 = vld [vmem:[%s328_s12 + $0x30] sm:$0xff]   ;;  %v777_v25 = vld [vmem:[%s328_s12 + $0x38] sm:$0xff]  }
  0x38   : > { %693 = vmatprep.subr.bf16.mxu0 %v835_v18  ;;  %v398_v26 = vld [vmem:[%s952_s27] sm:$0xf] }
  0x39   : > { %v397_v27 = vld [vmem:[#allocation2] sm:$0xff] }
  0x3a   : > { %v677_v34 = vld [vmem:[%s379_s5] ss:$0 sm:$0xff] (!%p676_p13) }
  0x3b   : > { %694 = vmatpush3.bf16.msra.mxu0 %v771_v19  ;;  %v678_v35 = vld [vmem:[%s382_s7] ss:$0 sm:$0xff] (!%p676_p13) }
  0x3c   : > { %695 = vmatprep.subr.bf16.mxu0 %v835_v18 }
  0x3f   : > { %696 = vmatpush3.bf16.msra.mxu0 %v772_v20 }
  0x40   : > { %697 = vmatprep.subr.bf16.mxu0 %v835_v18 }
  0x43   : > { %698 = vmatpush3.bf16.msra.mxu0 %v773_v21 }
  0x44   : > { %699 = vmatprep.subr.bf16.mxu0 %v835_v18 }
  0x47   : > { %700 = vmatpush3.bf16.msra.mxu0 %v774_v22 }
  0x48   : > { %701 = vmatprep.subr.bf16.mxu0 %v835_v18 }
  0x4b   : > { %702 = vmatpush3.bf16.msra.mxu0 %v775_v23 }
  0x4c   : > { %703 = vmatprep.subr.bf16.mxu0 %v835_v18 }
  0x4f   : > { %704 = vmatpush3.bf16.msra.mxu0 %v776_v24 }
  0x50   : > { %705 = vmatprep.subr.bf16.mxu0 %v835_v18 }
  0x53   : > { %706 = vmatpush3.bf16.msra.mxu0 %v777_v25 }
  0x56   : > { %708 = vmatmul.mubr.bf16.vlgmr.msra.gmra.mrb[0].mxu0 %v398_v26 }
 0x126   : > { %508 = sbr.rel (%p676_p13) target bundleno = 315 (0x13b), region = 85 }
 0x129   : > { %v497_v28 = vpop.f32.mrb[0].mxu0 }
 0x12a   : > { %v503_v29 = vadd.f32 %v497_v28, %v397_v27  ;;  %v709_v30 = vpop.f32.mrb[1].mxu0 }
 0x12b   : > { %v500_v31 = vpop.f32.mrb[2].mxu0 }
 0x12c   : > { %504 = vst [vmem:[#allocation2] sm:$0xff] %v503_v29  ;;  %v710_v32 = vpop.f32.mrb[3].mxu0 }
 0x133   : > { %v509_v33 = vld [vmem:[#allocation2] sm:$0xff] }
 0x134   : > { %v517_v36 = vmul.f32 %v677_v34, %v509_v33 }
 0x136   : > { %v525_v37 = vadd.f32 %v678_v35, %v517_v36 }
 0x138   : > { %v526_v38 = vmax.f32 %v525_v37, 0.0 }
 0x13a   : > { %527 = vst [vmem:[%s966_s11] sm:$0xff] %v526_v38 }
 0x13b PF: > { %s14_s21 = sadd.s32 1, %s832_s21   ;;  %s1008_s15 = smov %s812_s16 }
 0x13c   : > { %p11_p0 = scmp.ge.s32.totalorder %s14_s21, 12   ;;  %s1009_s16 = smov %s913_s28 }
 0x13d   : > { %s1010_s17 = smov %s824_s19  ;;  %s1011_s18 = smov %s828_s20 }
 0x13e   : > { %s1012_s19 = smov %s1015_s22  ;;  %s1013_s20 = smov %s1019_s23 }
 0x13f   :  { %13 = sbr.rel (!%p11_p0) target bundleno = 4 (0x4), region = 129 }

// kernel: pose_resnet_dann_forward.48
= control target key start
LH: loop header
LB: loop body
LE: loop exit
PB: predicated region body
PF: predicated region fallthrough
CT: control target
= control target key end

     0   :  { %s1288_s0 = inlined_call_operand.vmem [shape: bf16[32,640], index: 0, kind: input, shape index: {}]   ;;  %s1289_s1 = inlined_call_operand.vmem [shape: bf16[640,256], index: 1, kind: input, shape index: {}]   ;;  %s1290_s2 = inlined_call_operand.vmem [shape: f32[1,256], index: 2, kind: input, shape index: {}]   ;;  %s1291_s3 = inlined_call_operand.vmem [shape: f32[1,256], index: 3, kind: input, shape index: {}]   ;;  %s1292_s4 = inlined_call_operand.vmem [shape: f32[32,256], index: 4, kind: output, shape index: {}]  }
   0x1   :  { %1295 = sst [smem:[#allocation8_spill]] %s1288_s0 }
   0x2   :  { %1296 = sst [smem:[#allocation9_spill]] %s1289_s1 }
   0x3   :  { %s1061_s15 = smov 0   ;;  %s1063_s16 = smov 0  }
   0x4   :  { %s1065_s17 = smov 0   ;;  %s1067_s18 = smov 0  }
   0x5   :  { %s1069_s19 = smov 0   ;;  %s1071_s20 = smov 0  }
   0x6   :  { %s1073_s21 = smov 0   ;;  %s1075_s22 = smov 0  }
   0x7   :  { %s1077_s23 = smov 0   ;;  %s1079_s24 = smov 0  }
   0x8   :  { %s1081_s25 = smov 0  }
   0x9 LB: > { %s785_s26 = sadd.s32 4294967295, %s1033_s25   ;;  %s26_s27 = sadd.s32 1, %s1025_s23  ;;  %s1033_s25 = sphi %s1081_s25, %s14_s25   ;;  %s1029_s24 = sphi %s1079_s24, %s1315_s24   ;;  %s1025_s23 = sphi %s1077_s23, %s1314_s23   ;;  %s1021_s22 = sphi %s1075_s22, %s1313_s22   ;;  %s1017_s21 = sphi %s1073_s21, %s1312_s21   ;;  %s1013_s20 = sphi %s1071_s20, %s1311_s20   ;;  %s1009_s19 = sphi %s1069_s19, %s1310_s19   ;;  %s1005_s18 = sphi %s1067_s18, %s1309_s18   ;;  %s1001_s17 = sphi %s1065_s17, %s1308_s17   ;;  %s997_s16 = sphi %s1063_s16, %s1307_s16   ;;  %s993_s15 = sphi %s1061_s15, %s1306_s15  }
   0xa   : > { %p27_p0 = scmp.ge.s32.totalorder %s26_s27, 5  ;;  %s29_s28 = sadd.s32 1, %s1029_s24 }
   0xb   : > { %s42_s29 = sadd.s32 1, %s1013_s20  ;;  %p49_p1 = scmp.ne.s32.totalorder %s1013_s20, %s1009_s19 }
   0xc   : > { %s1317_s27 = smov (%p27_p0, %s26_s27), 0  ;;  %s1319_s28 = smov (!%p27_p0, %s29_s28), %s1029_s24 }
   0xd   : > { %1297 = sst [smem:[#allocation6_spill]] %s1317_s27  ;;  %s38_s30 = ssub.s32 %s1025_s23, %s1317_s27 }
   0xe   : > { %p50_p2 = scmp.eq.s32.totalorder %s1033_s25, 0  ;;  %p31_p3 = scmp.ge.s32.totalorder %s1319_s28, 2 }
   0xf   : > { %p40_p4 = scmp.eq.s32.totalorder %s38_s30, 0  ;;  %s70_s6 = sadd.s32 1, %s1005_s18 }
  0x10   : > { %p1128_p5 = por %p50_p2, %p49_p1  ;;  %s1321_s28 = smov (%p31_p3, %s1319_s28), 0 }
  0x11   : > { %1299 = sst [smem:[#allocation7_spill]] %s1321_s28  ;;  %s66_s8 = ssub.s32 %s1029_s24, %s1321_s28 }
  0x12   : > { %s1136_s7 = scalar_select %p40_p4, %s1013_s20, %s42_s29  }
  0x13   : > { %p77_p6 = scmp.ne.s32.totalorder %s1005_s18, %s1001_s17  ;;  %s67_s9 = sor.u32 %s66_s8, %s38_s30 }
  0x14   : > { %p148_p7 = scmp.eq.s32.totalorder %s66_s8, 0  ;;  %p68_p8 = scmp.eq.s32.totalorder %s67_s9, 0 }
  0x15   : > { %p1142_p9 = por %p77_p6, %p50_p2  ;;  %s150_s11 = sadd.s32 1, %s997_s16 }
  0x16   : > { %p160_p10 = scmp.ne.s32.totalorder %s997_s16, %s993_s15  ;;  %p161_p11 = scmp.eq.s32.totalorder %s785_s26, 9 }
  0x17   : > { %s1150_s12 = scalar_select %p68_p8, %s1005_s18, %s70_s6  }
  0x18   : > { %s1153_s13 = scalar_select %p148_p7, %s997_s16, %s150_s11  }
  0x19   : > { %p1155_p12 = por %p161_p11, %p160_p10  ;;  %p788_p13 = scmp.ge.s32.totalorder %s1033_s25, 10 }
  0x1b   : > { %183 = sbr.rel (%p788_p13) target bundleno = 66 (0x42), region = 16 }
  0x22   : > { %186 = sbr.rel (!%p1128_p5) target bundleno = 46 (0x2e), region = 20  ;;  %s188_s29 = sand.u32 (%p1128_p5), 1, %s1013_s20  }
  0x23   : > { %s790_s30 = sshll.u32 (%p1128_p5), %s1025_s23, 2  ;;  %s789_s8 = sshll.u32 (%p1128_p5), %s188_s29, 4 }
  0x24   : > { %s1302_s0 = sld [smem:[#allocation8_spill]] (%p1128_p5)  ;;  %s190_s26 = scalar_lea.vmem (%p1128_p5), [#allocation3], %s789_s8 }
  0x2a   : > { %s195_s11 = scalar_lea.vmem %s1302_s0, %s790_s30 }
  0x2b   : > { %v211_v0 = vld [vmem:[%s195_s11] sm:$0xf]  ;;  %v213_v1 = vld [vmem:[%s195_s11 + $0x14] sm:$0xf]  ;;  %v215_v2 = vld [vmem:[%s195_s11 + $0x28] sm:$0xf] }
  0x2c   : > { %212 = vst [vmem:[%s190_s26] sm:$0xf] %v211_v0  ;;  %214 = vst [vmem:[%s190_s26 + $0x4] sm:$0xf] %v213_v1  ;;  %v217_v3 = vld [vmem:[%s195_s11 + $0x3c] sm:$0xf] }
  0x2d   : > { %216 = vst [vmem:[%s190_s26 + $0x8] sm:$0xf] %v215_v2  ;;  %218 = vst [vmem:[%s190_s26 + $0xc] sm:$0xf] %v217_v3 }
  0x2e PF: > { %249 = sbr.rel (!%p1142_p9) target bundleno = 66 (0x42), region = 61  ;;  %s251_s5 = sand.u32 (%p1142_p9), 1, %s1005_s18  }
  0x2f   : > { %s817_s29 = sshll.u32 (%p1142_p9), %s1025_s23, 5  ;;  %s791_s6 = sshll.u32 (%p1142_p9), %s251_s5, 6 }
  0x30   : > { %s256_s30 = sadd.s32 (%p1142_p9), %s1029_s24, %s817_s29  ;;  %s1303_s1 = sld [smem:[#allocation9_spill]] (%p1142_p9) }
  0x31   : > { %s794_s9 = sshll.u32 (%p1142_p9), %s256_s30, 2  ;;  %s253_s10 = scalar_lea.vmem (%p1142_p9), [#allocation4], %s791_s6 }
  0x36   : > { %s1175_s28 = scalar_lea.vmem %s1303_s1, %s794_s9 }
  0x37   : > { %v274_v4 = vld [vmem:[%s1175_s28] sm:$0xf]  ;;  %v276_v5 = vld [vmem:[%s1175_s28 + $0x8] sm:$0xf]  ;;  %v278_v6 = vld [vmem:[%s1175_s28 + $0x10] sm:$0xf] }
  0x38   : > { %275 = vst [vmem:[%s253_s10] sm:$0xf] %v274_v4  ;;  %277 = vst [vmem:[%s253_s10 + $0x4] sm:$0xf] %v276_v5  ;;  %v280_v7 = vld [vmem:[%s1175_s28 + $0x18] sm:$0xf] }
  0x39   : > { %279 = vst [vmem:[%s253_s10 + $0x8] sm:$0xf] %v278_v6  ;;  %v282_v8 = vld [vmem:[%s1175_s28 + $0x20] sm:$0xf]  ;;  %v284_v9 = vld [vmem:[%s1175_s28 + $0x28] sm:$0xf] }
  0x3a   : > { %281 = vst [vmem:[%s253_s10 + $0xc] sm:$0xf] %v280_v7  ;;  %283 = vst [vmem:[%s253_s10 + $0x10] sm:$0xf] %v282_v8  ;;  %v286_v10 = vld [vmem:[%s1175_s28 + $0x30] sm:$0xf] }
  0x3b   : > { %285 = vst [vmem:[%s253_s10 + $0x14] sm:$0xf] %v284_v9  ;;  %v288_v11 = vld [vmem:[%s1175_s28 + $0x38] sm:$0xf]  ;;  %v290_v12 = vld [vmem:[%s1175_s28 + $0x40] sm:$0xf] }
  0x3c   : > { %287 = vst [vmem:[%s253_s10 + $0x18] sm:$0xf] %v286_v10  ;;  %289 = vst [vmem:[%s253_s10 + $0x1c] sm:$0xf] %v288_v11  ;;  %v292_v13 = vld [vmem:[%s1175_s28 + $0x48] sm:$0xf] }
  0x3d   : > { %291 = vst [vmem:[%s253_s10 + $0x20] sm:$0xf] %v290_v12  ;;  %v294_v14 = vld [vmem:[%s1175_s28 + $0x50] sm:$0xf]  ;;  %v296_v15 = vld [vmem:[%s1175_s28 + $0x58] sm:$0xf] }
  0x3e   : > { %293 = vst [vmem:[%s253_s10 + $0x24] sm:$0xf] %v292_v13  ;;  %295 = vst [vmem:[%s253_s10 + $0x28] sm:$0xf] %v294_v14  ;;  %v298_v16 = vld [vmem:[%s1175_s28 + $0x60] sm:$0xf] }
  0x3f   : > { %297 = vst [vmem:[%s253_s10 + $0x2c] sm:$0xf] %v296_v15  ;;  %v300_v17 = vld [vmem:[%s1175_s28 + $0x68] sm:$0xf]  ;;  %v302_v18 = vld [vmem:[%s1175_s28 + $0x70] sm:$0xf] }
  0x40   : > { %299 = vst [vmem:[%s253_s10 + $0x30] sm:$0xf] %v298_v16  ;;  %301 = vst [vmem:[%s253_s10 + $0x34] sm:$0xf] %v300_v17  ;;  %v304_v19 = vld [vmem:[%s1175_s28 + $0x78] sm:$0xf] }
  0x41   : > { %303 = vst [vmem:[%s253_s10 + $0x38] sm:$0xf] %v302_v18  ;;  %305 = vst [vmem:[%s253_s10 + $0x3c] sm:$0xf] %v304_v19 }
  0x42 PF: > { %p795_p0 = scmp.ge.s32.totalorder %s1033_s25, 1  ;;  %p371_p1 = scmp.lt.s32.totalorder %s1033_s25, 11 }
  0x44   : > { %p372_p2 = pnand %p795_p0, %p371_p1 }
  0x45   : > { %s378_s0 = sand.u32 (!%p372_p2), 1, %s1009_s19   ;;  %s385_s11 = sand.u32 (!%p372_p2), 1, %s1001_s17  }
  0x46   : > { %375 = sbr.rel (%p372_p2) target bundleno = 358 (0x166), region = 110  ;;  %s1197_s26 = sshll.u32 (!%p372_p2), %s378_s0, 4 }
  0x47   : > { %s797_s28 = sshll.u32 (!%p372_p2), %s385_s11, 6  ;;  %s416_s5 = sand.u32 (!%p372_p2), 1, %s993_s15  }
  0x48   : > { %p421_p3 = scmp.lt.s32.totalorder (!%p372_p2), %s1021_s22, 1  ;;  %s798_s29 = sshll.u32 (!%p372_p2), %s416_s5, 5 }
  0x49   : > { %s380_s17 = scalar_lea.vmem (!%p372_p2), [#allocation3], %s1197_s26  ;;  %s1213_s0 = scalar_lea.vmem (!%p372_p2), [#allocation4], %s797_s28 }
  0x4a   : > { %s1215_s27 = scalar_lea.vmem (!%p372_p2), [#allocation5], %s798_s29  ;;  %p799_p4 = scmp.ne.s32.totalorder (!%p372_p2), %s1017_s21, 0 }
  0x4d   : > { %s1202_s6 = scalar_select %p421_p3, %s1021_s22, 1 }
  0x4e   : > { %432 = sbr.rel (%p799_p4) target bundleno = 85 (0x55), region = 122  ;;  %v1035_v20 = vmov (!%p799_p4), 0.0  }
  0x4f   : > { %s423_s8 = scalar_lea.vmem %s1290_s2, %s1202_s6  ;;  %s426_s19 = scalar_lea.vmem %s1291_s3, %s1202_s6  ;;  %433 = vst [vmem:[#allocation2] sm:$0xff] (!%p799_p4), %v1035_v20  ;;  %434 = vst [vmem:[#allocation2 + $0x8] sm:$0xff] (!%p799_p4), %v1035_v20 }
  0x50   : > { %435 = vst [vmem:[#allocation2 + $0x10] sm:$0xff] (!%p799_p4), %v1035_v20  ;;  %436 = vst [vmem:[#allocation2 + $0x18] sm:$0xff] (!%p799_p4), %v1035_v20 }
  0x55 PF: > { %v937_v21 = vld [vmem:[%s1213_s0] sm:$0xff]   ;;  %v938_v22 = vld [vmem:[%s1213_s0 + $0x8] sm:$0xff]   ;;  %v939_v23 = vld [vmem:[%s1213_s0 + $0x10] sm:$0xff]   ;;  %p810_p5 = scmp.ne.s32.totalorder %s1017_s21, 4 }
  0x56   : > { %828 = vmatprep.subr.bf16.mxu0 %v937_v21  ;;  %v940_v24 = vld [vmem:[%s1213_s0 + $0x18] sm:$0xff]   ;;  %v945_v25 = vld [vmem:[%s380_s17] sm:$0xff]   ;;  %v942_v27 = vld [vmem:[%s1213_s0 + $0x28] sm:$0xff]  }
  0x57   : > { %829 = vmatpush3.bf16.msra.mxu0 %v937_v21  ;;  %844 = vmatprep.mubr.bf16.mxu0 %v945_v25  ;;  %v941_v26 = vld [vmem:[%s1213_s0 + $0x20] sm:$0xff]   ;;  %v943_v28 = vld [vmem:[%s1213_s0 + $0x30] sm:$0xff]   ;;  %v944_v29 = vld [vmem:[%s1213_s0 + $0x38] sm:$0xff]  }
  0x58   : > { %830 = vmatprep.subr.bf16.mxu0 %v938_v22  ;;  %v946_v30 = vld [vmem:[%s380_s17 + $0x8] sm:$0xff]   ;;  %v439_v31 = vld [vmem:[#allocation2 + $0x10] sm:$0xff]  ;;  %v437_v32 = vld [vmem:[#allocation2] sm:$0xff] }
  0x59   : > { %v440_v34 = vld [vmem:[#allocation2 + $0x18] sm:$0xff]  ;;  %v438_v37 = vld [vmem:[#allocation2 + $0x8] sm:$0xff]  ;;  %v811_v44 = vld [vmem:[%s423_s8] ss:$0 sm:$0xff] (!%p810_p5) }
  0x5a   : > { %v812_v45 = vld [vmem:[%s426_s19] ss:$0 sm:$0xff] (!%p810_p5) }
  0x5b   : > { %831 = vmatpush3.bf16.msra.mxu0 %v938_v22 }
  0x5c   : > { %832 = vmatprep.subr.bf16.mxu0 %v939_v23 }
  0x5f   : > { %833 = vmatpush3.bf16.msra.mxu0 %v939_v23 }
  0x60   : > { %834 = vmatprep.subr.bf16.mxu0 %v940_v24 }
  0x63   : > { %835 = vmatpush3.bf16.msra.mxu0 %v940_v24 }
  0x64   : > { %836 = vmatprep.subr.bf16.mxu0 %v941_v26 }
  0x67   : > { %837 = vmatpush3.bf16.msra.mxu0 %v941_v26 }
  0x68   : > { %838 = vmatprep.subr.bf16.mxu0 %v942_v27 }
  0x6b   : > { %839 = vmatpush3.bf16.msra.mxu0 %v942_v27 }
  0x6c   : > { %840 = vmatprep.subr.bf16.mxu0 %v943_v28 }
  0x6f   : > { %841 = vmatpush3.bf16.msra.mxu0 %v943_v28 }
  0x70   : > { %842 = vmatprep.subr.bf16.mxu0 %v944_v29 }
  0x73   : > { %843 = vmatpush3.bf16.msra.mxu0 %v944_v29 }
  0x76   : > { %845 = vmatmul.mubr.bf16.vlgmr.msra.gmra.mrb[0].mxu0 %v946_v30 }
 0x149   : > { %v846_v33 = vpop.f32.mrb[0].mxu0  ;;  %581 = sbr.rel (%p810_p5) target bundleno = 350 (0x15e), region = 126 }
 0x14a   : > { %v572_v35 = vadd.f32 %v846_v33, %v439_v31  ;;  %v555_v36 = vpop.f32.mrb[1].mxu0 }
 0x14b   : > { %v570_v38 = vadd.f32 %v555_v36, %v437_v32  ;;  %v847_v39 = vpop.f32.mrb[2].mxu0 }
 0x14c   : > { %576 = vst [vmem:[#allocation2 + $0x10] sm:$0xff] %v572_v35  ;;  %v573_v40 = vadd.f32 %v847_v39, %v440_v34  ;;  %v558_v41 = vpop.f32.mrb[3].mxu0 }
 0x14d   : > { %574 = vst [vmem:[#allocation2] sm:$0xff] %v570_v38  ;;  %v571_v42 = vadd.f32 %v558_v41, %v438_v37 }
 0x14e   : > { %577 = vst [vmem:[#allocation2 + $0x18] sm:$0xff] %v573_v40 }
 0x14f   : > { %575 = vst [vmem:[#allocation2 + $0x8] sm:$0xff] %v571_v42 }
 0x153   : > { %v584_v48 = vld [vmem:[#allocation2 + $0x10] sm:$0xff] }
 0x154   : > { %v582_v43 = vld [vmem:[#allocation2] sm:$0xff]  ;;  %v595_v51 = vmul.f32 %v811_v44, %v584_v48 }
 0x155   : > { %v593_v46 = vmul.f32 %v811_v44, %v582_v43  ;;  %v585_v49 = vld [vmem:[#allocation2 + $0x18] sm:$0xff] }
 0x156   : > { %v583_v47 = vld [vmem:[#allocation2 + $0x8] sm:$0xff]  ;;  %v596_v52 = vmul.f32 %v811_v44, %v585_v49  ;;  %v606_v55 = vadd.f32 %v812_v45, %v595_v51 }
 0x157   : > { %v594_v50 = vmul.f32 %v811_v44, %v583_v47  ;;  %v604_v53 = vadd.f32 %v812_v45, %v593_v46 }
 0x158   : > { %v607_v56 = vadd.f32 %v812_v45, %v596_v52  ;;  %v610_v59 = vmax.f32 %v606_v55, 0.0 }
 0x159   : > { %v605_v54 = vadd.f32 %v812_v45, %v594_v50  ;;  %v608_v57 = vmax.f32 %v604_v53, 0.0 }
 0x15a   : > { %v611_v60 = vmax.f32 %v607_v56, 0.0  ;;  %614 = vst [vmem:[%s1215_s27 + $0x10] sm:$0xff] %v610_v59 }
 0x15b   : > { %v609_v58 = vmax.f32 %v605_v54, 0.0  ;;  %612 = vst [vmem:[%s1215_s27] sm:$0xff] %v608_v57 }
 0x15c   : > { %615 = vst [vmem:[%s1215_s27 + $0x18] sm:$0xff] %v611_v60 }
 0x15d   : > { %613 = vst [vmem:[%s1215_s27 + $0x8] sm:$0xff] %v609_v58 }
 0x15e PF: > { %622 = sbr.rel (!%p1155_p12) target bundleno = 358 (0x166), region = 130  ;;  %s814_s21 = sshll.u32 (%p1155_p12), %s1021_s22, 3 }
 0x15f   : > { %s627_s29 = scalar_lea.vmem (%p1155_p12), %s1292_s4, %s814_s21 }
 0x161   : > { %v665_v63 = vld [vmem:[%s1215_s27 + $0x10] sm:$0xff] (%p1155_p12) }
 0x162   : > { %v661_v61 = vld [vmem:[%s1215_s27] sm:$0xff] (%p1155_p12)  ;;  %666 = vst [vmem:[%s627_s29 + $0x20] sm:$0xff] (%p1155_p12), %v665_v63 }
 0x163   : > { %v667_v0 = vld [vmem:[%s1215_s27 + $0x18] sm:$0xff] (%p1155_p12)  ;;  %662 = vst [vmem:[%s627_s29] sm:$0xff] (%p1155_p12), %v661_v61 }
 0x164   : > { %v663_v62 = vld [vmem:[%s1215_s27 + $0x8] sm:$0xff] (%p1155_p12)  ;;  %668 = vst [vmem:[%s627_s29 + $0x30] sm:$0xff] (%p1155_p12), %v667_v0 }
 0x165   : > { %664 = vst [vmem:[%s627_s29 + $0x10] sm:$0xff] %v663_v62 }
 0x166 PF: > { %s14_s25 = sadd.s32 1, %s1033_s25   ;;  %s1304_s14 = sld [smem:[#allocation6_spill]] }
 0x167   : > { %p11_p6 = scmp.ge.s32.totalorder %s14_s25, 12   ;;  %s1305_s6 = sld [smem:[#allocation7_spill]] }
 0x168   : > { %s1306_s15 = smov %s997_s16  ;;  %s1307_s16 = smov %s1153_s13 }
 0x169   : > { %s1308_s17 = smov %s1005_s18  ;;  %s1309_s18 = smov %s1150_s12 }
 0x16a   : > { %s1310_s19 = smov %s1013_s20  ;;  %s1311_s20 = smov %s1136_s7 }
 0x16b   : > { %s1312_s21 = smov %s1025_s23  ;;  %s1313_s22 = smov %s1029_s24 }
 0x16c   : > { %s1314_s23 = smov %s1304_s14  ;;  %13 = sbr.rel (!%p11_p6) target bundleno = 9 (0x9), region = 213 }
 0x16d   : > { %s1315_s24 = smov %s1305_s6 }

// kernel: pose_resnet_dann_forward.49
= control target key start
LH: loop header
LB: loop body
LE: loop exit
PB: predicated region body
PF: predicated region fallthrough
CT: control target
= control target key end

     0   :  { %s621_s1 = inlined_call_operand.vmem [shape: bf16[128,128], index: 1, kind: input, shape index: {}]   ;;  %s622_s0 = inlined_call_operand.vmem [shape: bf16[128,128], index: 0, kind: input, shape index: {}]   ;;  %s623_s2 = inlined_call_operand.vmem [shape: f32[1,128], index: 2, kind: input, shape index: {}]   ;;  %s624_s3 = inlined_call_operand.vmem [shape: f32[1,128], index: 3, kind: input, shape index: {}]   ;;  %s625_s4 = inlined_call_operand.vmem [shape: f32[128,128], index: 4, kind: output, shape index: {}]  }
   0x1   :  { %v478_v0 = vld [vmem:[%s621_s1] sm:$0xff]   ;;  %v479_v1 = vld [vmem:[%s621_s1 + $0x8] sm:$0xff]   ;;  %v480_v2 = vld [vmem:[%s621_s1 + $0x10] sm:$0xff]  }
   0x2   :  { %430 = vmatprep.subr.bf16.mxu0 %v478_v0  ;;  %462 = vmatprep.subr.bf16.mxu1 %v478_v0  ;;  %v481_v3 = vld [vmem:[%s621_s1 + $0x18] sm:$0xff]   ;;  %v486_v4 = vld [vmem:[%s622_s0] sm:$0xff]   ;;  %v483_v7 = vld [vmem:[%s621_s1 + $0x28] sm:$0xff]  }
   0x3   :  { %431 = vmatpush3.bf16.msra.mxu0 %v478_v0  ;;  %470 = vmatpush3.bf16.msra.mxu1 %v478_v0  ;;  %v487_v5 = vld [vmem:[%s622_s0 + $0x20] sm:$0xff]   ;;  %v484_v8 = vld [vmem:[%s621_s1 + $0x30] sm:$0xff]   ;;  %v485_v9 = vld [vmem:[%s621_s1 + $0x38] sm:$0xff]  }
   0x4   :  { %432 = vmatprep.subr.bf16.mxu0 %v479_v1  ;;  %463 = vmatprep.subr.bf16.mxu1 %v479_v1  ;;  %v482_v6 = vld [vmem:[%s621_s1 + $0x20] sm:$0xff]   ;;  %v488_v10 = vld [vmem:[%s622_s0 + $0x8] sm:$0xff]   ;;  %v490_v12 = vld [vmem:[%s622_s0 + $0x10] sm:$0xff]  }
   0x5   :  { %446 = vmatprep.mubr.bf16.mxu0 %v486_v4  ;;  %454 = vmatprep.mubr.bf16.mxu1 %v487_v5  ;;  %v489_v11 = vld [vmem:[%s622_s0 + $0x28] sm:$0xff]   ;;  %v491_v13 = vld [vmem:[%s622_s0 + $0x30] sm:$0xff]   ;;  %v492_v14 = vld [vmem:[%s622_s0 + $0x18] sm:$0xff]  }
   0x6   :  { %v493_v15 = vld [vmem:[%s622_s0 + $0x38] sm:$0xff]   ;;  %v412_v16 = vld [vmem:[%s623_s2] ss:$0 sm:$0xff] }
   0x7   :  { %433 = vmatpush3.bf16.msra.mxu0 %v479_v1  ;;  %471 = vmatpush3.bf16.msra.mxu1 %v479_v1  ;;  %v413_v18 = vld [vmem:[%s624_s3] ss:$0 sm:$0xff] }
   0x8   :  { %434 = vmatprep.subr.bf16.mxu0 %v480_v2  ;;  %464 = vmatprep.subr.bf16.mxu1 %v480_v2 }
   0xb   :  { %435 = vmatpush3.bf16.msra.mxu0 %v480_v2  ;;  %472 = vmatpush3.bf16.msra.mxu1 %v480_v2 }
   0xc   :  { %436 = vmatprep.subr.bf16.mxu0 %v481_v3  ;;  %465 = vmatprep.subr.bf16.mxu1 %v481_v3 }
   0xf   :  { %437 = vmatpush3.bf16.msra.mxu0 %v481_v3  ;;  %473 = vmatpush3.bf16.msra.mxu1 %v481_v3 }
  0x10   :  { %438 = vmatprep.subr.bf16.mxu0 %v482_v6  ;;  %466 = vmatprep.subr.bf16.mxu1 %v482_v6 }
  0x13   :  { %439 = vmatpush3.bf16.msra.mxu0 %v482_v6  ;;  %474 = vmatpush3.bf16.msra.mxu1 %v482_v6 }
  0x14   :  { %440 = vmatprep.subr.bf16.mxu0 %v483_v7  ;;  %467 = vmatprep.subr.bf16.mxu1 %v483_v7 }
  0x17   :  { %441 = vmatpush3.bf16.msra.mxu0 %v483_v7  ;;  %475 = vmatpush3.bf16.msra.mxu1 %v483_v7 }
  0x18   :  { %442 = vmatprep.subr.bf16.mxu0 %v484_v8  ;;  %468 = vmatprep.subr.bf16.mxu1 %v484_v8 }
  0x1b   :  { %443 = vmatpush3.bf16.msra.mxu0 %v484_v8  ;;  %476 = vmatpush3.bf16.msra.mxu1 %v484_v8 }
  0x1c   :  { %444 = vmatprep.subr.bf16.mxu0 %v485_v9  ;;  %469 = vmatprep.subr.bf16.mxu1 %v485_v9 }
  0x1f   :  { %445 = vmatpush3.bf16.msra.mxu0 %v485_v9  ;;  %477 = vmatpush3.bf16.msra.mxu1 %v485_v9 }
  0x22   :  { %447 = vmatmul.mubr.bf16.vlgmr.msra.gmra.mrb[0].mxu0 %v488_v10  ;;  %455 = vmatmul.mubr.bf16.vlgmr.msra.gmra.mrb[0].mxu1 %v489_v11 }
  0x23   :  { %450 = vmatprep.mubr.bf16.mxu0 %v490_v12  ;;  %458 = vmatprep.mubr.bf16.mxu1 %v491_v13 }
  0x2a   :  { %451 = vmatmul.mubr.bf16.gmra.mrb[4].mxu0 %v492_v14  ;;  %459 = vmatmul.mubr.bf16.gmra.mrb[4].mxu1 %v493_v15 }
  0xf5   :  { %v448_v17 = vpop.f32.mrb[0].mxu0  ;;  %v456_v19 = vpop.f32.mrb[0].mxu1 }
  0xf6   :  { %v339_v20 = vmul.f32 %v448_v17, %v412_v16  ;;  %v347_v21 = vmul.f32 %v456_v19, %v412_v16  ;;  %v216_v22 = vpop.f32.mrb[1].mxu0  ;;  %v248_v23 = vpop.f32.mrb[1].mxu1 }
  0xf7   :  { %v337_v24 = vmul.f32 %v412_v16, %v216_v22  ;;  %v345_v25 = vmul.f32 %v412_v16, %v248_v23  ;;  %v449_v26 = vpop.f32.mrb[2].mxu0  ;;  %v457_v27 = vpop.f32.mrb[2].mxu1 }
  0xf8   :  { %v362_v28 = vadd.f32 %v413_v18, %v339_v20  ;;  %v370_v29 = vadd.f32 %v413_v18, %v347_v21  ;;  %v340_v30 = vmul.f32 %v449_v26, %v412_v16  ;;  %v348_v31 = vmul.f32 %v457_v27, %v412_v16  ;;  %v219_v32 = vpop.f32.mrb[3].mxu0  ;;  %v251_v33 = vpop.f32.mrb[3].mxu1 }
  0xf9   :  { %v360_v34 = vadd.f32 %v413_v18, %v337_v24  ;;  %v368_v35 = vadd.f32 %v413_v18, %v345_v25  ;;  %v338_v36 = vmul.f32 %v412_v16, %v219_v32  ;;  %v346_v37 = vmul.f32 %v412_v16, %v251_v33 }
  0xfa   :  { %378 = vst [vmem:[%s625_s4 + $0x10] sm:$0xff] %v362_v28  ;;  %386 = vst [vmem:[%s625_s4 + $0x50] sm:$0xff] %v370_v29  ;;  %v363_v38 = vadd.f32 %v413_v18, %v340_v30  ;;  %v371_v39 = vadd.f32 %v413_v18, %v348_v31 }
  0xfb   :  { %376 = vst [vmem:[%s625_s4] sm:$0xff] %v360_v34  ;;  %384 = vst [vmem:[%s625_s4 + $0x40] sm:$0xff] %v368_v35  ;;  %v361_v40 = vadd.f32 %v413_v18, %v338_v36  ;;  %v369_v41 = vadd.f32 %v413_v18, %v346_v37 }
  0xfc   :  { %379 = vst [vmem:[%s625_s4 + $0x18] sm:$0xff] %v363_v38  ;;  %387 = vst [vmem:[%s625_s4 + $0x58] sm:$0xff] %v371_v39 }
  0xfd   :  { %377 = vst [vmem:[%s625_s4 + $0x8] sm:$0xff] %v361_v40  ;;  %385 = vst [vmem:[%s625_s4 + $0x48] sm:$0xff] %v369_v41  ;;  %v452_v42 = vpop.f32.mrb[4].mxu0  ;;  %v460_v43 = vpop.f32.mrb[4].mxu1 }
  0xfe   :  { %v343_v44 = vmul.f32 %v452_v42, %v412_v16  ;;  %v351_v45 = vmul.f32 %v460_v43, %v412_v16  ;;  %v232_v46 = vpop.f32.mrb[5].mxu0  ;;  %v264_v47 = vpop.f32.mrb[5].mxu1 }
  0xff   :  { %v341_v48 = vmul.f32 %v412_v16, %v232_v46  ;;  %v349_v49 = vmul.f32 %v412_v16, %v264_v47  ;;  %v453_v50 = vpop.f32.mrb[6].mxu0  ;;  %v461_v51 = vpop.f32.mrb[6].mxu1 }
 0x100   :  { %v366_v52 = vadd.f32 %v413_v18, %v343_v44  ;;  %v374_v53 = vadd.f32 %v413_v18, %v351_v45  ;;  %v344_v54 = vmul.f32 %v453_v50, %v412_v16  ;;  %v352_v55 = vmul.f32 %v461_v51, %v412_v16  ;;  %v235_v56 = vpop.f32.mrb[7].mxu0  ;;  %v267_v57 = vpop.f32.mrb[7].mxu1 }
 0x101   :  { %v364_v58 = vadd.f32 %v413_v18, %v341_v48  ;;  %v372_v59 = vadd.f32 %v413_v18, %v349_v49  ;;  %v342_v60 = vmul.f32 %v412_v16, %v235_v56  ;;  %v350_v61 = vmul.f32 %v412_v16, %v267_v57 }
 0x102   :  { %382 = vst [vmem:[%s625_s4 + $0x30] sm:$0xff] %v366_v52  ;;  %390 = vst [vmem:[%s625_s4 + $0x70] sm:$0xff] %v374_v53  ;;  %v367_v62 = vadd.f32 %v413_v18, %v344_v54  ;;  %v375_v63 = vadd.f32 %v413_v18, %v352_v55 }
 0x103   :  { %380 = vst [vmem:[%s625_s4 + $0x20] sm:$0xff] %v364_v58  ;;  %388 = vst [vmem:[%s625_s4 + $0x60] sm:$0xff] %v372_v59  ;;  %v365_v0 = vadd.f32 %v413_v18, %v342_v60  ;;  %v373_v1 = vadd.f32 %v413_v18, %v350_v61 }
 0x104   :  { %383 = vst [vmem:[%s625_s4 + $0x38] sm:$0xff] %v367_v62  ;;  %391 = vst [vmem:[%s625_s4 + $0x78] sm:$0xff] %v375_v63 }
 0x105   :  { %381 = vst [vmem:[%s625_s4 + $0x28] sm:$0xff] %v365_v0  ;;  %389 = vst [vmem:[%s625_s4 + $0x68] sm:$0xff] %v373_v1 }

</bundles_post_ra>
